<compile_context>
chip_gen: v6e
topology: v6e:2x2x1
jax: 0.10.0
libtpu: 0.0.40
codegen_flags: <defaults>
</compile_context>

<pallas_src>
import functools

import jax
import jax.numpy as jnp
from jax.experimental import pallas as pl
from jax.experimental.pallas import tpu as pltpu


def _round_up(a: int, m: int) -> int:
    return ((a + m - 1) // m) * m


def _tpu_info():
    try:
        return pltpu.get_tpu_info()
    except Exception:
        return None


def _vmem_capacity_bytes() -> int:
    info = _tpu_info()
    if info is not None:
        for attr in ("vmem_capacity_bytes", "vmem_bytes"):
            v = getattr(info, attr, None)
            if isinstance(v, int) and v > 0:
                return v
    return 64 * 1024 * 1024          # conservative default (v7x per-core VMEM)


def _num_tensorcores() -> int:
    info = _tpu_info()
    if info is not None:
        for attr in ("tensorcores_per_chip", "num_tensorcores",
                     "tensorcore_count", "cores_per_chip"):
            v = getattr(info, attr, None)
            if isinstance(v, int) and v > 0:
                return v
    try:
        if "7" in jax.devices()[0].device_kind:
            return 2                 # v7x: 2 TensorCores per chip
    except Exception:
        pass
    return 1                         # v5e / v6e: single TensorCore


def _fused_dilated_inception_kernel(x_ref, w_ref, b_ref, o_ref, *,
                                    taps, c_in, seq_len):
    """Fused multi-branch dilated (1, k) conv over time (weight-stationary).

    x_ref: (L_pad, c_in, Rb)           padded input, rows lane-minor
    w_ref: (c_out_total, taps*c_in)    dense fused taps (zero where unused)
    b_ref: (c_out_total, 1)            fused bias
    o_ref: (seq_len, c_out_total, Rb)  output, rows lane-minor (dense stores)
    """
    c_out = w_ref.shape[0]
    rb = o_ref.shape[-1]

    w = w_ref[...]                                        # resident all loop
    bias = jnp.broadcast_to(b_ref[...], (c_out, rb))      # hoisted broadcast

    # TODO(synk): for very large seq_len switch to lax.fori_loop with a
    # pl.ds window to bound unrolled code size.
    for l in range(seq_len):
        # (taps, c_in, rb) tap window -> (taps*c_in, rb).  c_in % 8 == 0 and
        # rb % 128 == 0, so this collapse is a pure tile reinterpretation
        # (no relayout) and feeds one deep-contraction MXU matmul.
        rhs = x_ref[l:l + taps, :, :].reshape(taps * c_in, rb)
        acc = jnp.dot(w, rhs, preferred_element_type=jnp.float32)   # (c_out, rb)
        o_ref[l] = (acc + bias).astype(o_ref.dtype)


def fused_dilated_inception_rows(x_t, w_flat, b_all, *, seq_len, taps,
                                 rows_per_block, vmem_limit_bytes=None):
    """Runs the fused inception conv on rows-minor data.

    x_t:    (L_pad, c_in, rows_pad)   rows_pad % rows_per_block == 0
    w_flat: (c_out_total, taps*c_in)
    b_all:  (c_out_total,)
    returns (seq_len, c_out_total, rows_pad)
    """
    L_pad, c_in, r_pad = x_t.shape
    c_out_total, k_dim = w_flat.shape
    assert k_dim == taps * c_in
    assert L_pad == seq_len + taps - 1
    rb = rows_per_block
    assert rb % 128 == 0 and r_pad % rb == 0

    itemsize = jnp.dtype(x_t.dtype).itemsize
    if vmem_limit_bytes is None:
        in_blk = L_pad * c_in * rb * itemsize
        out_blk = seq_len * c_out_total * rb * itemsize
        need = 2 * (in_blk + out_blk) \
            + 2 * c_out_total * (k_dim + 1) * itemsize + (8 << 20)
        vmem_limit_bytes = int(min(_vmem_capacity_bytes(),
                                   max(need, 32 << 20)))

    kernel = functools.partial(_fused_dilated_inception_kernel,
                               taps=taps, c_in=c_in, seq_len=seq_len)
    return pl.pallas_call(
        kernel,
        out_shape=jax.ShapeDtypeStruct((seq_len, c_out_total, r_pad),
                                       x_t.dtype),
        grid_spec=pltpu.PrefetchScalarGridSpec(
            num_scalar_prefetch=0,
            grid=(r_pad // rb,),
            in_specs=[
                pl.BlockSpec((L_pad, c_in, rb), lambda i: (0, 0, i)),
                pl.BlockSpec((c_out_total, k_dim), lambda i: (0, 0)),
                pl.BlockSpec((c_out_total, 1), lambda i: (0, 0)),
            ],
            out_specs=pl.BlockSpec((seq_len, c_out_total, rb),
                                   lambda i: (0, 0, i)),
        ),
        compiler_params=pltpu.CompilerParams(
            dimension_semantics=("parallel",),
            vmem_limit_bytes=vmem_limit_bytes),
    )(x_t, w_flat, b_all.reshape(c_out_total, 1))


def _fuse_branch_params(params, kernel_set, dilation, c_in, c_in_pad, taps,
                        left_max):
    """Zero-embeds all branch kernels into one dense (taps, c_in_pad,
    c_out_total) tensor so every branch's 'same' alignment coincides, then
    flattens to match the (taps*c_in_pad, rb) tap-window layout."""
    c_out_per = params[0][0].shape[-1]
    c_out_total = c_out_per * len(kernel_set)
    dtype = params[0][0].dtype
    w_dense = jnp.zeros((taps, c_in_pad, c_out_total), dtype)
    biases = []
    for j, ((w, b), k) in enumerate(zip(params, kernel_set)):
        left_k = (dilation * (k - 1)) // 2
        shift = left_max - left_k
        for p in range(k):
            w_dense = w_dense.at[
                shift + p * dilation, :c_in,
                j * c_out_per:(j + 1) * c_out_per].set(w[p])
        biases.append(b.reshape(-1))
    # w_flat[co, tau*c_in_pad + ci] == w_dense[tau, ci, co], matching the
    # collapsed tap-window row order inside the kernel.
    w_flat = jnp.transpose(w_dense, (2, 0, 1)).reshape(c_out_total,
                                                       taps * c_in_pad)
    b_all = jnp.concatenate(biases)
    return w_flat, b_all


def dilated_inception_forward(x, params, kernel_set, dilation_factor,
                              rows_per_block=None):
    """x: (B, c_in, N, L) NCHW -> (B, c_out_total, N, L)."""
    B, c_in, N, L = x.shape
    d = dilation_factor
    k_max = max(kernel_set)
    total_pad = d * (k_max - 1)
    taps = total_pad + 1
    # PyTorch padding='same': left = total//2, extra pad on the right.
    left = total_pad // 2
    right = total_pad - left
    c_in_p = _round_up(c_in, 8)          # sublane-align the fused contraction
    c_out_total = params[0][0].shape[-1] * len(kernel_set)
    L_pad = L + taps - 1

    w_flat, b_all = _fuse_branch_params(params, kernel_set, d, c_in, c_in_p,
                                        taps, left)

    rows = B * N
    itemsize = jnp.dtype(x.dtype).itemsize

    # Row-tile selection (core-count and VMEM-budget aware):
    #  - single-TC v5e/v6e: one full-width grid step (no per-step overhead),
    #  - v7x (2 TCs): keep >= 2 parallel steps so both cores get work,
    #  - cap rb so 2x double-buffered in + out blocks fit ~60% of per-core
    #    VMEM (v7x only has 64 MiB).
    n_tc = _num_tensorcores()
    vmem_cap = _vmem_capacity_bytes()
    bytes_per_lane_row = (L_pad * c_in_p + L * c_out_total) * itemsize
    rb_vmem = max(128, (int(vmem_cap * 0.6) // (2 * bytes_per_lane_row))
                  // 128 * 128)
    rb_cores = max(128, _round_up(pl.cdiv(rows, n_tc), 128))
    rb = min(rb_vmem, rb_cores)
    if rows_per_block is not None:
        rb = min(rb, max(128, _round_up(rows_per_block, 128)))
    r_pad = _round_up(rows, rb)          # handles B*N not divisible by tile

    # NCHW -> (L, c_in, rows); pad time once (max 'same' pad), pad channels to
    # the sublane multiple and rows to the tile.
    # TODO(synk): keep the surrounding model rows-minor end-to-end to remove
    # these boundary relayouts.
    x_t = jnp.transpose(x, (3, 1, 0, 2)).reshape(L, c_in, rows)
    x_t = jnp.pad(x_t, ((left, right), (0, c_in_p - c_in), (0, r_pad - rows)))

    out = fused_dilated_inception_rows(x_t, w_flat, b_all, seq_len=L,
                                       taps=taps, rows_per_block=rb)
    out = out[:, :, :rows].reshape(L, c_out_total, B, N)
    return jnp.transpose(out, (2, 1, 3, 0))        # back to NCHW


def _reference(x, params, kernel_set, d):
    """Pure-JAX reference (lax.conv_general_dilated) for validation."""
    outs = []
    for (w, b), kern in zip(params, kernel_set):
        w_oihw = jnp.transpose(w, (2, 1, 0))[:, :, None, :]   # (co, ci, 1, k)
        total = d * (kern - 1)
        left = total // 2
        right = total - left
        o = jax.lax.conv_general_dilated(
            x, w_oihw, window_strides=(1, 1),
            padding=((0, 0), (left, right)),
            rhs_dilation=(1, d),
            dimension_numbers=('NCHW', 'OIHW', 'NCHW'))
        o = o + b.reshape(1, -1, 1, 1)
        outs.append(o)
    return jnp.concatenate(outs, axis=1)


if __name__ == "__main__":
    key = jax.random.PRNGKey(0)

    # Small but realistic shapes (N=207 nodes exercises the non-divisible-rows
    # padding path; rows = 414 -> one full-width step on v5e/v6e, two parallel
    # steps on v7x).
    B, c_in, N, L = 2, 8, 207, 16
    c_out_total = 32
    kernel_set = [2, 3, 6, 7]
    dilation_factor = 2
    c_out_per = c_out_total // len(kernel_set)

    keys = jax.random.split(key, 1 + 2 * len(kernel_set))
    x = jax.random.normal(keys[0], (B, c_in, N, L), jnp.float32)

    # Deterministic parameter init mirroring _reset_parameters:
    # xavier_uniform_ for conv weights (dim > 1), U(0,1) for biases (dim == 1).
    params = []
    for j, kern in enumerate(kernel_set):
        fan_in = c_in * 1 * kern
        fan_out = c_out_per * 1 * kern
        bound = (6.0 / (fan_in + fan_out)) ** 0.5
        # Stored as (K taps, c_in, c_out_per).
        w = jax.random.uniform(keys[1 + 2 * j], (kern, c_in, c_out_per),
                               jnp.float32, -bound, bound)
        b = jax.random.uniform(keys[2 + 2 * j], (c_out_per,),
                               jnp.float32, 0.0, 1.0)
        params.append((w, b))

    fwd = jax.jit(functools.partial(
        dilated_inception_forward,
        kernel_set=kernel_set, dilation_factor=dilation_factor))
    out = jax.block_until_ready(fwd(x, params))

    assert out.shape == (B, c_out_total, N, L), out.shape
    ref = _reference(x, params, kernel_set, dilation_factor)
    assert bool(jnp.allclose(out, ref, atol=1e-4, rtol=1e-4)), \
        "Pallas output does not match reference conv"

    print("KERNEL_OK")
</pallas_src>

<mosaic_0001>
module attributes {stable_mosaic.version = 11 : i64} {
  func.func @_fused_dilated_inception_kernel(%arg0: i32, %arg1: memref<28x8x512xf32, #tpu.memory_space<vmem>>, %arg2: memref<32x104xf32, #tpu.memory_space<vmem>>, %arg3: memref<32x1xf32, #tpu.memory_space<vmem>>, %arg4: memref<16x32x512xf32, #tpu.memory_space<vmem>>) attributes {dimension_semantics = [#tpu.dimension_semantics<parallel>], iteration_bounds = array<i64: 1>, scalar_prefetch = 0 : i64, scratch_operands = 0 : i64, tpu.core_type = #tpu.core_type<tc>, window_params = [{transform_indices = @transform_0, window_bounds = array<i64: 28, 8, 512>}, {pipeline_mode = #tpu.pipeline_mode<synchronous>, transform_indices = @transform_1, window_bounds = array<i64: 32, 104>}, {pipeline_mode = #tpu.pipeline_mode<synchronous>, transform_indices = @transform_2, window_bounds = array<i64: 32, 1>}, {transform_indices = @transform_3, window_bounds = array<i64: 16, 32, 512>}]} {
    %c0 = arith.constant 0 : index
    %c0_0 = arith.constant 0 : index
    %0 = vector.load %arg2[%c0, %c0_0] : memref<32x104xf32, #tpu.memory_space<vmem>>, vector<32x104xf32>
    %c0_1 = arith.constant 0 : index
    %c0_2 = arith.constant 0 : index
    %1 = vector.load %arg3[%c0_1, %c0_2] : memref<32x1xf32, #tpu.memory_space<vmem>>, vector<32x1xf32>
    %2 = vector.shape_cast %1 : vector<32x1xf32> to vector<32x1xf32>
    %3 = vector.broadcast %2 : vector<32x1xf32> to vector<32x512xf32>
    %c0_3 = arith.constant 0 : index
    %c0_4 = arith.constant 0 : index
    %c0_5 = arith.constant 0 : index
    %4 = vector.load %arg1[%c0_3, %c0_4, %c0_5] : memref<28x8x512xf32, #tpu.memory_space<vmem>>, vector<13x8x512xf32>
    %5 = vector.shape_cast %4 : vector<13x8x512xf32> to vector<104x512xf32>
    %cst = arith.constant dense<0.000000e+00> : vector<32x512xf32>
    %6 = tpu.matmul %0, %5, %cst {dimension_numbers = #tpu.dot_dimension_numbers<[1], [0], [0], [1], [0, 0, 1, 1], [], []>} : vector<32x104xf32>, vector<104x512xf32>, vector<32x512xf32> -> vector<32x512xf32>
    %7 = arith.addf %6, %3 : vector<32x512xf32>
    %c0_6 = arith.constant 0 : index
    %c0_7 = arith.constant 0 : index
    %c0_8 = arith.constant 0 : index
    %8 = vector.load %arg4[%c0_6, %c0_7, %c0_8] : memref<16x32x512xf32, #tpu.memory_space<vmem>>, vector<1x32x512xf32>
    %9 = vector.shape_cast %8 : vector<1x32x512xf32> to vector<32x512xf32>
    %10 = vector.shape_cast %7 : vector<32x512xf32> to vector<1x32x512xf32>
    tpu.vector_store %arg4[%c0_6, %c0_7, %c0_8], %10 {strides = array<i32>} : memref<16x32x512xf32, #tpu.memory_space<vmem>>, vector<1x32x512xf32>,
    %c1 = arith.constant 1 : index
    %c0_9 = arith.constant 0 : index
    %c0_10 = arith.constant 0 : index
    %11 = vector.load %arg1[%c1, %c0_9, %c0_10] : memref<28x8x512xf32, #tpu.memory_space<vmem>>, vector<13x8x512xf32>
    %12 = vector.shape_cast %11 : vector<13x8x512xf32> to vector<104x512xf32>
    %cst_11 = arith.constant dense<0.000000e+00> : vector<32x512xf32>
    %13 = tpu.matmul %0, %12, %cst_11 {dimension_numbers = #tpu.dot_dimension_numbers<[1], [0], [0], [1], [0, 0, 1, 1], [], []>} : vector<32x104xf32>, vector<104x512xf32>, vector<32x512xf32> -> vector<32x512xf32>
    %14 = arith.addf %13, %3 : vector<32x512xf32>
    %c1_12 = arith.constant 1 : index
    %c0_13 = arith.constant 0 : index
    %c0_14 = arith.constant 0 : index
    %15 = vector.load %arg4[%c1_12, %c0_13, %c0_14] : memref<16x32x512xf32, #tpu.memory_space<vmem>>, vector<1x32x512xf32>
    %16 = vector.shape_cast %15 : vector<1x32x512xf32> to vector<32x512xf32>
    %17 = vector.shape_cast %14 : vector<32x512xf32> to vector<1x32x512xf32>
    tpu.vector_store %arg4[%c1_12, %c0_13, %c0_14], %17 {strides = array<i32>} : memref<16x32x512xf32, #tpu.memory_space<vmem>>, vector<1x32x512xf32>,
    %c2 = arith.constant 2 : index
    %c0_15 = arith.constant 0 : index
    %c0_16 = arith.constant 0 : index
    %18 = vector.load %arg1[%c2, %c0_15, %c0_16] : memref<28x8x512xf32, #tpu.memory_space<vmem>>, vector<13x8x512xf32>
    %19 = vector.shape_cast %18 : vector<13x8x512xf32> to vector<104x512xf32>
    %cst_17 = arith.constant dense<0.000000e+00> : vector<32x512xf32>
    %20 = tpu.matmul %0, %19, %cst_17 {dimension_numbers = #tpu.dot_dimension_numbers<[1], [0], [0], [1], [0, 0, 1, 1], [], []>} : vector<32x104xf32>, vector<104x512xf32>, vector<32x512xf32> -> vector<32x512xf32>
    %21 = arith.addf %20, %3 : vector<32x512xf32>
    %c2_18 = arith.constant 2 : index
    %c0_19 = arith.constant 0 : index
    %c0_20 = arith.constant 0 : index
    %22 = vector.load %arg4[%c2_18, %c0_19, %c0_20] : memref<16x32x512xf32, #tpu.memory_space<vmem>>, vector<1x32x512xf32>
    %23 = vector.shape_cast %22 : vector<1x32x512xf32> to vector<32x512xf32>
    %24 = vector.shape_cast %21 : vector<32x512xf32> to vector<1x32x512xf32>
    tpu.vector_store %arg4[%c2_18, %c0_19, %c0_20], %24 {strides = array<i32>} : memref<16x32x512xf32, #tpu.memory_space<vmem>>, vector<1x32x512xf32>,
    %c3 = arith.constant 3 : index
    %c0_21 = arith.constant 0 : index
    %c0_22 = arith.constant 0 : index
    %25 = vector.load %arg1[%c3, %c0_21, %c0_22] : memref<28x8x512xf32, #tpu.memory_space<vmem>>, vector<13x8x512xf32>
    %26 = vector.shape_cast %25 : vector<13x8x512xf32> to vector<104x512xf32>
    %cst_23 = arith.constant dense<0.000000e+00> : vector<32x512xf32>
    %27 = tpu.matmul %0, %26, %cst_23 {dimension_numbers = #tpu.dot_dimension_numbers<[1], [0], [0], [1], [0, 0, 1, 1], [], []>} : vector<32x104xf32>, vector<104x512xf32>, vector<32x512xf32> -> vector<32x512xf32>
    %28 = arith.addf %27, %3 : vector<32x512xf32>
    %c3_24 = arith.constant 3 : index
    %c0_25 = arith.constant 0 : index
    %c0_26 = arith.constant 0 : index
    %29 = vector.load %arg4[%c3_24, %c0_25, %c0_26] : memref<16x32x512xf32, #tpu.memory_space<vmem>>, vector<1x32x512xf32>
    %30 = vector.shape_cast %29 : vector<1x32x512xf32> to vector<32x512xf32>
    %31 = vector.shape_cast %28 : vector<32x512xf32> to vector<1x32x512xf32>
    tpu.vector_store %arg4[%c3_24, %c0_25, %c0_26], %31 {strides = array<i32>} : memref<16x32x512xf32, #tpu.memory_space<vmem>>, vector<1x32x512xf32>,
    %c4 = arith.constant 4 : index
    %c0_27 = arith.constant 0 : index
    %c0_28 = arith.constant 0 : index
    %32 = vector.load %arg1[%c4, %c0_27, %c0_28] : memref<28x8x512xf32, #tpu.memory_space<vmem>>, vector<13x8x512xf32>
    %33 = vector.shape_cast %32 : vector<13x8x512xf32> to vector<104x512xf32>
    %cst_29 = arith.constant dense<0.000000e+00> : vector<32x512xf32>
    %34 = tpu.matmul %0, %33, %cst_29 {dimension_numbers = #tpu.dot_dimension_numbers<[1], [0], [0], [1], [0, 0, 1, 1], [], []>} : vector<32x104xf32>, vector<104x512xf32>, vector<32x512xf32> -> vector<32x512xf32>
    %35 = arith.addf %34, %3 : vector<32x512xf32>
    %c4_30 = arith.constant 4 : index
    %c0_31 = arith.constant 0 : index
    %c0_32 = arith.constant 0 : index
    %36 = vector.load %arg4[%c4_30, %c0_31, %c0_32] : memref<16x32x512xf32, #tpu.memory_space<vmem>>, vector<1x32x512xf32>
    %37 = vector.shape_cast %36 : vector<1x32x512xf32> to vector<32x512xf32>
    %38 = vector.shape_cast %35 : vector<32x512xf32> to vector<1x32x512xf32>
    tpu.vector_store %arg4[%c4_30, %c0_31, %c0_32], %38 {strides = array<i32>} : memref<16x32x512xf32, #tpu.memory_space<vmem>>, vector<1x32x512xf32>,
    %c5 = arith.constant 5 : index
    %c0_33 = arith.constant 0 : index
    %c0_34 = arith.constant 0 : index
    %39 = vector.load %arg1[%c5, %c0_33, %c0_34] : memref<28x8x512xf32, #tpu.memory_space<vmem>>, vector<13x8x512xf32>
    %40 = vector.shape_cast %39 : vector<13x8x512xf32> to vector<104x512xf32>
    %cst_35 = arith.constant dense<0.000000e+00> : vector<32x512xf32>
    %41 = tpu.matmul %0, %40, %cst_35 {dimension_numbers = #tpu.dot_dimension_numbers<[1], [0], [0], [1], [0, 0, 1, 1], [], []>} : vector<32x104xf32>, vector<104x512xf32>, vector<32x512xf32> -> vector<32x512xf32>
    %42 = arith.addf %41, %3 : vector<32x512xf32>
    %c5_36 = arith.constant 5 : index
    %c0_37 = arith.constant 0 : index
    %c0_38 = arith.constant 0 : index
    %43 = vector.load %arg4[%c5_36, %c0_37, %c0_38] : memref<16x32x512xf32, #tpu.memory_space<vmem>>, vector<1x32x512xf32>
    %44 = vector.shape_cast %43 : vector<1x32x512xf32> to vector<32x512xf32>
    %45 = vector.shape_cast %42 : vector<32x512xf32> to vector<1x32x512xf32>
    tpu.vector_store %arg4[%c5_36, %c0_37, %c0_38], %45 {strides = array<i32>} : memref<16x32x512xf32, #tpu.memory_space<vmem>>, vector<1x32x512xf32>,
    %c6 = arith.constant 6 : index
    %c0_39 = arith.constant 0 : index
    %c0_40 = arith.constant 0 : index
    %46 = vector.load %arg1[%c6, %c0_39, %c0_40] : memref<28x8x512xf32, #tpu.memory_space<vmem>>, vector<13x8x512xf32>
    %47 = vector.shape_cast %46 : vector<13x8x512xf32> to vector<104x512xf32>
    %cst_41 = arith.constant dense<0.000000e+00> : vector<32x512xf32>
    %48 = tpu.matmul %0, %47, %cst_41 {dimension_numbers = #tpu.dot_dimension_numbers<[1], [0], [0], [1], [0, 0, 1, 1], [], []>} : vector<32x104xf32>, vector<104x512xf32>, vector<32x512xf32> -> vector<32x512xf32>
    %49 = arith.addf %48, %3 : vector<32x512xf32>
    %c6_42 = arith.constant 6 : index
    %c0_43 = arith.constant 0 : index
    %c0_44 = arith.constant 0 : index
    %50 = vector.load %arg4[%c6_42, %c0_43, %c0_44] : memref<16x32x512xf32, #tpu.memory_space<vmem>>, vector<1x32x512xf32>
    %51 = vector.shape_cast %50 : vector<1x32x512xf32> to vector<32x512xf32>
    %52 = vector.shape_cast %49 : vector<32x512xf32> to vector<1x32x512xf32>
    tpu.vector_store %arg4[%c6_42, %c0_43, %c0_44], %52 {strides = array<i32>} : memref<16x32x512xf32, #tpu.memory_space<vmem>>, vector<1x32x512xf32>,
    %c7 = arith.constant 7 : index
    %c0_45 = arith.constant 0 : index
    %c0_46 = arith.constant 0 : index
    %53 = vector.load %arg1[%c7, %c0_45, %c0_46] : memref<28x8x512xf32, #tpu.memory_space<vmem>>, vector<13x8x512xf32>
    %54 = vector.shape_cast %53 : vector<13x8x512xf32> to vector<104x512xf32>
    %cst_47 = arith.constant dense<0.000000e+00> : vector<32x512xf32>
    %55 = tpu.matmul %0, %54, %cst_47 {dimension_numbers = #tpu.dot_dimension_numbers<[1], [0], [0], [1], [0, 0, 1, 1], [], []>} : vector<32x104xf32>, vector<104x512xf32>, vector<32x512xf32> -> vector<32x512xf32>
    %56 = arith.addf %55, %3 : vector<32x512xf32>
    %c7_48 = arith.constant 7 : index
    %c0_49 = arith.constant 0 : index
    %c0_50 = arith.constant 0 : index
    %57 = vector.load %arg4[%c7_48, %c0_49, %c0_50] : memref<16x32x512xf32, #tpu.memory_space<vmem>>, vector<1x32x512xf32>
    %58 = vector.shape_cast %57 : vector<1x32x512xf32> to vector<32x512xf32>
    %59 = vector.shape_cast %56 : vector<32x512xf32> to vector<1x32x512xf32>
    tpu.vector_store %arg4[%c7_48, %c0_49, %c0_50], %59 {strides = array<i32>} : memref<16x32x512xf32, #tpu.memory_space<vmem>>, vector<1x32x512xf32>,
    %c8 = arith.constant 8 : index
    %c0_51 = arith.constant 0 : index
    %c0_52 = arith.constant 0 : index
    %60 = vector.load %arg1[%c8, %c0_51, %c0_52] : memref<28x8x512xf32, #tpu.memory_space<vmem>>, vector<13x8x512xf32>
    %61 = vector.shape_cast %60 : vector<13x8x512xf32> to vector<104x512xf32>
    %cst_53 = arith.constant dense<0.000000e+00> : vector<32x512xf32>
    %62 = tpu.matmul %0, %61, %cst_53 {dimension_numbers = #tpu.dot_dimension_numbers<[1], [0], [0], [1], [0, 0, 1, 1], [], []>} : vector<32x104xf32>, vector<104x512xf32>, vector<32x512xf32> -> vector<32x512xf32>
    %63 = arith.addf %62, %3 : vector<32x512xf32>
    %c8_54 = arith.constant 8 : index
    %c0_55 = arith.constant 0 : index
    %c0_56 = arith.constant 0 : index
    %64 = vector.load %arg4[%c8_54, %c0_55, %c0_56] : memref<16x32x512xf32, #tpu.memory_space<vmem>>, vector<1x32x512xf32>
    %65 = vector.shape_cast %64 : vector<1x32x512xf32> to vector<32x512xf32>
    %66 = vector.shape_cast %63 : vector<32x512xf32> to vector<1x32x512xf32>
    tpu.vector_store %arg4[%c8_54, %c0_55, %c0_56], %66 {strides = array<i32>} : memref<16x32x512xf32, #tpu.memory_space<vmem>>, vector<1x32x512xf32>,
    %c9 = arith.constant 9 : index
    %c0_57 = arith.constant 0 : index
    %c0_58 = arith.constant 0 : index
    %67 = vector.load %arg1[%c9, %c0_57, %c0_58] : memref<28x8x512xf32, #tpu.memory_space<vmem>>, vector<13x8x512xf32>
    %68 = vector.shape_cast %67 : vector<13x8x512xf32> to vector<104x512xf32>
    %cst_59 = arith.constant dense<0.000000e+00> : vector<32x512xf32>
    %69 = tpu.matmul %0, %68, %cst_59 {dimension_numbers = #tpu.dot_dimension_numbers<[1], [0], [0], [1], [0, 0, 1, 1], [], []>} : vector<32x104xf32>, vector<104x512xf32>, vector<32x512xf32> -> vector<32x512xf32>
    %70 = arith.addf %69, %3 : vector<32x512xf32>
    %c9_60 = arith.constant 9 : index
    %c0_61 = arith.constant 0 : index
    %c0_62 = arith.constant 0 : index
    %71 = vector.load %arg4[%c9_60, %c0_61, %c0_62] : memref<16x32x512xf32, #tpu.memory_space<vmem>>, vector<1x32x512xf32>
    %72 = vector.shape_cast %71 : vector<1x32x512xf32> to vector<32x512xf32>
    %73 = vector.shape_cast %70 : vector<32x512xf32> to vector<1x32x512xf32>
    tpu.vector_store %arg4[%c9_60, %c0_61, %c0_62], %73 {strides = array<i32>} : memref<16x32x512xf32, #tpu.memory_space<vmem>>, vector<1x32x512xf32>,
    %c10 = arith.constant 10 : index
    %c0_63 = arith.constant 0 : index
    %c0_64 = arith.constant 0 : index
    %74 = vector.load %arg1[%c10, %c0_63, %c0_64] : memref<28x8x512xf32, #tpu.memory_space<vmem>>, vector<13x8x512xf32>
    %75 = vector.shape_cast %74 : vector<13x8x512xf32> to vector<104x512xf32>
    %cst_65 = arith.constant dense<0.000000e+00> : vector<32x512xf32>
    %76 = tpu.matmul %0, %75, %cst_65 {dimension_numbers = #tpu.dot_dimension_numbers<[1], [0], [0], [1], [0, 0, 1, 1], [], []>} : vector<32x104xf32>, vector<104x512xf32>, vector<32x512xf32> -> vector<32x512xf32>
    %77 = arith.addf %76, %3 : vector<32x512xf32>
    %c10_66 = arith.constant 10 : index
    %c0_67 = arith.constant 0 : index
    %c0_68 = arith.constant 0 : index
    %78 = vector.load %arg4[%c10_66, %c0_67, %c0_68] : memref<16x32x512xf32, #tpu.memory_space<vmem>>, vector<1x32x512xf32>
    %79 = vector.shape_cast %78 : vector<1x32x512xf32> to vector<32x512xf32>
    %80 = vector.shape_cast %77 : vector<32x512xf32> to vector<1x32x512xf32>
    tpu.vector_store %arg4[%c10_66, %c0_67, %c0_68], %80 {strides = array<i32>} : memref<16x32x512xf32, #tpu.memory_space<vmem>>, vector<1x32x512xf32>,
    %c11 = arith.constant 11 : index
    %c0_69 = arith.constant 0 : index
    %c0_70 = arith.constant 0 : index
    %81 = vector.load %arg1[%c11, %c0_69, %c0_70] : memref<28x8x512xf32, #tpu.memory_space<vmem>>, vector<13x8x512xf32>
    %82 = vector.shape_cast %81 : vector<13x8x512xf32> to vector<104x512xf32>
    %cst_71 = arith.constant dense<0.000000e+00> : vector<32x512xf32>
    %83 = tpu.matmul %0, %82, %cst_71 {dimension_numbers = #tpu.dot_dimension_numbers<[1], [0], [0], [1], [0, 0, 1, 1], [], []>} : vector<32x104xf32>, vector<104x512xf32>, vector<32x512xf32> -> vector<32x512xf32>
    %84 = arith.addf %83, %3 : vector<32x512xf32>
    %c11_72 = arith.constant 11 : index
    %c0_73 = arith.constant 0 : index
    %c0_74 = arith.constant 0 : index
    %85 = vector.load %arg4[%c11_72, %c0_73, %c0_74] : memref<16x32x512xf32, #tpu.memory_space<vmem>>, vector<1x32x512xf32>
    %86 = vector.shape_cast %85 : vector<1x32x512xf32> to vector<32x512xf32>
    %87 = vector.shape_cast %84 : vector<32x512xf32> to vector<1x32x512xf32>
    tpu.vector_store %arg4[%c11_72, %c0_73, %c0_74], %87 {strides = array<i32>} : memref<16x32x512xf32, #tpu.memory_space<vmem>>, vector<1x32x512xf32>,
    %c12 = arith.constant 12 : index
    %c0_75 = arith.constant 0 : index
    %c0_76 = arith.constant 0 : index
    %88 = vector.load %arg1[%c12, %c0_75, %c0_76] : memref<28x8x512xf32, #tpu.memory_space<vmem>>, vector<13x8x512xf32>
    %89 = vector.shape_cast %88 : vector<13x8x512xf32> to vector<104x512xf32>
    %cst_77 = arith.constant dense<0.000000e+00> : vector<32x512xf32>
    %90 = tpu.matmul %0, %89, %cst_77 {dimension_numbers = #tpu.dot_dimension_numbers<[1], [0], [0], [1], [0, 0, 1, 1], [], []>} : vector<32x104xf32>, vector<104x512xf32>, vector<32x512xf32> -> vector<32x512xf32>
    %91 = arith.addf %90, %3 : vector<32x512xf32>
    %c12_78 = arith.constant 12 : index
    %c0_79 = arith.constant 0 : index
    %c0_80 = arith.constant 0 : index
    %92 = vector.load %arg4[%c12_78, %c0_79, %c0_80] : memref<16x32x512xf32, #tpu.memory_space<vmem>>, vector<1x32x512xf32>
    %93 = vector.shape_cast %92 : vector<1x32x512xf32> to vector<32x512xf32>
    %94 = vector.shape_cast %91 : vector<32x512xf32> to vector<1x32x512xf32>
    tpu.vector_store %arg4[%c12_78, %c0_79, %c0_80], %94 {strides = array<i32>} : memref<16x32x512xf32, #tpu.memory_space<vmem>>, vector<1x32x512xf32>,
    %c13 = arith.constant 13 : index
    %c0_81 = arith.constant 0 : index
    %c0_82 = arith.constant 0 : index
    %95 = vector.load %arg1[%c13, %c0_81, %c0_82] : memref<28x8x512xf32, #tpu.memory_space<vmem>>, vector<13x8x512xf32>
    %96 = vector.shape_cast %95 : vector<13x8x512xf32> to vector<104x512xf32>
    %cst_83 = arith.constant dense<0.000000e+00> : vector<32x512xf32>
    %97 = tpu.matmul %0, %96, %cst_83 {dimension_numbers = #tpu.dot_dimension_numbers<[1], [0], [0], [1], [0, 0, 1, 1], [], []>} : vector<32x104xf32>, vector<104x512xf32>, vector<32x512xf32> -> vector<32x512xf32>
    %98 = arith.addf %97, %3 : vector<32x512xf32>
    %c13_84 = arith.constant 13 : index
    %c0_85 = arith.constant 0 : index
    %c0_86 = arith.constant 0 : index
    %99 = vector.load %arg4[%c13_84, %c0_85, %c0_86] : memref<16x32x512xf32, #tpu.memory_space<vmem>>, vector<1x32x512xf32>
    %100 = vector.shape_cast %99 : vector<1x32x512xf32> to vector<32x512xf32>
    %101 = vector.shape_cast %98 : vector<32x512xf32> to vector<1x32x512xf32>
    tpu.vector_store %arg4[%c13_84, %c0_85, %c0_86], %101 {strides = array<i32>} : memref<16x32x512xf32, #tpu.memory_space<vmem>>, vector<1x32x512xf32>,
    %c14 = arith.constant 14 : index
    %c0_87 = arith.constant 0 : index
    %c0_88 = arith.constant 0 : index
    %102 = vector.load %arg1[%c14, %c0_87, %c0_88] : memref<28x8x512xf32, #tpu.memory_space<vmem>>, vector<13x8x512xf32>
    %103 = vector.shape_cast %102 : vector<13x8x512xf32> to vector<104x512xf32>
    %cst_89 = arith.constant dense<0.000000e+00> : vector<32x512xf32>
    %104 = tpu.matmul %0, %103, %cst_89 {dimension_numbers = #tpu.dot_dimension_numbers<[1], [0], [0], [1], [0, 0, 1, 1], [], []>} : vector<32x104xf32>, vector<104x512xf32>, vector<32x512xf32> -> vector<32x512xf32>
    %105 = arith.addf %104, %3 : vector<32x512xf32>
    %c14_90 = arith.constant 14 : index
    %c0_91 = arith.constant 0 : index
    %c0_92 = arith.constant 0 : index
    %106 = vector.load %arg4[%c14_90, %c0_91, %c0_92] : memref<16x32x512xf32, #tpu.memory_space<vmem>>, vector<1x32x512xf32>
    %107 = vector.shape_cast %106 : vector<1x32x512xf32> to vector<32x512xf32>
    %108 = vector.shape_cast %105 : vector<32x512xf32> to vector<1x32x512xf32>
    tpu.vector_store %arg4[%c14_90, %c0_91, %c0_92], %108 {strides = array<i32>} : memref<16x32x512xf32, #tpu.memory_space<vmem>>, vector<1x32x512xf32>,
    %c15 = arith.constant 15 : index
    %c0_93 = arith.constant 0 : index
    %c0_94 = arith.constant 0 : index
    %109 = vector.load %arg1[%c15, %c0_93, %c0_94] : memref<28x8x512xf32, #tpu.memory_space<vmem>>, vector<13x8x512xf32>
    %110 = vector.shape_cast %109 : vector<13x8x512xf32> to vector<104x512xf32>
    %cst_95 = arith.constant dense<0.000000e+00> : vector<32x512xf32>
    %111 = tpu.matmul %0, %110, %cst_95 {dimension_numbers = #tpu.dot_dimension_numbers<[1], [0], [0], [1], [0, 0, 1, 1], [], []>} : vector<32x104xf32>, vector<104x512xf32>, vector<32x512xf32> -> vector<32x512xf32>
    %112 = arith.addf %111, %3 : vector<32x512xf32>
    %c15_96 = arith.constant 15 : index
    %c0_97 = arith.constant 0 : index
    %c0_98 = arith.constant 0 : index
    %113 = vector.load %arg4[%c15_96, %c0_97, %c0_98] : memref<16x32x512xf32, #tpu.memory_space<vmem>>, vector<1x32x512xf32>
    %114 = vector.shape_cast %113 : vector<1x32x512xf32> to vector<32x512xf32>
    %115 = vector.shape_cast %112 : vector<32x512xf32> to vector<1x32x512xf32>
    tpu.vector_store %arg4[%c15_96, %c0_97, %c0_98], %115 {strides = array<i32>} : memref<16x32x512xf32, #tpu.memory_space<vmem>>, vector<1x32x512xf32>,
    return
  }
  func.func @transform_0(%arg0: i32) -> (i32, i32, i32) {
    %c0_i32 = arith.constant 0 : i32
    %c0_i32_0 = arith.constant 0 : i32
    %c0_i32_1 = arith.constant 0 : i32
    return %c0_i32, %c0_i32_0, %arg0 : i32, i32, i32
  }
  func.func @transform_1(%arg0: i32) -> (i32, i32) {
    %c0_i32 = arith.constant 0 : i32
    %c0_i32_0 = arith.constant 0 : i32
    %c0_i32_1 = arith.constant 0 : i32
    return %c0_i32, %c0_i32_0 : i32, i32
  }
  func.func @transform_2(%arg0: i32) -> (i32, i32) {
    %c0_i32 = arith.constant 0 : i32
    %c0_i32_0 = arith.constant 0 : i32
    %c0_i32_1 = arith.constant 0 : i32
    return %c0_i32, %c0_i32_0 : i32, i32
  }
  func.func @transform_3(%arg0: i32) -> (i32, i32, i32) {
    %c0_i32 = arith.constant 0 : i32
    %c0_i32_0 = arith.constant 0 : i32
    %c0_i32_1 = arith.constant 0 : i32
    return %c0_i32, %c0_i32_0, %arg0 : i32, i32, i32
  }
}

</mosaic_0001>

<bundles_post_ra>
// kernel: dilated_inception_forward.1
= control target key start
LH: loop header
LB: loop body
LE: loop exit
PB: predicated region body
PF: predicated region fallthrough
CT: control target
= control target key end

     0   :  { %v8885_v3 = vmov 0.0   ;;  %vm94_vm0 = vcmask 850944   ;;  %s8881_s0 = inlined_call_operand.vmem [shape: f32[28,8,512], index: 0, kind: input, shape index: {}]   ;;  %s8882_s1 = inlined_call_operand.vmem [shape: f32[32,104], index: 1, kind: input, shape index: {}]   ;;  %s8883_s2 = inlined_call_operand.vmem [shape: f32[32,1], index: 2, kind: input, shape index: {}]   ;;  %s8884_s3 = inlined_call_operand.vmem [shape: f32[16,32,512], index: 3, kind: output, shape index: {}]  }
   0x1   :  { %v5214_v0 = vld [vmem:[%s8881_s0 + $0x188] sm:$0xff]  ;;  %v5219_v1 = vld [vmem:[%s8881_s0 + $0x198] sm:$0xff]  ;;  %v5224_v2 = vld [vmem:[%s8881_s0 + $0x180] sm:$0xff]  ;;  %171 = vmatprep.mubr.f32.mxu0 %v8885_v3  ;;  %260 = vmatprep.mubr.f32.mxu1 %v8885_v3 }
   0x2   :  { %113 = vmatprep.subr.mxu0 %v5214_v0  ;;  %202 = vmatprep.subr.mxu1 %v5219_v1  ;;  %v5233_v4 = vld [vmem:[%s8881_s0 + $0x190] sm:$0xff]  ;;  %v5238_v5 = vld [vmem:[%s8881_s0 + $0x168] sm:$0xff]  ;;  %v5243_v6 = vld [vmem:[%s8881_s0 + $0x178] sm:$0xff] }
   0x3   :  { %114 = vmatpush1.msra.mxu0 %v5224_v2  ;;  %203 = vmatpush1.msra.mxu1 %v5233_v4  ;;  %v5250_v7 = vld [vmem:[%s8881_s0 + $0x160] sm:$0xff]  ;;  %v5255_v8 = vld [vmem:[%s8881_s0 + $0x170] sm:$0xff]  ;;  %v5260_v9 = vld [vmem:[%s8881_s0 + $0x148] sm:$0xff] }
   0x4   :  { %115 = vmatprep.subr.mxu0 %v5238_v5  ;;  %204 = vmatprep.subr.mxu1 %v5243_v6  ;;  %v5267_v10 = vld [vmem:[%s8881_s0 + $0x158] sm:$0xff]  ;;  %v5272_v11 = vld [vmem:[%s8881_s0 + $0x140] sm:$0xff]  ;;  %v5277_v12 = vld [vmem:[%s8881_s0 + $0x150] sm:$0xff] }
   0x5   :  { %116 = vmatpush1.msra.mxu0 %v5250_v7  ;;  %205 = vmatpush1.msra.mxu1 %v5255_v8  ;;  %v5284_v13 = vld [vmem:[%s8881_s0 + $0x128] sm:$0xff]  ;;  %v5289_v14 = vld [vmem:[%s8881_s0 + $0x138] sm:$0xff]  ;;  %v5296_v15 = vld [vmem:[%s8881_s0 + $0x120] sm:$0xff] }
   0x6   :  { %117 = vmatprep.subr.mxu0 %v5260_v9  ;;  %206 = vmatprep.subr.mxu1 %v5267_v10  ;;  %v5301_v16 = vld [vmem:[%s8881_s0 + $0x130] sm:$0xff]  ;;  %v5308_v17 = vld [vmem:[%s8881_s0 + $0x108] sm:$0xff]  ;;  %v5313_v18 = vld [vmem:[%s8881_s0 + $0x118] sm:$0xff] }
   0x7   :  { %118 = vmatpush1.msra.mxu0 %v5272_v11  ;;  %207 = vmatpush1.msra.mxu1 %v5277_v12  ;;  %v5320_v19 = vld [vmem:[%s8881_s0 + $0x100] sm:$0xff]  ;;  %v5325_v20 = vld [vmem:[%s8881_s0 + $0x110] sm:$0xff]  ;;  %v5332_v21 = vld [vmem:[%s8881_s0 + $0xe8] sm:$0xff] }
   0x8   :  { %119 = vmatprep.subr.mxu0 %v5284_v13  ;;  %208 = vmatprep.subr.mxu1 %v5289_v14  ;;  %v5337_v22 = vld [vmem:[%s8881_s0 + $0xf8] sm:$0xff]  ;;  %v5344_v23 = vld [vmem:[%s8881_s0 + $0xe0] sm:$0xff]  ;;  %v5349_v24 = vld [vmem:[%s8881_s0 + $0xf0] sm:$0xff] }
   0x9   :  { %120 = vmatpush1.msra.mxu0 %v5296_v15  ;;  %209 = vmatpush1.msra.mxu1 %v5301_v16  ;;  %v5356_v25 = vld [vmem:[%s8881_s0 + $0xc8] sm:$0xff]  ;;  %v5361_v26 = vld [vmem:[%s8881_s0 + $0xd8] sm:$0xff]  ;;  %v5368_v27 = vld [vmem:[%s8881_s0 + $0xc0] sm:$0xff] }
   0xa   :  { %121 = vmatprep.subr.mxu0 %v5308_v17  ;;  %210 = vmatprep.subr.mxu1 %v5313_v18  ;;  %v5373_v28 = vld [vmem:[%s8881_s0 + $0xd0] sm:$0xff]  ;;  %v5380_v29 = vld [vmem:[%s8881_s0 + $0xa8] sm:$0xff]  ;;  %v5385_v30 = vld [vmem:[%s8881_s0 + $0xb8] sm:$0xff] }
   0xb   :  { %122 = vmatpush1.msra.mxu0 %v5320_v19  ;;  %211 = vmatpush1.msra.mxu1 %v5325_v20  ;;  %v5392_v31 = vld [vmem:[%s8881_s0 + $0xa0] sm:$0xff]  ;;  %v5397_v32 = vld [vmem:[%s8881_s0 + $0xb0] sm:$0xff]  ;;  %v5404_v33 = vld [vmem:[%s8881_s0 + $0x88] sm:$0xff] }
   0xc   :  { %123 = vmatprep.subr.mxu0 %v5332_v21  ;;  %212 = vmatprep.subr.mxu1 %v5337_v22  ;;  %v5409_v34 = vld [vmem:[%s8881_s0 + $0x98] sm:$0xff]  ;;  %v5416_v35 = vld [vmem:[%s8881_s0 + $0x80] sm:$0xff]  ;;  %v5421_v36 = vld [vmem:[%s8881_s0 + $0x90] sm:$0xff] }
   0xd   :  { %124 = vmatpush1.msra.mxu0 %v5344_v23  ;;  %213 = vmatpush1.msra.mxu1 %v5349_v24  ;;  %v5428_v37 = vld [vmem:[%s8881_s0 + $0x68] sm:$0xff]  ;;  %v5433_v38 = vld [vmem:[%s8881_s0 + $0x78] sm:$0xff]  ;;  %v5440_v39 = vld [vmem:[%s8881_s0 + $0x60] sm:$0xff] }
   0xe   :  { %125 = vmatprep.subr.mxu0 %v5356_v25  ;;  %214 = vmatprep.subr.mxu1 %v5361_v26  ;;  %v5445_v40 = vld [vmem:[%s8881_s0 + $0x70] sm:$0xff]  ;;  %v5452_v41 = vld [vmem:[%s8881_s0 + $0x48] sm:$0xff]  ;;  %v5457_v42 = vld [vmem:[%s8881_s0 + $0x58] sm:$0xff] }
   0xf   :  { %126 = vmatpush1.msra.mxu0 %v5368_v27  ;;  %215 = vmatpush1.msra.mxu1 %v5373_v28  ;;  %v5464_v43 = vld [vmem:[%s8881_s0 + $0x40] sm:$0xff]  ;;  %v5469_v44 = vld [vmem:[%s8881_s0 + $0x50] sm:$0xff]  ;;  %v5476_v45 = vld [vmem:[%s8881_s0 + $0x28] sm:$0xff] }
  0x10   :  { %127 = vmatprep.subr.mxu0 %v5380_v29  ;;  %216 = vmatprep.subr.mxu1 %v5385_v30  ;;  %v5481_v46 = vld [vmem:[%s8881_s0 + $0x38] sm:$0xff]  ;;  %v5488_v47 = vld [vmem:[%s8881_s0 + $0x20] sm:$0xff]  ;;  %v5493_v48 = vld [vmem:[%s8881_s0 + $0x30] sm:$0xff] }
  0x11   :  { %128 = vmatpush1.msra.mxu0 %v5392_v31  ;;  %217 = vmatpush1.msra.mxu1 %v5397_v32  ;;  %v43_v49 = vld [vmem:[%s8881_s0 + $0x8] sm:$0xff]  ;;  %v45_v50 = vld [vmem:[%s8881_s0 + $0x18] sm:$0xff]  ;;  %v42_v51 = vld [vmem:[%s8881_s0] sm:$0xff] }
  0x12   :  { %129 = vmatprep.subr.mxu0 %v5404_v33  ;;  %218 = vmatprep.subr.mxu1 %v5409_v34  ;;  %v44_v52 = vld [vmem:[%s8881_s0 + $0x10] sm:$0xff]  ;;  %v5516_v53 = vld [vmem:[%s8882_s1] sm:$0xff]  ;;  %v5521_v54 = vld [vmem:[%s8881_s0 + $0x1a8] sm:$0xff] }
  0x13   :  { %130 = vmatpush1.msra.mxu0 %v5416_v35  ;;  %219 = vmatpush1.msra.mxu1 %v5421_v36  ;;  %v5526_v55 = vld [vmem:[%s8881_s0 + $0x1b8] sm:$0xff]  ;;  %v5531_v56 = vld [vmem:[%s8881_s0 + $0x1a0] sm:$0xff]  ;;  %v5536_v57 = vld [vmem:[%s8881_s0 + $0x1b0] sm:$0xff] }
  0x14   :  { %131 = vmatprep.subr.mxu0 %v5428_v37  ;;  %220 = vmatprep.subr.mxu1 %v5433_v38  ;;  %v5569_v58 = vld [vmem:[%s8882_s1 + $0x8] sm:$0xff]  ;;  %v5588_v59 = vld [vmem:[%s8882_s1 + $0x10] sm:$0xff]  ;;  %v5607_v60 = vld [vmem:[%s8882_s1 + $0x18] sm:$0xff] }
  0x15   :  { %132 = vmatpush1.msra.mxu0 %v5440_v39  ;;  %221 = vmatpush1.msra.mxu1 %v5445_v40  ;;  %v5630_v61 = vld [vmem:[%s8881_s0 + $0x1c8] sm:$0xff]  ;;  %v5635_v62 = vld [vmem:[%s8881_s0 + $0x1d8] sm:$0xff]  ;;  %v5642_v63 = vld [vmem:[%s8881_s0 + $0x1c0] sm:$0xff] }
  0x16   :  { %133 = vmatprep.subr.mxu0 %v5452_v41  ;;  %222 = vmatprep.subr.mxu1 %v5457_v42 }
  0x17   :  { %134 = vmatpush1.msra.mxu0 %v5464_v43  ;;  %223 = vmatpush1.msra.mxu1 %v5469_v44 }
  0x18   :  { %135 = vmatprep.subr.mxu0 %v5476_v45  ;;  %224 = vmatprep.subr.mxu1 %v5481_v46 }
  0x19   :  { %136 = vmatpush1.msra.mxu0 %v5488_v47  ;;  %225 = vmatpush1.msra.mxu1 %v5493_v48 }
  0x1a   :  { %137 = vmatprep.subr.mxu0 %v43_v49  ;;  %226 = vmatprep.subr.mxu1 %v45_v50  ;;  %v4261_v49 = vld [vmem:[%s8881_s0 + $0x80] sm:$0xff]  ;;  %v4263_v50 = vld [vmem:[%s8881_s0 + $0x90] sm:$0xff] }
  0x1b   :  { %138 = vmatpush1.msra.mxu0 %v42_v51  ;;  %227 = vmatpush1.msra.mxu1 %v44_v52  ;;  %v6099_v51 = vld [vmem:[%s8881_s0 + $0x228] sm:$0xff]  ;;  %v6104_v52 = vld [vmem:[%s8881_s0 + $0x238] sm:$0xff] }
  0x1c   :  { %4025 = vmatmul.mubr.msk.f32.vlgmr.msra.gmra.mxu0 %vm94_vm0, %v5516_v53  ;;  %4029 = vmatmul.mubr.msk.f32.vlgmr.msra.gmra.mxu1 %vm94_vm0, %v5516_v53  ;;  %8890 = vst [vmem:[#allocation2_spill] sm:$0xff] %v6104_v52 }
  0x1d   :  { %360 = vmatprep.subr.mxu0 %v5521_v54  ;;  %449 = vmatprep.subr.mxu1 %v5526_v55 }
  0x1e   :  { %361 = vmatpush1.msra.mxu0 %v5531_v56  ;;  %450 = vmatpush1.msra.mxu1 %v5536_v57 }
  0x1f   :  { %362 = vmatprep.subr.mxu0 %v5214_v0  ;;  %451 = vmatprep.subr.mxu1 %v5219_v1 }
  0x20   :  { %363 = vmatpush1.msra.mxu0 %v5224_v2  ;;  %452 = vmatpush1.msra.mxu1 %v5233_v4 }
  0x21   :  { %364 = vmatprep.subr.mxu0 %v5238_v5  ;;  %453 = vmatprep.subr.mxu1 %v5243_v6 }
  0x22   :  { %365 = vmatpush1.msra.mxu0 %v5250_v7  ;;  %454 = vmatpush1.msra.mxu1 %v5255_v8 }
  0x23   :  { %366 = vmatprep.subr.mxu0 %v5260_v9  ;;  %455 = vmatprep.subr.mxu1 %v5267_v10 }
  0x24   :  { %367 = vmatpush1.msra.mxu0 %v5272_v11  ;;  %456 = vmatpush1.msra.mxu1 %v5277_v12 }
  0x25   :  { %368 = vmatprep.subr.mxu0 %v5284_v13  ;;  %457 = vmatprep.subr.mxu1 %v5289_v14 }
  0x26   :  { %369 = vmatpush1.msra.mxu0 %v5296_v15  ;;  %458 = vmatpush1.msra.mxu1 %v5301_v16 }
  0x27   :  { %370 = vmatprep.subr.mxu0 %v5308_v17  ;;  %459 = vmatprep.subr.mxu1 %v5313_v18 }
  0x28   :  { %371 = vmatpush1.msra.mxu0 %v5320_v19  ;;  %460 = vmatpush1.msra.mxu1 %v5325_v20 }
  0x29   :  { %177 = vmatprep.mubr.f32.mxu0 %v8885_v3  ;;  %266 = vmatprep.mubr.f32.mxu1 %v8885_v3 }
  0x2a   :  { %372 = vmatprep.subr.mxu0 %v5332_v21  ;;  %461 = vmatprep.subr.mxu1 %v5337_v22 }
  0x2b   :  { %4026 = vmatmul.mubr.msk.f32.gmra.mxu0 %vm94_vm0, %v5569_v58  ;;  %4030 = vmatmul.mubr.msk.f32.gmra.mxu1 %vm94_vm0, %v5569_v58 }
  0x2c   :  { %373 = vmatpush1.msra.mxu0 %v5344_v23  ;;  %462 = vmatpush1.msra.mxu1 %v5349_v24 }
  0x2d   :  { %374 = vmatprep.subr.mxu0 %v5356_v25  ;;  %463 = vmatprep.subr.mxu1 %v5361_v26 }
  0x2e   :  { %375 = vmatpush1.msra.mxu0 %v5368_v27  ;;  %464 = vmatpush1.msra.mxu1 %v5373_v28 }
  0x2f   :  { %183 = vmatprep.mubr.f32.mxu0 %v8885_v3  ;;  %272 = vmatprep.mubr.f32.mxu1 %v8885_v3 }
  0x30   :  { %376 = vmatprep.subr.mxu0 %v5380_v29  ;;  %465 = vmatprep.subr.mxu1 %v5385_v30 }
  0x31   :  { %4027 = vmatmul.mubr.msk.f32.gmra.mxu0 %vm94_vm0, %v5588_v59  ;;  %4031 = vmatmul.mubr.msk.f32.gmra.mxu1 %vm94_vm0, %v5588_v59 }
  0x32   :  { %377 = vmatpush1.msra.mxu0 %v5392_v31  ;;  %466 = vmatpush1.msra.mxu1 %v5397_v32 }
  0x33   :  { %378 = vmatprep.subr.mxu0 %v5404_v33  ;;  %467 = vmatprep.subr.mxu1 %v5409_v34 }
  0x34   :  { %379 = vmatpush1.msra.mxu0 %v5416_v35  ;;  %468 = vmatpush1.msra.mxu1 %v5421_v36 }
  0x35   :  { %189 = vmatprep.mubr.f32.mxu0 %v8885_v3  ;;  %278 = vmatprep.mubr.f32.mxu1 %v8885_v3 }
  0x36   :  { %380 = vmatprep.subr.mxu0 %v5428_v37  ;;  %469 = vmatprep.subr.mxu1 %v5433_v38 }
  0x37   :  { %4028 = vmatmul.mubr.msk.f32.gmra.mxu0 %vm94_vm0, %v5607_v60  ;;  %4032 = vmatmul.mubr.msk.f32.gmra.mxu1 %vm94_vm0, %v5607_v60 }
  0x38   :  { %381 = vmatpush1.msra.mxu0 %v5440_v39  ;;  %470 = vmatpush1.msra.mxu1 %v5445_v40 }
  0x39   :  { %382 = vmatprep.subr.mxu0 %v5452_v41  ;;  %471 = vmatprep.subr.mxu1 %v5457_v42 }
  0x3a   :  { %383 = vmatpush1.msra.mxu0 %v5464_v43  ;;  %472 = vmatpush1.msra.mxu1 %v5469_v44 }
  0x3b   :  { %384 = vmatprep.subr.mxu0 %v5476_v45  ;;  %473 = vmatprep.subr.mxu1 %v5481_v46  ;;  %v5647_v45 = vld [vmem:[%s8881_s0 + $0x1d0] sm:$0xff]  ;;  %v5726_v46 = vld [vmem:[%s8881_s0 + $0x1e8] sm:$0xff] }
  0x3c   :  { %385 = vmatpush1.msra.mxu0 %v5488_v47  ;;  %418 = vmatprep.mubr.f32.mxu0 %v8885_v3  ;;  %v5731_v47 = vld [vmem:[%s8881_s0 + $0x1f8] sm:$0xff] }
  0x3d   :  { %474 = vmatpush1.msra.mxu1 %v5493_v48  ;;  %507 = vmatprep.mubr.f32.mxu1 %v8885_v3  ;;  %v4264_v48 = vld [vmem:[%s8881_s0 + $0x98] sm:$0xff] }
  0x3e   :  { %4085 = vmatmul.mubr.msk.f32.vlgmr.msra.gmra.mxu0 %vm94_vm0, %v5516_v53  ;;  %4089 = vmatmul.mubr.msk.f32.vlgmr.msra.gmra.mxu1 %vm94_vm0, %v5516_v53 }
  0x3f   :  { %608 = vmatprep.subr.mxu0 %v5630_v61  ;;  %697 = vmatprep.subr.mxu1 %v5635_v62 }
  0x40   :  { %609 = vmatpush1.msra.mxu0 %v5642_v63  ;;  %698 = vmatpush1.msra.mxu1 %v5647_v45 }
  0x41   :  { %610 = vmatprep.subr.mxu0 %v5521_v54  ;;  %699 = vmatprep.subr.mxu1 %v5526_v55 }
  0x42   :  { %611 = vmatpush1.msra.mxu0 %v5531_v56  ;;  %700 = vmatpush1.msra.mxu1 %v5536_v57 }
  0x43   :  { %612 = vmatprep.subr.mxu0 %v5214_v0  ;;  %701 = vmatprep.subr.mxu1 %v5219_v1 }
  0x44   :  { %613 = vmatpush1.msra.mxu0 %v5224_v2  ;;  %702 = vmatpush1.msra.mxu1 %v5233_v4 }
  0x45   :  { %614 = vmatprep.subr.mxu0 %v5238_v5  ;;  %703 = vmatprep.subr.mxu1 %v5243_v6 }
  0x46   :  { %615 = vmatpush1.msra.mxu0 %v5250_v7  ;;  %704 = vmatpush1.msra.mxu1 %v5255_v8 }
  0x47   :  { %616 = vmatprep.subr.mxu0 %v5260_v9  ;;  %705 = vmatprep.subr.mxu1 %v5267_v10 }
  0x48   :  { %617 = vmatpush1.msra.mxu0 %v5272_v11  ;;  %706 = vmatpush1.msra.mxu1 %v5277_v12 }
  0x49   :  { %618 = vmatprep.subr.mxu0 %v5284_v13  ;;  %707 = vmatprep.subr.mxu1 %v5289_v14 }
  0x4a   :  { %619 = vmatpush1.msra.mxu0 %v5296_v15  ;;  %708 = vmatpush1.msra.mxu1 %v5301_v16 }
  0x4b   :  { %424 = vmatprep.mubr.f32.mxu0 %v8885_v3  ;;  %513 = vmatprep.mubr.f32.mxu1 %v8885_v3 }
  0x4c   :  { %620 = vmatprep.subr.mxu0 %v5308_v17  ;;  %709 = vmatprep.subr.mxu1 %v5313_v18 }
  0x4d   :  { %4086 = vmatmul.mubr.msk.f32.gmra.mxu0 %vm94_vm0, %v5569_v58  ;;  %4090 = vmatmul.mubr.msk.f32.gmra.mxu1 %vm94_vm0, %v5569_v58 }
  0x4e   :  { %621 = vmatpush1.msra.mxu0 %v5320_v19  ;;  %710 = vmatpush1.msra.mxu1 %v5325_v20 }
  0x4f   :  { %622 = vmatprep.subr.mxu0 %v5332_v21  ;;  %711 = vmatprep.subr.mxu1 %v5337_v22 }
  0x50   :  { %623 = vmatpush1.msra.mxu0 %v5344_v23  ;;  %712 = vmatpush1.msra.mxu1 %v5349_v24 }
  0x51   :  { %430 = vmatprep.mubr.f32.mxu0 %v8885_v3  ;;  %519 = vmatprep.mubr.f32.mxu1 %v8885_v3 }
  0x52   :  { %624 = vmatprep.subr.mxu0 %v5356_v25  ;;  %713 = vmatprep.subr.mxu1 %v5361_v26 }
  0x53   :  { %4087 = vmatmul.mubr.msk.f32.gmra.mxu0 %vm94_vm0, %v5588_v59  ;;  %4091 = vmatmul.mubr.msk.f32.gmra.mxu1 %vm94_vm0, %v5588_v59 }
  0x54   :  { %625 = vmatpush1.msra.mxu0 %v5368_v27  ;;  %714 = vmatpush1.msra.mxu1 %v5373_v28 }
  0x55   :  { %626 = vmatprep.subr.mxu0 %v5380_v29  ;;  %715 = vmatprep.subr.mxu1 %v5385_v30 }
  0x56   :  { %627 = vmatpush1.msra.mxu0 %v5392_v31  ;;  %716 = vmatpush1.msra.mxu1 %v5397_v32 }
  0x57   :  { %436 = vmatprep.mubr.f32.mxu0 %v8885_v3  ;;  %525 = vmatprep.mubr.f32.mxu1 %v8885_v3 }
  0x58   :  { %628 = vmatprep.subr.mxu0 %v5404_v33  ;;  %717 = vmatprep.subr.mxu1 %v5409_v34 }
  0x59   :  { %4088 = vmatmul.mubr.msk.f32.gmra.mxu0 %vm94_vm0, %v5607_v60  ;;  %4092 = vmatmul.mubr.msk.f32.gmra.mxu1 %vm94_vm0, %v5607_v60 }
  0x5a   :  { %629 = vmatpush1.msra.mxu0 %v5416_v35  ;;  %718 = vmatpush1.msra.mxu1 %v5421_v36 }
  0x5b   :  { %630 = vmatprep.subr.mxu0 %v5428_v37  ;;  %719 = vmatprep.subr.mxu1 %v5433_v38 }
  0x5c   :  { %631 = vmatpush1.msra.mxu0 %v5440_v39  ;;  %720 = vmatpush1.msra.mxu1 %v5445_v40 }
  0x5d   :  { %632 = vmatprep.subr.mxu0 %v5452_v41  ;;  %721 = vmatprep.subr.mxu1 %v5457_v42  ;;  %v5738_v41 = vld [vmem:[%s8881_s0 + $0x1e0] sm:$0xff]  ;;  %v5743_v42 = vld [vmem:[%s8881_s0 + $0x1f0] sm:$0xff] }
  0x5e   :  { %633 = vmatpush1.msra.mxu0 %v5464_v43  ;;  %666 = vmatprep.mubr.f32.mxu0 %v8885_v3  ;;  %v6075_v43 = vld [vmem:[%s8881_s0 + $0xb0] sm:$0xff] }
  0x5f   :  { %722 = vmatpush1.msra.mxu1 %v5469_v44  ;;  %755 = vmatprep.mubr.f32.mxu1 %v8885_v3  ;;  %v4262_v44 = vld [vmem:[%s8881_s0 + $0x88] sm:$0xff] }
  0x60   :  { %4161 = vmatmul.mubr.msk.f32.vlgmr.msra.gmra.mxu0 %vm94_vm0, %v5516_v53  ;;  %4165 = vmatmul.mubr.msk.f32.vlgmr.msra.gmra.mxu1 %vm94_vm0, %v5516_v53 }
  0x61   :  { %856 = vmatprep.subr.mxu0 %v5726_v46  ;;  %945 = vmatprep.subr.mxu1 %v5731_v47 }
  0x62   :  { %857 = vmatpush1.msra.mxu0 %v5738_v41  ;;  %946 = vmatpush1.msra.mxu1 %v5743_v42 }
  0x63   :  { %858 = vmatprep.subr.mxu0 %v5630_v61  ;;  %947 = vmatprep.subr.mxu1 %v5635_v62 }
  0x64   :  { %859 = vmatpush1.msra.mxu0 %v5642_v63  ;;  %948 = vmatpush1.msra.mxu1 %v5647_v45 }
  0x65   :  { %860 = vmatprep.subr.mxu0 %v5521_v54  ;;  %949 = vmatprep.subr.mxu1 %v5526_v55 }
  0x66   :  { %861 = vmatpush1.msra.mxu0 %v5531_v56  ;;  %950 = vmatpush1.msra.mxu1 %v5536_v57 }
  0x67   :  { %862 = vmatprep.subr.mxu0 %v5214_v0  ;;  %951 = vmatprep.subr.mxu1 %v5219_v1  ;;  %v18_v0 = vld [vmem:[%s8883_s2] sm:$0xff]  ;;  %v5190_v1 = vmov 0  }
  0x68   :  { %863 = vmatpush1.msra.mxu0 %v5224_v2  ;;  %952 = vmatpush1.msra.mxu1 %v5233_v4  ;;  %v5825_v2 = vld [vmem:[%s8881_s0 + $0x208] sm:$0xff]  ;;  %v5830_v4 = vld [vmem:[%s8881_s0 + $0x218] sm:$0xff] }
  0x69   :  { %864 = vmatprep.subr.mxu0 %v5238_v5  ;;  %953 = vmatprep.subr.mxu1 %v5243_v6  ;;  %v5837_v5 = vld [vmem:[%s8881_s0 + $0x200] sm:$0xff]  ;;  %v5842_v6 = vld [vmem:[%s8881_s0 + $0x210] sm:$0xff] }
  0x6a   :  { %865 = vmatpush1.msra.mxu0 %v5250_v7  ;;  %954 = vmatpush1.msra.mxu1 %v5255_v8  ;;  %v19_v7 = vld [vmem:[%s8883_s2 + $0x8] sm:$0xff] }
  0x6b   :  { %866 = vmatprep.subr.mxu0 %v5260_v9  ;;  %955 = vmatprep.subr.mxu1 %v5267_v10  ;;  %v5866_v8 = vld [vmem:[%s8881_s0 + $0x188] sm:$0xff]  ;;  %v5872_v9 = vld [vmem:[%s8881_s0 + $0x198] sm:$0xff]  ;;  %v5879_v10 = vld [vmem:[%s8881_s0 + $0x180] sm:$0xff] }
  0x6c   :  { %867 = vmatpush1.msra.mxu0 %v5272_v11  ;;  %956 = vmatpush1.msra.mxu1 %v5277_v12  ;;  %v5884_v11 = vld [vmem:[%s8881_s0 + $0x190] sm:$0xff] }
  0x6d   :  { %672 = vmatprep.mubr.f32.mxu0 %v8885_v3  ;;  %761 = vmatprep.mubr.f32.mxu1 %v8885_v3  ;;  %v20_v12 = vld [vmem:[%s8883_s2 + $0x10] sm:$0xff] }
  0x6e   :  { %868 = vmatprep.subr.mxu0 %v5284_v13  ;;  %957 = vmatprep.subr.mxu1 %v5289_v14  ;;  %v5894_v13 = vld [vmem:[%s8881_s0 + $0x168] sm:$0xff]  ;;  %v5900_v14 = vld [vmem:[%s8881_s0 + $0x178] sm:$0xff] }
  0x6f   :  { %4162 = vmatmul.mubr.msk.f32.gmra.mxu0 %vm94_vm0, %v5569_v58  ;;  %4166 = vmatmul.mubr.msk.f32.gmra.mxu1 %vm94_vm0, %v5569_v58 }
  0x70   :  { %869 = vmatpush1.msra.mxu0 %v5296_v15  ;;  %958 = vmatpush1.msra.mxu1 %v5301_v16  ;;  %v5905_v15 = vld [vmem:[%s8881_s0 + $0x160] sm:$0xff]  ;;  %v5912_v16 = vld [vmem:[%s8881_s0 + $0x170] sm:$0xff] }
  0x71   :  { %870 = vmatprep.subr.mxu0 %v5308_v17  ;;  %959 = vmatprep.subr.mxu1 %v5313_v18  ;;  %v5918_v17 = vld [vmem:[%s8881_s0 + $0x148] sm:$0xff]  ;;  %v5925_v18 = vld [vmem:[%s8881_s0 + $0x158] sm:$0xff] }
  0x72   :  { %871 = vmatpush1.msra.mxu0 %v5320_v19  ;;  %960 = vmatpush1.msra.mxu1 %v5325_v20  ;;  %v5932_v19 = vld [vmem:[%s8881_s0 + $0x140] sm:$0xff]  ;;  %v5939_v20 = vld [vmem:[%s8881_s0 + $0x150] sm:$0xff] }
  0x73   :  { %678 = vmatprep.mubr.f32.mxu0 %v8885_v3  ;;  %767 = vmatprep.mubr.f32.mxu1 %v8885_v3 }
  0x74   :  { %872 = vmatprep.subr.mxu0 %v5332_v21  ;;  %961 = vmatprep.subr.mxu1 %v5337_v22  ;;  %v21_v21 = vld [vmem:[%s8883_s2 + $0x18] sm:$0xff]  ;;  %v5950_v22 = vld [vmem:[%s8881_s0 + $0x128] sm:$0xff] }
  0x75   :  { %5175 = vset.pattern.permute.xlu0 %v5190_v1  ;;  %4163 = vmatmul.mubr.msk.f32.gmra.mxu0 %vm94_vm0, %v5588_v59 }
  0x76   :  { %4167 = vmatmul.mubr.msk.f32.gmra.mxu1 %vm94_vm0, %v5588_v59  ;;  %873 = vmatpush1.msra.mxu0 %v5344_v23  ;;  %v5955_v23 = vld [vmem:[%s8881_s0 + $0x138] sm:$0xff] }
  0x77   :  { %962 = vmatpush1.msra.mxu1 %v5349_v24  ;;  %24 = vperm.xlu0 %5175, %v18_v0   ;;  %v5963_v24 = vld [vmem:[%s8881_s0 + $0x120] sm:$0xff] }
  0x78   :  { %874 = vmatprep.subr.mxu0 %v5356_v25  ;;  %963 = vmatprep.subr.mxu1 %v5361_v26  ;;  %v5968_v25 = vld [vmem:[%s8881_s0 + $0x130] sm:$0xff]  ;;  %v5976_v26 = vld [vmem:[%s8881_s0 + $0x108] sm:$0xff]  ;;  %v6148_v0 = vld [vmem:[%s8881_s0 + $0x1a0] sm:$0xff] }
  0x79   :  { %875 = vmatpush1.msra.mxu0 %v5368_v27  ;;  %964 = vmatpush1.msra.mxu1 %v5373_v28  ;;  %v5981_v27 = vld [vmem:[%s8881_s0 + $0x118] sm:$0xff]  ;;  %v5990_v28 = vld [vmem:[%s8881_s0 + $0x100] sm:$0xff] }
  0x7a   :  { %684 = vmatprep.mubr.f32.mxu0 %v8885_v3  ;;  %773 = vmatprep.mubr.f32.mxu1 %v8885_v3 }
  0x7b   :  { %876 = vmatprep.subr.mxu0 %v5380_v29  ;;  %965 = vmatprep.subr.mxu1 %v5385_v30  ;;  %v5995_v29 = vld [vmem:[%s8881_s0 + $0x110] sm:$0xff]  ;;  %v6002_v30 = vld [vmem:[%s8881_s0 + $0xe8] sm:$0xff] }
  0x7c   :  { %4164 = vmatmul.mubr.msk.f32.gmra.mxu0 %vm94_vm0, %v5607_v60  ;;  %4168 = vmatmul.mubr.msk.f32.gmra.mxu1 %vm94_vm0, %v5607_v60 }
  0x7d   :  { %877 = vmatpush1.msra.mxu0 %v5392_v31  ;;  %966 = vmatpush1.msra.mxu1 %v5397_v32  ;;  %v6007_v31 = vld [vmem:[%s8881_s0 + $0xf8] sm:$0xff]  ;;  %v6016_v32 = vld [vmem:[%s8881_s0 + $0xe0] sm:$0xff] }
  0x7e   :  { %878 = vmatprep.subr.mxu0 %v5404_v33  ;;  %967 = vmatprep.subr.mxu1 %v5409_v34  ;;  %v6021_v33 = vld [vmem:[%s8881_s0 + $0xf0] sm:$0xff]  ;;  %v6030_v34 = vld [vmem:[%s8881_s0 + $0xc8] sm:$0xff] }
  0x7f   :  { %879 = vmatpush1.msra.mxu0 %v5416_v35  ;;  %968 = vmatpush1.msra.mxu1 %v5421_v36  ;;  %v6035_v35 = vld [vmem:[%s8881_s0 + $0xd8] sm:$0xff]  ;;  %v6044_v36 = vld [vmem:[%s8881_s0 + $0xc0] sm:$0xff] }
  0x80   :  { %880 = vmatprep.subr.mxu0 %v5428_v37  ;;  %969 = vmatprep.subr.mxu1 %v5433_v38  ;;  %v6049_v37 = vld [vmem:[%s8881_s0 + $0xd0] sm:$0xff]  ;;  %v6056_v38 = vld [vmem:[%s8881_s0 + $0xa8] sm:$0xff] }
  0x81   :  { %881 = vmatpush1.msra.mxu0 %v5440_v39  ;;  %914 = vmatprep.mubr.f32.mxu0 %v8885_v3  ;;  %v6061_v39 = vld [vmem:[%s8881_s0 + $0xb8] sm:$0xff] }
  0x82   :  { %970 = vmatpush1.msra.mxu1 %v5445_v40  ;;  %1003 = vmatprep.mubr.f32.mxu1 %v8885_v3  ;;  %v6070_v40 = vld [vmem:[%s8881_s0 + $0xa0] sm:$0xff] }
  0x83   :  { %4237 = vmatmul.mubr.msk.f32.vlgmr.msra.gmra.mxu0 %vm94_vm0, %v5516_v53  ;;  %4241 = vmatmul.mubr.msk.f32.vlgmr.msra.gmra.mxu1 %vm94_vm0, %v5516_v53 }
  0x84   :  { %1104 = vmatprep.subr.mxu0 %v5825_v2  ;;  %1193 = vmatprep.subr.mxu1 %v5830_v4 }
  0x85   :  { %1105 = vmatpush1.msra.mxu0 %v5837_v5  ;;  %1194 = vmatpush1.msra.mxu1 %v5842_v6 }
  0x86   :  { %1106 = vmatprep.subr.mxu0 %v5726_v46  ;;  %1195 = vmatprep.subr.mxu1 %v5731_v47 }
  0x87   :  { %1107 = vmatpush1.msra.mxu0 %v5738_v41  ;;  %1196 = vmatpush1.msra.mxu1 %v5743_v42 }
  0x88   :  { %1108 = vmatprep.subr.mxu0 %v5630_v61  ;;  %1197 = vmatprep.subr.mxu1 %v5635_v62 }
  0x89   :  { %1109 = vmatpush1.msra.mxu0 %v5642_v63  ;;  %1198 = vmatpush1.msra.mxu1 %v5647_v45 }
  0x8a   :  { %29 = vperm.xlu0 %5175, %v19_v7   ;;  %1110 = vmatprep.subr.mxu0 %v5521_v54  ;;  %v6110_v54 = vld [vmem:[%s8881_s0 + $0x220] sm:$0xff]  ;;  %v6252_v7 = vld [vmem:[%s8881_s0 + $0x1c8] sm:$0xff] }
  0x8b   :  { %1199 = vmatprep.subr.mxu1 %v5526_v55  ;;  %1111 = vmatpush1.msra.mxu0 %v5531_v56  ;;  %8891 = vst [vmem:[#allocation3_spill] sm:$0xff] %v6110_v54  ;;  %v6115_v55 = vld [vmem:[%s8881_s0 + $0x230] sm:$0xff]  ;;  %v6136_v56 = vld [vmem:[%s8881_s0 + $0x1a8] sm:$0xff] }
  0x8c   :  { %1200 = vmatpush1.msra.mxu1 %v5536_v57  ;;  %1112 = vmatprep.subr.mxu0 %v5866_v8  ;;  %8892 = vst [vmem:[#allocation4_spill] sm:$0xff] %v6115_v55  ;;  %v6141_v57 = vld [vmem:[%s8881_s0 + $0x1b8] sm:$0xff] }
  0x8d   :  { %1201 = vmatprep.subr.mxu1 %v5872_v9  ;;  %5176 = vset.pattern.permute.xlu1 %v5190_v1  ;;  %v6153_v1 = vld [vmem:[%s8881_s0 + $0x1b0] sm:$0xff] }
  0x8e   :  { %1113 = vmatpush1.msra.mxu0 %v5879_v10  ;;  %1202 = vmatpush1.msra.mxu1 %v5884_v11 }
  0x8f   :  { %34 = vperm.xlu1 %5176, %v20_v12   ;;  %1114 = vmatprep.subr.mxu0 %v5894_v13  ;;  %v6257_v12 = vld [vmem:[%s8881_s0 + $0x1d8] sm:$0xff] }
  0x90   :  { %1203 = vmatprep.subr.mxu1 %v5900_v14  ;;  %1115 = vmatpush1.msra.mxu0 %v5905_v15 }
  0x91   :  { %1204 = vmatpush1.msra.mxu1 %v5912_v16  ;;  %920 = vmatprep.mubr.f32.mxu0 %v8885_v3 }
  0x92   :  { %1009 = vmatprep.mubr.f32.mxu1 %v8885_v3  ;;  %1116 = vmatprep.subr.mxu0 %v5918_v17 }
  0x93   :  { %1205 = vmatprep.subr.mxu1 %v5925_v18  ;;  %4238 = vmatmul.mubr.msk.f32.gmra.mxu0 %vm94_vm0, %v5569_v58 }
  0x94   :  { %4242 = vmatmul.mubr.msk.f32.gmra.mxu1 %vm94_vm0, %v5569_v58  ;;  %1117 = vmatpush1.msra.mxu0 %v5932_v19 }
  0x95   :  { %1206 = vmatpush1.msra.mxu1 %v5939_v20  ;;  %39 = vperm.xlu1 %5176, %v21_v21   ;;  %v6264_v21 = vld [vmem:[%s8881_s0 + $0x1c0] sm:$0xff] }
  0x96   :  { %1118 = vmatprep.subr.mxu0 %v5950_v22  ;;  %1207 = vmatprep.subr.mxu1 %v5955_v23 }
  0x97   :  { %1119 = vmatpush1.msra.mxu0 %v5963_v24  ;;  %1208 = vmatpush1.msra.mxu1 %v5968_v25 }
  0x98   :  { %926 = vmatprep.mubr.f32.mxu0 %v8885_v3  ;;  %1015 = vmatprep.mubr.f32.mxu1 %v8885_v3 }
  0x99   :  { %1120 = vmatprep.subr.mxu0 %v5976_v26  ;;  %1209 = vmatprep.subr.mxu1 %v5981_v27 }
  0x9a   :  { %4239 = vmatmul.mubr.msk.f32.gmra.mxu0 %vm94_vm0, %v5588_v59  ;;  %4243 = vmatmul.mubr.msk.f32.gmra.mxu1 %vm94_vm0, %v5588_v59 }
  0x9b   :  { %1121 = vmatpush1.msra.mxu0 %v5990_v28  ;;  %1210 = vmatpush1.msra.mxu1 %v5995_v29 }
  0x9c   :  { %1122 = vmatprep.subr.mxu0 %v6002_v30  ;;  %1211 = vmatprep.subr.mxu1 %v6007_v31 }
  0x9d   :  { %1123 = vmatpush1.msra.mxu0 %v6016_v32  ;;  %1212 = vmatpush1.msra.mxu1 %v6021_v33 }
  0x9e   :  { %932 = vmatprep.mubr.f32.mxu0 %v8885_v3  ;;  %1021 = vmatprep.mubr.f32.mxu1 %v8885_v3 }
  0x9f   :  { %1124 = vmatprep.subr.mxu0 %v6030_v34  ;;  %1213 = vmatprep.subr.mxu1 %v6035_v35 }
  0xa0   :  { %4240 = vmatmul.mubr.msk.f32.gmra.mxu0 %vm94_vm0, %v5607_v60  ;;  %4244 = vmatmul.mubr.msk.f32.gmra.mxu1 %vm94_vm0, %v5607_v60 }
  0xa1   :  { %1125 = vmatpush1.msra.mxu0 %v6044_v36  ;;  %1214 = vmatpush1.msra.mxu1 %v6049_v37 }
  0xa2   :  { %1126 = vmatprep.subr.mxu0 %v6056_v38  ;;  %1215 = vmatprep.subr.mxu1 %v6061_v39 }
  0xa3   :  { %1127 = vmatpush1.msra.mxu0 %v6070_v40  ;;  %1216 = vmatpush1.msra.mxu1 %v6075_v43 }
  0xa4   :  { %1128 = vmatprep.subr.mxu0 %v4262_v44  ;;  %1217 = vmatprep.subr.mxu1 %v4264_v48  ;;  %v6392_v48 = vld [vmem:[%s8881_s0 + $0x1e0] sm:$0xff] }
  0xa5   :  { %1129 = vmatpush1.msra.mxu0 %v4261_v49  ;;  %1162 = vmatprep.mubr.f32.mxu0 %v8885_v3  ;;  %v6397_v49 = vld [vmem:[%s8881_s0 + $0x1f0] sm:$0xff] }
  0xa6   :  { %1218 = vmatpush1.msra.mxu1 %v4263_v50  ;;  %1251 = vmatprep.mubr.f32.mxu1 %v8885_v3 }
  0xa7   :  { %4313 = vmatmul.mubr.msk.f32.vlgmr.msra.gmra.mxu0 %vm94_vm0, %v5516_v53  ;;  %4317 = vmatmul.mubr.msk.f32.vlgmr.msra.gmra.mxu1 %vm94_vm0, %v5516_v53 }
  0xa8   :  { %1352 = vmatprep.subr.mxu0 %v6099_v51  ;;  %1441 = vmatprep.subr.mxu1 %v6104_v52 }
  0xa9   :  { %1353 = vmatpush1.msra.mxu0 %v6110_v54  ;;  %1442 = vmatpush1.msra.mxu1 %v6115_v55 }
  0xaa   :  { %1354 = vmatprep.subr.mxu0 %v5825_v2  ;;  %1443 = vmatprep.subr.mxu1 %v5830_v4 }
  0xab   :  { %1355 = vmatpush1.msra.mxu0 %v5837_v5  ;;  %1444 = vmatpush1.msra.mxu1 %v5842_v6 }
  0xac   :  { %1356 = vmatprep.subr.mxu0 %v5726_v46  ;;  %1445 = vmatprep.subr.mxu1 %v5731_v47 }
  0xad   :  { %1357 = vmatpush1.msra.mxu0 %v5738_v41  ;;  %1446 = vmatpush1.msra.mxu1 %v5743_v42 }
  0xae   :  { %1358 = vmatprep.subr.mxu0 %v5630_v61  ;;  %1447 = vmatprep.subr.mxu1 %v5635_v62  ;;  %v6214_v61 = vld [vmem:[%s8881_s0 + $0x248] sm:$0xff]  ;;  %v6219_v62 = vld [vmem:[%s8881_s0 + $0x258] sm:$0xff] }
  0xaf   :  { %1359 = vmatpush1.msra.mxu0 %v5642_v63  ;;  %1448 = vmatpush1.msra.mxu1 %v5647_v45  ;;  %v6226_v63 = vld [vmem:[%s8881_s0 + $0x240] sm:$0xff]  ;;  %v6231_v45 = vld [vmem:[%s8881_s0 + $0x250] sm:$0xff] }
  0xb0   :  { %1360 = vmatprep.subr.mxu0 %v6136_v56  ;;  %1449 = vmatprep.subr.mxu1 %v6141_v57 }
  0xb1   :  { %1361 = vmatpush1.msra.mxu0 %v6148_v0  ;;  %1450 = vmatpush1.msra.mxu1 %v6153_v1 }
  0xb2   :  { %1362 = vmatprep.subr.mxu0 %v5866_v8  ;;  %1451 = vmatprep.subr.mxu1 %v5872_v9 }
  0xb3   :  { %1363 = vmatpush1.msra.mxu0 %v5879_v10  ;;  %1452 = vmatpush1.msra.mxu1 %v5884_v11 }
  0xb4   :  { %1168 = vmatprep.mubr.f32.mxu0 %v8885_v3  ;;  %1257 = vmatprep.mubr.f32.mxu1 %v8885_v3 }
  0xb5   :  { %1364 = vmatprep.subr.mxu0 %v5894_v13  ;;  %1453 = vmatprep.subr.mxu1 %v5900_v14 }
  0xb6   :  { %4314 = vmatmul.mubr.msk.f32.gmra.mxu0 %vm94_vm0, %v5569_v58  ;;  %4318 = vmatmul.mubr.msk.f32.gmra.mxu1 %vm94_vm0, %v5569_v58 }
  0xb7   :  { %1365 = vmatpush1.msra.mxu0 %v5905_v15  ;;  %1454 = vmatpush1.msra.mxu1 %v5912_v16 }
  0xb8   :  { %1366 = vmatprep.subr.mxu0 %v5918_v17  ;;  %1455 = vmatprep.subr.mxu1 %v5925_v18 }
  0xb9   :  { %1367 = vmatpush1.msra.mxu0 %v5932_v19  ;;  %1456 = vmatpush1.msra.mxu1 %v5939_v20 }
  0xba   :  { %1174 = vmatprep.mubr.f32.mxu0 %v8885_v3  ;;  %1263 = vmatprep.mubr.f32.mxu1 %v8885_v3 }
  0xbb   :  { %1368 = vmatprep.subr.mxu0 %v5950_v22  ;;  %1457 = vmatprep.subr.mxu1 %v5955_v23 }
  0xbc   :  { %4315 = vmatmul.mubr.msk.f32.gmra.mxu0 %vm94_vm0, %v5588_v59  ;;  %4319 = vmatmul.mubr.msk.f32.gmra.mxu1 %vm94_vm0, %v5588_v59 }
  0xbd   :  { %1369 = vmatpush1.msra.mxu0 %v5963_v24  ;;  %1458 = vmatpush1.msra.mxu1 %v5968_v25 }
  0xbe   :  { %1370 = vmatprep.subr.mxu0 %v5976_v26  ;;  %1459 = vmatprep.subr.mxu1 %v5981_v27 }
  0xbf   :  { %1371 = vmatpush1.msra.mxu0 %v5990_v28  ;;  %1460 = vmatpush1.msra.mxu1 %v5995_v29 }
  0xc0   :  { %1180 = vmatprep.mubr.f32.mxu0 %v8885_v3  ;;  %1269 = vmatprep.mubr.f32.mxu1 %v8885_v3 }
  0xc1   :  { %1372 = vmatprep.subr.mxu0 %v6002_v30  ;;  %1461 = vmatprep.subr.mxu1 %v6007_v31 }
  0xc2   :  { %4316 = vmatmul.mubr.msk.f32.gmra.mxu0 %vm94_vm0, %v5607_v60  ;;  %4320 = vmatmul.mubr.msk.f32.gmra.mxu1 %vm94_vm0, %v5607_v60 }
  0xc3   :  { %1373 = vmatpush1.msra.mxu0 %v6016_v32  ;;  %1462 = vmatpush1.msra.mxu1 %v6021_v33 }
  0xc4   :  { %1374 = vmatprep.subr.mxu0 %v6030_v34  ;;  %1463 = vmatprep.subr.mxu1 %v6035_v35 }
  0xc5   :  { %1375 = vmatpush1.msra.mxu0 %v6044_v36  ;;  %1464 = vmatpush1.msra.mxu1 %v6049_v37 }
  0xc6   :  { %1376 = vmatprep.subr.mxu0 %v6056_v38  ;;  %1465 = vmatprep.subr.mxu1 %v6061_v39  ;;  %v6269_v38 = vld [vmem:[%s8881_s0 + $0x1d0] sm:$0xff] }
  0xc7   :  { %1377 = vmatpush1.msra.mxu0 %v6070_v40  ;;  %1410 = vmatprep.mubr.f32.mxu0 %v8885_v3  ;;  %v6381_v40 = vld [vmem:[%s8881_s0 + $0x1f8] sm:$0xff] }
  0xc8   :  { %1466 = vmatpush1.msra.mxu1 %v6075_v43  ;;  %1499 = vmatprep.mubr.f32.mxu1 %v8885_v3 }
  0xc9   :  { %4389 = vmatmul.mubr.msk.f32.vlgmr.msra.gmra.mxu0 %vm94_vm0, %v5516_v53  ;;  %4393 = vmatmul.mubr.msk.f32.vlgmr.msra.gmra.mxu1 %vm94_vm0, %v5516_v53 }
  0xca   :  { %1600 = vmatprep.subr.mxu0 %v6214_v61  ;;  %1689 = vmatprep.subr.mxu1 %v6219_v62 }
  0xcb   :  { %1601 = vmatpush1.msra.mxu0 %v6226_v63  ;;  %1690 = vmatpush1.msra.mxu1 %v6231_v45 }
  0xcc   :  { %1602 = vmatprep.subr.mxu0 %v6099_v51  ;;  %1691 = vmatprep.subr.mxu1 %v6104_v52 }
  0xcd   :  { %1603 = vmatpush1.msra.mxu0 %v6110_v54  ;;  %1692 = vmatpush1.msra.mxu1 %v6115_v55 }
  0xce   :  { %1604 = vmatprep.subr.mxu0 %v5825_v2  ;;  %1693 = vmatprep.subr.mxu1 %v5830_v4 }
  0xcf   :  { %1605 = vmatpush1.msra.mxu0 %v5837_v5  ;;  %1694 = vmatpush1.msra.mxu1 %v5842_v6 }
  0xd0   :  { %1606 = vmatprep.subr.mxu0 %v5726_v46  ;;  %1695 = vmatprep.subr.mxu1 %v5731_v47  ;;  %v6335_v46 = vld [vmem:[%s8881_s0 + $0x278] sm:$0xff] }
  0xd1   :  { %1607 = vmatpush1.msra.mxu0 %v5738_v41  ;;  %1696 = vmatpush1.msra.mxu1 %v5743_v42  ;;  %v6342_v42 = vld [vmem:[%s8881_s0 + $0x260] sm:$0xff] }
  0xd2   :  { %1608 = vmatprep.subr.mxu0 %v6252_v7  ;;  %1697 = vmatprep.subr.mxu1 %v6257_v12 }
  0xd3   :  { %1609 = vmatpush1.msra.mxu0 %v6264_v21  ;;  %1698 = vmatpush1.msra.mxu1 %v6269_v38 }
  0xd4   :  { %1610 = vmatprep.subr.mxu0 %v6136_v56  ;;  %1699 = vmatprep.subr.mxu1 %v6141_v57 }
  0xd5   :  { %1611 = vmatpush1.msra.mxu0 %v6148_v0  ;;  %1700 = vmatpush1.msra.mxu1 %v6153_v1 }
  0xd6   :  { %1416 = vmatprep.mubr.f32.mxu0 %v8885_v3  ;;  %1505 = vmatprep.mubr.f32.mxu1 %v8885_v3 }
  0xd7   :  { %1612 = vmatprep.subr.mxu0 %v5866_v8  ;;  %1701 = vmatprep.subr.mxu1 %v5872_v9 }
  0xd8   :  { %4390 = vmatmul.mubr.msk.f32.gmra.mxu0 %vm94_vm0, %v5569_v58  ;;  %4394 = vmatmul.mubr.msk.f32.gmra.mxu1 %vm94_vm0, %v5569_v58 }
  0xd9   :  { %1613 = vmatpush1.msra.mxu0 %v5879_v10  ;;  %1702 = vmatpush1.msra.mxu1 %v5884_v11 }
  0xda   :  { %1614 = vmatprep.subr.mxu0 %v5894_v13  ;;  %1703 = vmatprep.subr.mxu1 %v5900_v14 }
  0xdb   :  { %1615 = vmatpush1.msra.mxu0 %v5905_v15  ;;  %1704 = vmatpush1.msra.mxu1 %v5912_v16 }
  0xdc   :  { %1422 = vmatprep.mubr.f32.mxu0 %v8885_v3  ;;  %1511 = vmatprep.mubr.f32.mxu1 %v8885_v3  ;;  %v173_v58 = vpop.f32.mrf.mxu0 }
  0xdd   :  { %1616 = vmatprep.subr.mxu0 %v5918_v17  ;;  %1705 = vmatprep.subr.mxu1 %v5925_v18 }
  0xde   :  { %4391 = vmatmul.mubr.msk.f32.gmra.mxu0 %vm94_vm0, %v5588_v59  ;;  %4395 = vmatmul.mubr.msk.f32.gmra.mxu1 %vm94_vm0, %v5588_v59  ;;  %v262_v59 = vpop.f32.mrf.mxu1  ;;  %v175_v47 = vpop.f32.mrf.mxu0 }
  0xdf   :  { %1617 = vmatpush1.msra.mxu0 %v5932_v19  ;;  %1706 = vmatpush1.msra.mxu1 %v5939_v20 }
  0xe0   :  { %1618 = vmatprep.subr.mxu0 %v5950_v22  ;;  %1707 = vmatprep.subr.mxu1 %v5955_v23  ;;  %v264_v41 = vpop.f32.mrf.mxu1 }
  0xe1   :  { %1619 = vmatpush1.msra.mxu0 %v5963_v24  ;;  %1708 = vmatpush1.msra.mxu1 %v5968_v25 }
  0xe2   :  { %1428 = vmatprep.mubr.f32.mxu0 %v8885_v3  ;;  %1517 = vmatprep.mubr.f32.mxu1 %v8885_v3 }
  0xe3   :  { %1620 = vmatprep.subr.mxu0 %v5976_v26  ;;  %1709 = vmatprep.subr.mxu1 %v5981_v27 }
  0xe4   :  { %4392 = vmatmul.mubr.msk.f32.gmra.mxu0 %vm94_vm0, %v5607_v60  ;;  %4396 = vmatmul.mubr.msk.f32.gmra.mxu1 %vm94_vm0, %v5607_v60  ;;  %v6330_v60 = vld [vmem:[%s8881_s0 + $0x268] sm:$0xff] }
  0xe5   :  { %1621 = vmatpush1.msra.mxu0 %v5990_v28  ;;  %1710 = vmatpush1.msra.mxu1 %v5995_v29 }
  0xe6   :  { %1622 = vmatprep.subr.mxu0 %v6002_v30  ;;  %1711 = vmatprep.subr.mxu1 %v6007_v31 }
  0xe7   :  { %1623 = vmatpush1.msra.mxu0 %v6016_v32  ;;  %1712 = vmatpush1.msra.mxu1 %v6021_v33 }
  0xe8   :  { %1624 = vmatprep.subr.mxu0 %v6030_v34  ;;  %1713 = vmatprep.subr.mxu1 %v6035_v35  ;;  %v6347_v34 = vld [vmem:[%s8881_s0 + $0x270] sm:$0xff] }
  0xe9   :  { %1625 = vmatpush1.msra.mxu0 %v6044_v36  ;;  %1658 = vmatprep.mubr.f32.mxu0 %v8885_v3 }
  0xea   :  { %1714 = vmatpush1.msra.mxu1 %v6049_v37  ;;  %1747 = vmatprep.mubr.f32.mxu1 %v8885_v3 }
  0xeb   :  { %4465 = vmatmul.mubr.msk.f32.vlgmr.msra.gmra.mxu0 %vm94_vm0, %v5516_v53  ;;  %4469 = vmatmul.mubr.msk.f32.vlgmr.msra.gmra.mxu1 %vm94_vm0, %v5516_v53  ;;  %v6353_v35 = vpop.f32.mrf.mxu0  ;;  %v6355_v36 = vpop.f32.mrf.mxu1  ;;  %v6376_v53 = vld [vmem:[%s8881_s0 + $0x1e8] sm:$0xff] }
  0xec   :  { %1848 = vmatprep.subr.mxu0 %v6330_v60  ;;  %1937 = vmatprep.subr.mxu1 %v6335_v46 }
  0xed   :  { %1849 = vmatpush1.msra.mxu0 %v6342_v42  ;;  %1938 = vmatpush1.msra.mxu1 %v6347_v34  ;;  %v6361_v37 = vpop.f32.mrf.mxu0  ;;  %v6363_v39 = vpop.f32.mrf.mxu1 }
  0xee   :  { %1850 = vmatprep.subr.mxu0 %v6214_v61  ;;  %1939 = vmatprep.subr.mxu1 %v6219_v62 }
  0xef   :  { %1851 = vmatpush1.msra.mxu0 %v6226_v63  ;;  %1940 = vmatpush1.msra.mxu1 %v6231_v45 }
  0xf0   :  { %1852 = vmatprep.subr.mxu0 %v6099_v51  ;;  %1941 = vmatprep.subr.mxu1 %v6104_v52 }
  0xf1   :  { %1853 = vmatpush1.msra.mxu0 %v6110_v54  ;;  %1942 = vmatpush1.msra.mxu1 %v6115_v55  ;;  %v6383_v43 = vpop.f32.mrf.mxu0  ;;  %v6385_v44 = vpop.f32.mrf.mxu1 }
  0xf2   :  { %1854 = vmatprep.subr.mxu0 %v5825_v2  ;;  %1943 = vmatprep.subr.mxu1 %v5830_v4  ;;  %v6399_v50 = vpop.permute.xlu0 %24 }
  0xf3   :  { %1855 = vmatpush1.msra.mxu0 %v5837_v5  ;;  %1944 = vmatpush1.msra.mxu1 %v5842_v6  ;;  %v174_v2 = vadd.f32 %v173_v58, %v6399_v50  ;;  %v263_v4 = vadd.f32 %v262_v59, %v6399_v50  ;;  %v176_v3 = vadd.f32 %v175_v47, %v6399_v50  ;;  %v6406_v55 = vpop.f32.mrf.mxu0  ;;  %v6408_v54 = vpop.f32.mrf.mxu1  ;;  %v8893_v58 = vmov 0.0  }
  0xf4   :  { %1856 = vmatprep.subr.mxu0 %v6376_v53  ;;  %1945 = vmatprep.subr.mxu1 %v6381_v40  ;;  %v265_v52 = vadd.f32 %v264_v41, %v6399_v50 }
  0xf5   :  { %1857 = vmatpush1.msra.mxu0 %v6392_v48  ;;  %1946 = vmatpush1.msra.mxu1 %v6397_v49  ;;  %285 = vst [vmem:[%s8884_s3] sm:$0xff] %v174_v2  ;;  %287 = vst [vmem:[%s8884_s3 + $0x10] sm:$0xff] %v263_v4 }
  0xf6   :  { %286 = vst [vmem:[%s8884_s3 + $0x8] sm:$0xff] %v176_v3  ;;  %1858 = vmatprep.subr.mxu0 %v6252_v7  ;;  %1947 = vmatprep.subr.mxu1 %v6257_v12  ;;  %288 = vst [vmem:[%s8884_s3 + $0x18] sm:$0xff] %v265_v52  ;;  %v6442_v3 = vld [vmem:[%s8882_s1 + $0x8] sm:$0xff] }
  0xf7   :  { %1859 = vmatpush1.msra.mxu0 %v6264_v21  ;;  %1948 = vmatpush1.msra.mxu1 %v6269_v38  ;;  %v6431_v5 = vpop.f32.mrf.mxu0  ;;  %v6433_v6 = vpop.f32.mrf.mxu1 }
  0xf8   :  { %1664 = vmatprep.mubr.f32.mxu0 %v8893_v58  ;;  %1753 = vmatprep.mubr.f32.mxu1 %v8893_v58 }
  0xf9   :  { %1860 = vmatprep.subr.mxu0 %v6136_v56  ;;  %1949 = vmatprep.subr.mxu1 %v6141_v57  ;;  %v6448_v52 = vpop.f32.mrf.mxu0  ;;  %v6450_v59 = vpop.f32.mrf.mxu1 }
  0xfa   :  { %4466 = vmatmul.mubr.msk.f32.gmra.mxu0 %vm94_vm0, %v6442_v3  ;;  %4470 = vmatmul.mubr.msk.f32.gmra.mxu1 %vm94_vm0, %v6442_v3 }
  0xfb   :  { %1861 = vmatpush1.msra.mxu0 %v6148_v0  ;;  %1950 = vmatpush1.msra.mxu1 %v6153_v1 }
  0xfc   :  { %1862 = vmatprep.subr.mxu0 %v5866_v8  ;;  %1951 = vmatprep.subr.mxu1 %v5872_v9  ;;  %v6467_v9 = vld [vmem:[%s8882_s1 + $0x10] sm:$0xff] }
  0xfd   :  { %1863 = vmatpush1.msra.mxu0 %v5879_v10  ;;  %1952 = vmatpush1.msra.mxu1 %v5884_v11 }
  0xfe   :  { %1670 = vmatprep.mubr.f32.mxu0 %v8893_v58  ;;  %1759 = vmatprep.mubr.f32.mxu1 %v8893_v58  ;;  %v420_v47 = vpop.f32.mrf.mxu0  ;;  %v509_v41 = vpop.f32.mrf.mxu1 }
  0xff   :  { %1864 = vmatprep.subr.mxu0 %v5894_v13  ;;  %1953 = vmatprep.subr.mxu1 %v5900_v14  ;;  %v421_v2 = vadd.f32 %v420_v47, %v6399_v50  ;;  %v510_v8 = vadd.f32 %v509_v41, %v6399_v50 }
 0x100   :  { %4467 = vmatmul.mubr.msk.f32.gmra.mxu0 %vm94_vm0, %v6467_v9  ;;  %4471 = vmatmul.mubr.msk.f32.gmra.mxu1 %vm94_vm0, %v6467_v9  ;;  %v422_v10 = vpop.f32.mrf.mxu0  ;;  %v511_v11 = vpop.f32.mrf.mxu1 }
 0x101   :  { %1865 = vmatpush1.msra.mxu0 %v5905_v15  ;;  %1954 = vmatpush1.msra.mxu1 %v5912_v16  ;;  %4093 = vst [vmem:[%s8884_s3 + $0x80] sm:$0xff] %v421_v2  ;;  %4095 = vst [vmem:[%s8884_s3 + $0x90] sm:$0xff] %v510_v8  ;;  %v423_v13 = vadd.f32 %v422_v10, %v6399_v50  ;;  %v512_v14 = vadd.f32 %v511_v11, %v6399_v50  ;;  %v6502_v16 = vld [vmem:[%s8882_s1 + $0x18] sm:$0xff]  ;;  %v8894_v2 = vld [vmem:[#allocation2_spill] sm:$0xff] }
 0x102   :  { %1866 = vmatprep.subr.mxu0 %v5918_v17  ;;  %1955 = vmatprep.subr.mxu1 %v5925_v18  ;;  %v6653_v8 = vld [vmem:[%s8881_s0 + $0x200] sm:$0xff]  ;;  %v6658_v10 = vld [vmem:[%s8881_s0 + $0x210] sm:$0xff] }
 0x103   :  { %1867 = vmatpush1.msra.mxu0 %v5932_v19  ;;  %1956 = vmatpush1.msra.mxu1 %v5939_v20  ;;  %4094 = vst [vmem:[%s8884_s3 + $0x88] sm:$0xff] %v423_v13  ;;  %4096 = vst [vmem:[%s8884_s3 + $0x98] sm:$0xff] %v512_v14  ;;  %v8895_v13 = vld [vmem:[#allocation3_spill] sm:$0xff]  ;;  %v8896_v14 = vld [vmem:[#allocation4_spill] sm:$0xff] }
 0x104   :  { %1676 = vmatprep.mubr.f32.mxu0 %v8893_v58  ;;  %1765 = vmatprep.mubr.f32.mxu1 %v8893_v58 }
 0x105   :  { %1868 = vmatprep.subr.mxu0 %v5950_v22  ;;  %1957 = vmatprep.subr.mxu1 %v5955_v23  ;;  %v6497_v15 = vpop.permute.xlu0 %29  ;;  %v6543_v23 = vld [vmem:[%s8881_s0 + $0x288] sm:$0xff] }
 0x106   :  { %4468 = vmatmul.mubr.msk.f32.gmra.mxu0 %vm94_vm0, %v6502_v16  ;;  %4472 = vmatmul.mubr.msk.f32.gmra.mxu1 %vm94_vm0, %v6502_v16  ;;  %v180_v17 = vadd.f32 %v6353_v35, %v6497_v15  ;;  %v269_v18 = vadd.f32 %v6355_v36, %v6497_v15  ;;  %v182_v19 = vadd.f32 %v6361_v37, %v6497_v15 }
 0x107   :  { %1869 = vmatpush1.msra.mxu0 %v5963_v24  ;;  %1958 = vmatpush1.msra.mxu1 %v5968_v25  ;;  %v271_v20 = vadd.f32 %v6363_v39, %v6497_v15  ;;  %v6548_v24 = vld [vmem:[%s8881_s0 + $0x298] sm:$0xff] }
 0x108   :  { %1870 = vmatprep.subr.mxu0 %v5976_v26  ;;  %1959 = vmatprep.subr.mxu1 %v5981_v27  ;;  %289 = vst [vmem:[%s8884_s3 + $0x20] sm:$0xff] %v180_v17  ;;  %291 = vst [vmem:[%s8884_s3 + $0x30] sm:$0xff] %v269_v18 }
 0x109   :  { %290 = vst [vmem:[%s8884_s3 + $0x28] sm:$0xff] %v182_v19  ;;  %1871 = vmatpush1.msra.mxu0 %v5990_v28  ;;  %1960 = vmatpush1.msra.mxu1 %v5995_v29  ;;  %292 = vst [vmem:[%s8884_s3 + $0x38] sm:$0xff] %v271_v20  ;;  %v6561_v28 = vld [vmem:[%s8881_s0 + $0x280] sm:$0xff]  ;;  %v6566_v29 = vld [vmem:[%s8881_s0 + $0x290] sm:$0xff] }
 0x10a   :  { %1872 = vmatprep.subr.mxu0 %v6002_v30  ;;  %1961 = vmatprep.subr.mxu1 %v6007_v31  ;;  %v6536_v22 = vpop.permute.xlu1 %34  ;;  %v6573_v31 = vld [vmem:[%s8882_s1] sm:$0xff] }
 0x10b   :  { %1873 = vmatpush1.msra.mxu0 %v6016_v32  ;;  %1906 = vmatprep.mubr.f32.mxu0 %v8893_v58  ;;  %v186_v25 = vadd.f32 %v6383_v43, %v6536_v22  ;;  %v275_v26 = vadd.f32 %v6385_v44, %v6536_v22  ;;  %v188_v27 = vadd.f32 %v6406_v55, %v6536_v22 }
 0x10c   :  { %1962 = vmatpush1.msra.mxu1 %v6021_v33  ;;  %1995 = vmatprep.mubr.f32.mxu1 %v8893_v58  ;;  %v277_v30 = vadd.f32 %v6408_v54, %v6536_v22 }
 0x10d   :  { %4541 = vmatmul.mubr.msk.f32.vlgmr.msra.gmra.mxu0 %vm94_vm0, %v6573_v31  ;;  %4545 = vmatmul.mubr.msk.f32.vlgmr.msra.gmra.mxu1 %vm94_vm0, %v6573_v31  ;;  %293 = vst [vmem:[%s8884_s3 + $0x40] sm:$0xff] %v186_v25  ;;  %295 = vst [vmem:[%s8884_s3 + $0x50] sm:$0xff] %v275_v26  ;;  %v426_v32 = vpop.f32.mrf.mxu0  ;;  %v515_v33 = vpop.f32.mrf.mxu1 }
 0x10e   :  { %294 = vst [vmem:[%s8884_s3 + $0x48] sm:$0xff] %v188_v27  ;;  %2096 = vmatprep.subr.mxu0 %v6543_v23  ;;  %2185 = vmatprep.subr.mxu1 %v6548_v24  ;;  %296 = vst [vmem:[%s8884_s3 + $0x58] sm:$0xff] %v277_v30  ;;  %v427_v54 = vadd.f32 %v426_v32, %v6497_v15  ;;  %v516_v55 = vadd.f32 %v515_v33, %v6497_v15 }
 0x10f   :  { %2097 = vmatpush1.msra.mxu0 %v6561_v28  ;;  %2186 = vmatpush1.msra.mxu1 %v6566_v29  ;;  %v428_v35 = vpop.f32.mrf.mxu0  ;;  %v517_v36 = vpop.f32.mrf.mxu1 }
 0x110   :  { %2098 = vmatprep.subr.mxu0 %v6330_v60  ;;  %2187 = vmatprep.subr.mxu1 %v6335_v46  ;;  %v6599_v37 = vpop.permute.xlu1 %39  ;;  %4097 = vst [vmem:[%s8884_s3 + $0xa0] sm:$0xff] %v427_v54  ;;  %4099 = vst [vmem:[%s8884_s3 + $0xb0] sm:$0xff] %v516_v55  ;;  %v429_v39 = vadd.f32 %v428_v35, %v6497_v15  ;;  %v518_v43 = vadd.f32 %v517_v36, %v6497_v15  ;;  %v6714_v35 = vld [vmem:[%s8881_s0 + $0x188] sm:$0xff]  ;;  %v6719_v36 = vld [vmem:[%s8881_s0 + $0x198] sm:$0xff] }
 0x111   :  { %2099 = vmatpush1.msra.mxu0 %v6342_v42  ;;  %2188 = vmatpush1.msra.mxu1 %v6347_v34  ;;  %v192_v44 = vadd.f32 %v6431_v5, %v6599_v37  ;;  %v281_v4 = vadd.f32 %v6433_v6, %v6599_v37  ;;  %v194_v47 = vadd.f32 %v6448_v52, %v6599_v37  ;;  %v6632_v5 = vld [vmem:[%s8881_s0 + $0x208] sm:$0xff]  ;;  %v6637_v6 = vld [vmem:[%s8881_s0 + $0x218] sm:$0xff] }
 0x112   :  { %2100 = vmatprep.subr.mxu0 %v6214_v61  ;;  %2189 = vmatprep.subr.mxu1 %v6219_v62  ;;  %v283_v41 = vadd.f32 %v6450_v59, %v6599_v37  ;;  %4098 = vst [vmem:[%s8884_s3 + $0xa8] sm:$0xff] %v429_v39  ;;  %4100 = vst [vmem:[%s8884_s3 + $0xb8] sm:$0xff] %v518_v43 }
 0x113   :  { %2101 = vmatpush1.msra.mxu0 %v6226_v63  ;;  %2190 = vmatpush1.msra.mxu1 %v6231_v45  ;;  %297 = vst [vmem:[%s8884_s3 + $0x60] sm:$0xff] %v192_v44  ;;  %299 = vst [vmem:[%s8884_s3 + $0x70] sm:$0xff] %v281_v4  ;;  %v432_v52 = vpop.f32.mrf.mxu0  ;;  %v521_v59 = vpop.f32.mrf.mxu1 }
 0x114   :  { %298 = vst [vmem:[%s8884_s3 + $0x68] sm:$0xff] %v194_v47  ;;  %2102 = vmatprep.subr.mxu0 %v6099_v51  ;;  %2191 = vmatprep.subr.mxu1 %v8894_v2  ;;  %300 = vst [vmem:[%s8884_s3 + $0x78] sm:$0xff] %v283_v41  ;;  %v433_v11 = vadd.f32 %v432_v52, %v6536_v22  ;;  %v522_v51 = vadd.f32 %v521_v59, %v6536_v22  ;;  %v6762_v47 = vld [vmem:[%s8881_s0 + $0x160] sm:$0xff]  ;;  %v6767_v41 = vld [vmem:[%s8881_s0 + $0x170] sm:$0xff] }
 0x115   :  { %2103 = vmatpush1.msra.mxu0 %v8895_v13  ;;  %2192 = vmatpush1.msra.mxu1 %v8896_v14  ;;  %v434_v17 = vpop.f32.mrf.mxu0  ;;  %v523_v18 = vpop.f32.mrf.mxu1  ;;  %v6789_v13 = vld [vmem:[%s8881_s0 + $0x158] sm:$0xff]  ;;  %v6804_v14 = vld [vmem:[%s8881_s0 + $0x140] sm:$0xff] }
 0x116   :  { %2104 = vmatprep.subr.mxu0 %v6632_v5  ;;  %2193 = vmatprep.subr.mxu1 %v6637_v6  ;;  %4101 = vst [vmem:[%s8884_s3 + $0xc0] sm:$0xff] %v433_v11  ;;  %4103 = vst [vmem:[%s8884_s3 + $0xd0] sm:$0xff] %v522_v51  ;;  %v435_v19 = vadd.f32 %v434_v17, %v6536_v22  ;;  %v524_v20 = vadd.f32 %v523_v18, %v6536_v22  ;;  %v6784_v51 = vld [vmem:[%s8881_s0 + $0x148] sm:$0xff]  ;;  %v6809_v17 = vld [vmem:[%s8881_s0 + $0x150] sm:$0xff] }
 0x117   :  { %2105 = vmatpush1.msra.mxu0 %v6653_v8  ;;  %2194 = vmatpush1.msra.mxu1 %v6658_v10  ;;  %v6816_v18 = vld [vmem:[%s8881_s0 + $0x128] sm:$0xff] }
 0x118   :  { %2106 = vmatprep.subr.mxu0 %v6376_v53  ;;  %2195 = vmatprep.subr.mxu1 %v6381_v40  ;;  %4102 = vst [vmem:[%s8884_s3 + $0xc8] sm:$0xff] %v435_v19  ;;  %4104 = vst [vmem:[%s8884_s3 + $0xd8] sm:$0xff] %v524_v20  ;;  %v6821_v19 = vld [vmem:[%s8881_s0 + $0x138] sm:$0xff]  ;;  %v6830_v20 = vld [vmem:[%s8881_s0 + $0x120] sm:$0xff] }
 0x119   :  { %2107 = vmatpush1.msra.mxu0 %v6392_v48  ;;  %2196 = vmatpush1.msra.mxu1 %v6397_v49  ;;  %v438_v25 = vpop.f32.mrf.mxu0  ;;  %v527_v26 = vpop.f32.mrf.mxu1 }
 0x11a   :  { %1912 = vmatprep.mubr.f32.mxu0 %v8893_v58  ;;  %2001 = vmatprep.mubr.f32.mxu1 %v8893_v58  ;;  %v439_v27 = vadd.f32 %v438_v25, %v6599_v37  ;;  %v528_v30 = vadd.f32 %v527_v26, %v6599_v37  ;;  %v6835_v25 = vld [vmem:[%s8881_s0 + $0x130] sm:$0xff]  ;;  %v4566_v26 = vld [vmem:[%s8881_s0 + $0x108] sm:$0xff] }
 0x11b   :  { %2108 = vmatprep.subr.mxu0 %v6252_v7  ;;  %2197 = vmatprep.subr.mxu1 %v6257_v12  ;;  %v440_v32 = vpop.f32.mrf.mxu0  ;;  %v529_v33 = vpop.f32.mrf.mxu1 }
 0x11c   :  { %4542 = vmatmul.mubr.msk.f32.gmra.mxu0 %vm94_vm0, %v6442_v3  ;;  %4546 = vmatmul.mubr.msk.f32.gmra.mxu1 %vm94_vm0, %v6442_v3  ;;  %4105 = vst [vmem:[%s8884_s3 + $0xe0] sm:$0xff] %v439_v27  ;;  %4107 = vst [vmem:[%s8884_s3 + $0xf0] sm:$0xff] %v528_v30  ;;  %v441_v54 = vadd.f32 %v440_v32, %v6599_v37  ;;  %v530_v55 = vadd.f32 %v529_v33, %v6599_v37  ;;  %v4568_v27 = vld [vmem:[%s8881_s0 + $0x118] sm:$0xff]  ;;  %v4565_v30 = vld [vmem:[%s8881_s0 + $0x100] sm:$0xff] }
 0x11d   :  { %2109 = vmatpush1.msra.mxu0 %v6264_v21  ;;  %2198 = vmatpush1.msra.mxu1 %v6269_v38  ;;  %v4567_v32 = vld [vmem:[%s8881_s0 + $0x110] sm:$0xff]  ;;  %v6859_v33 = vld [vmem:[%s8881_s0 + $0x2a8] sm:$0xff] }
 0x11e   :  { %2110 = vmatprep.subr.mxu0 %v6136_v56  ;;  %2199 = vmatprep.subr.mxu1 %v6141_v57  ;;  %4106 = vst [vmem:[%s8884_s3 + $0xe8] sm:$0xff] %v441_v54  ;;  %4108 = vst [vmem:[%s8884_s3 + $0xf8] sm:$0xff] %v530_v55  ;;  %v6734_v56 = vld [vmem:[%s8881_s0 + $0x180] sm:$0xff]  ;;  %v6739_v57 = vld [vmem:[%s8881_s0 + $0x190] sm:$0xff] }
 0x11f   :  { %2111 = vmatpush1.msra.mxu0 %v6148_v0  ;;  %2200 = vmatpush1.msra.mxu1 %v6153_v1  ;;  %v6746_v0 = vld [vmem:[%s8881_s0 + $0x168] sm:$0xff]  ;;  %v6751_v1 = vld [vmem:[%s8881_s0 + $0x178] sm:$0xff]  ;;  %v6870_v55 = vld [vmem:[%s8881_s0 + $0x2a0] sm:$0xff] }
 0x120   :  { %1918 = vmatprep.mubr.f32.mxu0 %v8893_v58  ;;  %2007 = vmatprep.mubr.f32.mxu1 %v8893_v58  ;;  %v668_v39 = vpop.f32.mrf.mxu0  ;;  %v757_v43 = vpop.f32.mrf.mxu1  ;;  %v6864_v54 = vld [vmem:[%s8881_s0 + $0x2b8] sm:$0xff] }
 0x121   :  { %2112 = vmatprep.subr.mxu0 %v6714_v35  ;;  %2201 = vmatprep.subr.mxu1 %v6719_v36  ;;  %v669_v44 = vadd.f32 %v668_v39, %v6399_v50  ;;  %v758_v4 = vadd.f32 %v757_v43, %v6399_v50  ;;  %v6875_v39 = vld [vmem:[%s8881_s0 + $0x2b0] sm:$0xff] }
 0x122   :  { %4543 = vmatmul.mubr.msk.f32.gmra.mxu0 %vm94_vm0, %v6467_v9  ;;  %4547 = vmatmul.mubr.msk.f32.gmra.mxu1 %vm94_vm0, %v6467_v9  ;;  %v670_v52 = vpop.f32.mrf.mxu0  ;;  %v759_v59 = vpop.f32.mrf.mxu1 }
 0x123   :  { %2113 = vmatpush1.msra.mxu0 %v6734_v56  ;;  %2202 = vmatpush1.msra.mxu1 %v6739_v57  ;;  %4169 = vst [vmem:[%s8884_s3 + $0x100] sm:$0xff] %v669_v44  ;;  %4171 = vst [vmem:[%s8884_s3 + $0x110] sm:$0xff] %v758_v4  ;;  %v671_v2 = vadd.f32 %v670_v52, %v6399_v50  ;;  %v760_v11 = vadd.f32 %v759_v59, %v6399_v50 }
 0x124   :  { %2114 = vmatprep.subr.mxu0 %v6746_v0  ;;  %2203 = vmatprep.subr.mxu1 %v6751_v1 }
 0x125   :  { %2115 = vmatpush1.msra.mxu0 %v6762_v47  ;;  %2204 = vmatpush1.msra.mxu1 %v6767_v41  ;;  %4170 = vst [vmem:[%s8884_s3 + $0x108] sm:$0xff] %v671_v2  ;;  %4172 = vst [vmem:[%s8884_s3 + $0x118] sm:$0xff] %v760_v11 }
 0x126   :  { %1924 = vmatprep.mubr.f32.mxu0 %v8893_v58  ;;  %2013 = vmatprep.mubr.f32.mxu1 %v8893_v58 }
 0x127   :  { %2116 = vmatprep.subr.mxu0 %v6784_v51  ;;  %2205 = vmatprep.subr.mxu1 %v6789_v13 }
 0x128   :  { %4544 = vmatmul.mubr.msk.f32.gmra.mxu0 %vm94_vm0, %v6502_v16  ;;  %4548 = vmatmul.mubr.msk.f32.gmra.mxu1 %vm94_vm0, %v6502_v16 }
 0x129   :  { %2117 = vmatpush1.msra.mxu0 %v6804_v14  ;;  %2206 = vmatpush1.msra.mxu1 %v6809_v17 }
 0x12a   :  { %2118 = vmatprep.subr.mxu0 %v6816_v18  ;;  %2207 = vmatprep.subr.mxu1 %v6821_v19 }
 0x12b   :  { %2119 = vmatpush1.msra.mxu0 %v6830_v20  ;;  %2208 = vmatpush1.msra.mxu1 %v6835_v25 }
 0x12c   :  { %2120 = vmatprep.subr.mxu0 %v4566_v26  ;;  %2209 = vmatprep.subr.mxu1 %v4568_v27  ;;  %v6912_v27 = vld [vmem:[%s8881_s0 + $0x228] sm:$0xff] }
 0x12d   :  { %2121 = vmatpush1.msra.mxu0 %v4565_v30  ;;  %2154 = vmatprep.mubr.f32.mxu0 %v8893_v58  ;;  %v6917_v30 = vld [vmem:[%s8881_s0 + $0x238] sm:$0xff] }
 0x12e   :  { %2210 = vmatpush1.msra.mxu1 %v4567_v32  ;;  %2243 = vmatprep.mubr.f32.mxu1 %v8893_v58 }
 0x12f   :  { %4617 = vmatmul.mubr.msk.f32.vlgmr.msra.gmra.mxu0 %vm94_vm0, %v6573_v31  ;;  %4621 = vmatmul.mubr.msk.f32.vlgmr.msra.gmra.mxu1 %vm94_vm0, %v6573_v31  ;;  %v674_v43 = vpop.f32.mrf.mxu0  ;;  %v763_v44 = vpop.f32.mrf.mxu1 }
 0x130   :  { %2344 = vmatprep.subr.mxu0 %v6859_v33  ;;  %2433 = vmatprep.subr.mxu1 %v6864_v54  ;;  %v675_v4 = vadd.f32 %v674_v43, %v6497_v15  ;;  %v764_v52 = vadd.f32 %v763_v44, %v6497_v15  ;;  %v6924_v43 = vld [vmem:[%s8881_s0 + $0x220] sm:$0xff]  ;;  %v6929_v44 = vld [vmem:[%s8881_s0 + $0x230] sm:$0xff] }
 0x131   :  { %2345 = vmatpush1.msra.mxu0 %v6870_v55  ;;  %2434 = vmatpush1.msra.mxu1 %v6875_v39  ;;  %v676_v59 = vpop.f32.mrf.mxu0  ;;  %v765_v2 = vpop.f32.mrf.mxu1 }
 0x132   :  { %2346 = vmatprep.subr.mxu0 %v6543_v23  ;;  %2435 = vmatprep.subr.mxu1 %v6548_v24  ;;  %4173 = vst [vmem:[%s8884_s3 + $0x120] sm:$0xff] %v675_v4  ;;  %4175 = vst [vmem:[%s8884_s3 + $0x130] sm:$0xff] %v764_v52  ;;  %v677_v11 = vadd.f32 %v676_v59, %v6497_v15  ;;  %v766_v26 = vadd.f32 %v765_v2, %v6497_v15 }
 0x133   :  { %2347 = vmatpush1.msra.mxu0 %v6561_v28  ;;  %2436 = vmatpush1.msra.mxu1 %v6566_v29 }
 0x134   :  { %2348 = vmatprep.subr.mxu0 %v6330_v60  ;;  %2437 = vmatprep.subr.mxu1 %v6335_v46  ;;  %4174 = vst [vmem:[%s8884_s3 + $0x128] sm:$0xff] %v677_v11  ;;  %4176 = vst [vmem:[%s8884_s3 + $0x138] sm:$0xff] %v766_v26 }
 0x135   :  { %2349 = vmatpush1.msra.mxu0 %v6342_v42  ;;  %2438 = vmatpush1.msra.mxu1 %v6347_v34  ;;  %v680_v32 = vpop.f32.mrf.mxu0 }
 0x136   :  { %2350 = vmatprep.subr.mxu0 %v6214_v61  ;;  %2439 = vmatprep.subr.mxu1 %v6219_v62  ;;  %v681_v4 = vadd.f32 %v680_v32, %v6536_v22  ;;  %v769_v52 = vpop.f32.mrf.mxu1 }
 0x137   :  { %2351 = vmatpush1.msra.mxu0 %v6226_v63  ;;  %2440 = vmatpush1.msra.mxu1 %v6231_v45  ;;  %v770_v61 = vadd.f32 %v769_v52, %v6536_v22  ;;  %v682_v62 = vpop.f32.mrf.mxu0 }
 0x138   :  { %2352 = vmatprep.subr.mxu0 %v6912_v27  ;;  %2441 = vmatprep.subr.mxu1 %v6917_v30  ;;  %4177 = vst [vmem:[%s8884_s3 + $0x140] sm:$0xff] %v681_v4  ;;  %v683_v59 = vadd.f32 %v682_v62, %v6536_v22  ;;  %v771_v2 = vpop.f32.mrf.mxu1 }
 0x139   :  { %2353 = vmatpush1.msra.mxu0 %v6924_v43  ;;  %2442 = vmatpush1.msra.mxu1 %v6929_v44  ;;  %4179 = vst [vmem:[%s8884_s3 + $0x150] sm:$0xff] %v770_v61  ;;  %v772_v63 = vadd.f32 %v771_v2, %v6536_v22  ;;  %v6987_v2 = vld [vmem:[%s8881_s0 + $0x1b8] sm:$0xff] }
 0x13a   :  { %2354 = vmatprep.subr.mxu0 %v6632_v5  ;;  %2443 = vmatprep.subr.mxu1 %v6637_v6  ;;  %4178 = vst [vmem:[%s8884_s3 + $0x148] sm:$0xff] %v683_v59  ;;  %v6982_v59 = vld [vmem:[%s8881_s0 + $0x1a8] sm:$0xff] }
 0x13b   :  { %2355 = vmatpush1.msra.mxu0 %v6653_v8  ;;  %2444 = vmatpush1.msra.mxu1 %v6658_v10  ;;  %4180 = vst [vmem:[%s8884_s3 + $0x158] sm:$0xff] %v772_v63 }
 0x13c   :  { %2160 = vmatprep.mubr.f32.mxu0 %v8893_v58  ;;  %2249 = vmatprep.mubr.f32.mxu1 %v8893_v58  ;;  %v686_v45 = vpop.f32.mrf.mxu0  ;;  %v775_v11 = vpop.f32.mrf.mxu1 }
 0x13d   :  { %2356 = vmatprep.subr.mxu0 %v6376_v53  ;;  %2445 = vmatprep.subr.mxu1 %v6381_v40  ;;  %v687_v26 = vadd.f32 %v686_v45, %v6599_v37  ;;  %v776_v32 = vadd.f32 %v775_v11, %v6599_v37 }
 0x13e   :  { %4618 = vmatmul.mubr.msk.f32.gmra.mxu0 %vm94_vm0, %v6442_v3  ;;  %4622 = vmatmul.mubr.msk.f32.gmra.mxu1 %vm94_vm0, %v6442_v3  ;;  %v688_v4 = vpop.f32.mrf.mxu0  ;;  %v777_v52 = vpop.f32.mrf.mxu1 }
 0x13f   :  { %2357 = vmatpush1.msra.mxu0 %v6392_v48  ;;  %2446 = vmatpush1.msra.mxu1 %v6397_v49  ;;  %4181 = vst [vmem:[%s8884_s3 + $0x160] sm:$0xff] %v687_v26  ;;  %4183 = vst [vmem:[%s8884_s3 + $0x170] sm:$0xff] %v776_v32  ;;  %v689_v61 = vadd.f32 %v688_v4, %v6599_v37  ;;  %v778_v62 = vadd.f32 %v777_v52, %v6599_v37  ;;  %v7058_v52 = vld [vmem:[%s8881_s0 + $0x2c8] sm:$0xff] }
 0x140   :  { %2358 = vmatprep.subr.mxu0 %v6252_v7  ;;  %2447 = vmatprep.subr.mxu1 %v6257_v12  ;;  %v7002_v7 = vld [vmem:[%s8881_s0 + $0x1a0] sm:$0xff]  ;;  %v7007_v12 = vld [vmem:[%s8881_s0 + $0x1b0] sm:$0xff] }
 0x141   :  { %2359 = vmatpush1.msra.mxu0 %v6264_v21  ;;  %2448 = vmatpush1.msra.mxu1 %v6269_v38  ;;  %4182 = vst [vmem:[%s8884_s3 + $0x168] sm:$0xff] %v689_v61  ;;  %4184 = vst [vmem:[%s8884_s3 + $0x178] sm:$0xff] %v778_v62  ;;  %v7063_v61 = vld [vmem:[%s8881_s0 + $0x2d8] sm:$0xff] }
 0x142   :  { %2166 = vmatprep.mubr.f32.mxu0 %v8893_v58  ;;  %2255 = vmatprep.mubr.f32.mxu1 %v8893_v58 }
 0x143   :  { %2360 = vmatprep.subr.mxu0 %v6982_v59  ;;  %2449 = vmatprep.subr.mxu1 %v6987_v2  ;;  %v916_v21 = vpop.f32.mrf.mxu0  ;;  %v1005_v38 = vpop.f32.mrf.mxu1 }
 0x144   :  { %4619 = vmatmul.mubr.msk.f32.gmra.mxu0 %vm94_vm0, %v6467_v9  ;;  %4623 = vmatmul.mubr.msk.f32.gmra.mxu1 %vm94_vm0, %v6467_v9  ;;  %v917_v63 = vadd.f32 %v916_v21, %v6399_v50  ;;  %v1006_v45 = vadd.f32 %v1005_v38, %v6399_v50 }
 0x145   :  { %2361 = vmatpush1.msra.mxu0 %v7002_v7  ;;  %2450 = vmatpush1.msra.mxu1 %v7007_v12  ;;  %v918_v11 = vpop.f32.mrf.mxu0  ;;  %v1007_v26 = vpop.f32.mrf.mxu1 }
 0x146   :  { %2362 = vmatprep.subr.mxu0 %v6714_v35  ;;  %2451 = vmatprep.subr.mxu1 %v6719_v36  ;;  %4245 = vst [vmem:[%s8884_s3 + $0x180] sm:$0xff] %v917_v63  ;;  %4247 = vst [vmem:[%s8884_s3 + $0x190] sm:$0xff] %v1006_v45  ;;  %v919_v32 = vadd.f32 %v918_v11, %v6399_v50  ;;  %v1008_v4 = vadd.f32 %v1007_v26, %v6399_v50  ;;  %v7102_v11 = vld [vmem:[%s8881_s0 + $0x248] sm:$0xff] }
 0x147   :  { %2363 = vmatpush1.msra.mxu0 %v6734_v56  ;;  %2452 = vmatpush1.msra.mxu1 %v6739_v57 }
 0x148   :  { %2172 = vmatprep.mubr.f32.mxu0 %v8893_v58  ;;  %2261 = vmatprep.mubr.f32.mxu1 %v8893_v58  ;;  %4246 = vst [vmem:[%s8884_s3 + $0x188] sm:$0xff] %v919_v32  ;;  %4248 = vst [vmem:[%s8884_s3 + $0x198] sm:$0xff] %v1008_v4 }
 0x149   :  { %2364 = vmatprep.subr.mxu0 %v6746_v0  ;;  %2453 = vmatprep.subr.mxu1 %v6751_v1 }
 0x14a   :  { %4620 = vmatmul.mubr.msk.f32.gmra.mxu0 %vm94_vm0, %v6502_v16  ;;  %4624 = vmatmul.mubr.msk.f32.gmra.mxu1 %vm94_vm0, %v6502_v16 }
 0x14b   :  { %2365 = vmatpush1.msra.mxu0 %v6762_v47  ;;  %2454 = vmatpush1.msra.mxu1 %v6767_v41 }
 0x14c   :  { %2366 = vmatprep.subr.mxu0 %v6784_v51  ;;  %2455 = vmatprep.subr.mxu1 %v6789_v13 }
 0x14d   :  { %2367 = vmatpush1.msra.mxu0 %v6804_v14  ;;  %2456 = vmatpush1.msra.mxu1 %v6809_v17 }
 0x14e   :  { %2368 = vmatprep.subr.mxu0 %v6816_v18  ;;  %2457 = vmatprep.subr.mxu1 %v6821_v19  ;;  %v7070_v18 = vld [vmem:[%s8881_s0 + $0x2c0] sm:$0xff]  ;;  %v7075_v19 = vld [vmem:[%s8881_s0 + $0x2d0] sm:$0xff] }
 0x14f   :  { %2369 = vmatpush1.msra.mxu0 %v6830_v20  ;;  %2402 = vmatprep.mubr.f32.mxu0 %v8893_v58 }
 0x150   :  { %2458 = vmatpush1.msra.mxu1 %v6835_v25  ;;  %2491 = vmatprep.mubr.f32.mxu1 %v8893_v58 }
 0x151   :  { %4693 = vmatmul.mubr.msk.f32.vlgmr.msra.gmra.mxu0 %vm94_vm0, %v6573_v31  ;;  %4697 = vmatmul.mubr.msk.f32.vlgmr.msra.gmra.mxu1 %vm94_vm0, %v6573_v31 }
 0x152   :  { %2592 = vmatprep.subr.mxu0 %v7058_v52  ;;  %2681 = vmatprep.subr.mxu1 %v7063_v61 }
 0x153   :  { %2593 = vmatpush1.msra.mxu0 %v7070_v18  ;;  %2682 = vmatpush1.msra.mxu1 %v7075_v19  ;;  %v922_v20 = vpop.f32.mrf.mxu0 }
 0x154   :  { %2594 = vmatprep.subr.mxu0 %v6859_v33  ;;  %2683 = vmatprep.subr.mxu1 %v6864_v54  ;;  %v923_v25 = vadd.f32 %v922_v20, %v6497_v15  ;;  %v1011_v62 = vpop.f32.mrf.mxu1 }
 0x155   :  { %2595 = vmatpush1.msra.mxu0 %v6870_v55  ;;  %2684 = vmatpush1.msra.mxu1 %v6875_v39  ;;  %v1012_v21 = vadd.f32 %v1011_v62, %v6497_v15  ;;  %v924_v38 = vpop.f32.mrf.mxu0 }
 0x156   :  { %2596 = vmatprep.subr.mxu0 %v6543_v23  ;;  %2685 = vmatprep.subr.mxu1 %v6548_v24  ;;  %4249 = vst [vmem:[%s8884_s3 + $0x1a0] sm:$0xff] %v923_v25  ;;  %v925_v63 = vadd.f32 %v924_v38, %v6497_v15  ;;  %v1013_v45 = vpop.f32.mrf.mxu1  ;;  %v7107_v23 = vld [vmem:[%s8881_s0 + $0x258] sm:$0xff] }
 0x157   :  { %2597 = vmatpush1.msra.mxu0 %v6561_v28  ;;  %2686 = vmatpush1.msra.mxu1 %v6566_v29  ;;  %4251 = vst [vmem:[%s8884_s3 + $0x1b0] sm:$0xff] %v1012_v21  ;;  %v1014_v24 = vadd.f32 %v1013_v45, %v6497_v15  ;;  %v7118_v28 = vld [vmem:[%s8881_s0 + $0x240] sm:$0xff]  ;;  %v7123_v29 = vld [vmem:[%s8881_s0 + $0x250] sm:$0xff]  ;;  %v7174_v21 = vld [vmem:[%s8881_s0 + $0x1c8] sm:$0xff] }
 0x158   :  { %2598 = vmatprep.subr.mxu0 %v6330_v60  ;;  %2687 = vmatprep.subr.mxu1 %v6335_v46  ;;  %4250 = vst [vmem:[%s8884_s3 + $0x1a8] sm:$0xff] %v925_v63 }
 0x159   :  { %2599 = vmatpush1.msra.mxu0 %v6342_v42  ;;  %2688 = vmatpush1.msra.mxu1 %v6347_v34  ;;  %4252 = vst [vmem:[%s8884_s3 + $0x1b8] sm:$0xff] %v1014_v24 }
 0x15a   :  { %2600 = vmatprep.subr.mxu0 %v7102_v11  ;;  %2689 = vmatprep.subr.mxu1 %v7107_v23  ;;  %v928_v60 = vpop.f32.mrf.mxu0  ;;  %v1017_v46 = vpop.f32.mrf.mxu1 }
 0x15b   :  { %2601 = vmatpush1.msra.mxu0 %v7118_v28  ;;  %2690 = vmatpush1.msra.mxu1 %v7123_v29  ;;  %v929_v26 = vadd.f32 %v928_v60, %v6536_v22  ;;  %v1018_v42 = vadd.f32 %v1017_v46, %v6536_v22 }
 0x15c   :  { %2602 = vmatprep.subr.mxu0 %v6912_v27  ;;  %2691 = vmatprep.subr.mxu1 %v6917_v30  ;;  %v930_v34 = vpop.f32.mrf.mxu0  ;;  %v1019_v32 = vpop.f32.mrf.mxu1 }
 0x15d   :  { %2603 = vmatpush1.msra.mxu0 %v6924_v43  ;;  %2692 = vmatpush1.msra.mxu1 %v6929_v44  ;;  %4253 = vst [vmem:[%s8884_s3 + $0x1c0] sm:$0xff] %v929_v26  ;;  %4255 = vst [vmem:[%s8884_s3 + $0x1d0] sm:$0xff] %v1018_v42  ;;  %v931_v4 = vadd.f32 %v930_v34, %v6536_v22  ;;  %v1020_v20 = vadd.f32 %v1019_v32, %v6536_v22  ;;  %v7338_v42 = vld [vmem:[%s8881_s0 + $0x260] sm:$0xff]  ;;  %v7343_v34 = vld [vmem:[%s8881_s0 + $0x270] sm:$0xff] }
 0x15e   :  { %2408 = vmatprep.mubr.f32.mxu0 %v8893_v58  ;;  %2497 = vmatprep.mubr.f32.mxu1 %v8893_v58 }
 0x15f   :  { %2604 = vmatprep.subr.mxu0 %v6632_v5  ;;  %2693 = vmatprep.subr.mxu1 %v6637_v6  ;;  %4254 = vst [vmem:[%s8884_s3 + $0x1c8] sm:$0xff] %v931_v4  ;;  %4256 = vst [vmem:[%s8884_s3 + $0x1d8] sm:$0xff] %v1020_v20 }
 0x160   :  { %4694 = vmatmul.mubr.msk.f32.gmra.mxu0 %vm94_vm0, %v6442_v3  ;;  %4698 = vmatmul.mubr.msk.f32.gmra.mxu1 %vm94_vm0, %v6442_v3  ;;  %v934_v25 = vpop.f32.mrf.mxu0  ;;  %v1023_v62 = vpop.f32.mrf.mxu1  ;;  %v7179_v3 = vld [vmem:[%s8881_s0 + $0x1d8] sm:$0xff] }
 0x161   :  { %2605 = vmatpush1.msra.mxu0 %v6653_v8  ;;  %2694 = vmatpush1.msra.mxu1 %v6658_v10  ;;  %v935_v5 = vadd.f32 %v934_v25, %v6599_v37  ;;  %v1024_v6 = vadd.f32 %v1023_v62, %v6599_v37 }
 0x162   :  { %2606 = vmatprep.subr.mxu0 %v6376_v53  ;;  %2695 = vmatprep.subr.mxu1 %v6381_v40  ;;  %v936_v8 = vpop.f32.mrf.mxu0  ;;  %v1025_v10 = vpop.f32.mrf.mxu1 }
 0x163   :  { %2607 = vmatpush1.msra.mxu0 %v6392_v48  ;;  %2696 = vmatpush1.msra.mxu1 %v6397_v49  ;;  %4257 = vst [vmem:[%s8884_s3 + $0x1e0] sm:$0xff] %v935_v5  ;;  %4259 = vst [vmem:[%s8884_s3 + $0x1f0] sm:$0xff] %v1024_v6  ;;  %v937_v53 = vadd.f32 %v936_v8, %v6599_v37  ;;  %v1026_v40 = vadd.f32 %v1025_v10, %v6599_v37  ;;  %v7196_v48 = vld [vmem:[%s8881_s0 + $0x1c0] sm:$0xff]  ;;  %v7201_v49 = vld [vmem:[%s8881_s0 + $0x1d0] sm:$0xff] }
 0x164   :  { %2414 = vmatprep.mubr.f32.mxu0 %v8893_v58  ;;  %2503 = vmatprep.mubr.f32.mxu1 %v8893_v58  ;;  %v7378_v10 = vld [vmem:[%s8881_s0 + $0x208] sm:$0xff] }
 0x165   :  { %2608 = vmatprep.subr.mxu0 %v7174_v21  ;;  %2697 = vmatprep.subr.mxu1 %v7179_v3  ;;  %4258 = vst [vmem:[%s8884_s3 + $0x1e8] sm:$0xff] %v937_v53  ;;  %4260 = vst [vmem:[%s8884_s3 + $0x1f8] sm:$0xff] %v1026_v40  ;;  %v7383_v53 = vld [vmem:[%s8881_s0 + $0x218] sm:$0xff]  ;;  %v7408_v40 = vld [vmem:[%s8881_s0 + $0x210] sm:$0xff] }
 0x166   :  { %4695 = vmatmul.mubr.msk.f32.gmra.mxu0 %vm94_vm0, %v6467_v9  ;;  %4699 = vmatmul.mubr.msk.f32.gmra.mxu1 %vm94_vm0, %v6467_v9 }
 0x167   :  { %2609 = vmatpush1.msra.mxu0 %v7196_v48  ;;  %2698 = vmatpush1.msra.mxu1 %v7201_v49  ;;  %v1164_v38 = vpop.f32.mrf.mxu0  ;;  %v1253_v63 = vpop.f32.mrf.mxu1 }
 0x168   :  { %2610 = vmatprep.subr.mxu0 %v6982_v59  ;;  %2699 = vmatprep.subr.mxu1 %v6987_v2  ;;  %v1165_v45 = vadd.f32 %v1164_v38, %v6399_v50  ;;  %v1254_v24 = vadd.f32 %v1253_v63, %v6399_v50 }
 0x169   :  { %2611 = vmatpush1.msra.mxu0 %v7002_v7  ;;  %2700 = vmatpush1.msra.mxu1 %v7007_v12  ;;  %v1166_v60 = vpop.f32.mrf.mxu0  ;;  %v1255_v9 = vpop.f32.mrf.mxu1 }
 0x16a   :  { %2420 = vmatprep.mubr.f32.mxu0 %v8893_v58  ;;  %2509 = vmatprep.mubr.f32.mxu1 %v8893_v58  ;;  %4321 = vst [vmem:[%s8884_s3 + $0x200] sm:$0xff] %v1165_v45  ;;  %4323 = vst [vmem:[%s8884_s3 + $0x210] sm:$0xff] %v1254_v24  ;;  %v1167_v46 = vadd.f32 %v1166_v60, %v6399_v50  ;;  %v1256_v26 = vadd.f32 %v1255_v9, %v6399_v50  ;;  %v7419_v60 = vld [vmem:[%s8881_s0 + $0x1e8] sm:$0xff]  ;;  %v7424_v9 = vld [vmem:[%s8881_s0 + $0x1f8] sm:$0xff] }
 0x16b   :  { %2612 = vmatprep.subr.mxu0 %v6714_v35  ;;  %2701 = vmatprep.subr.mxu1 %v6719_v36  ;;  %v7263_v35 = vld [vmem:[%s8881_s0 + $0x2f8] sm:$0xff]  ;;  %v7270_v36 = vld [vmem:[%s8881_s0 + $0x2e0] sm:$0xff] }
 0x16c   :  { %4696 = vmatmul.mubr.msk.f32.gmra.mxu0 %vm94_vm0, %v6502_v16  ;;  %4700 = vmatmul.mubr.msk.f32.gmra.mxu1 %vm94_vm0, %v6502_v16  ;;  %4322 = vst [vmem:[%s8884_s3 + $0x208] sm:$0xff] %v1167_v46  ;;  %4324 = vst [vmem:[%s8884_s3 + $0x218] sm:$0xff] %v1256_v26  ;;  %v7258_v16 = vld [vmem:[%s8881_s0 + $0x2e8] sm:$0xff] }
 0x16d   :  { %2613 = vmatpush1.msra.mxu0 %v6734_v56  ;;  %2702 = vmatpush1.msra.mxu1 %v6739_v57  ;;  %v7275_v56 = vld [vmem:[%s8881_s0 + $0x2f0] sm:$0xff] }
 0x16e   :  { %2614 = vmatprep.subr.mxu0 %v6746_v0  ;;  %2703 = vmatprep.subr.mxu1 %v6751_v1  ;;  %v7297_v1 = vld [vmem:[%s8881_s0 + $0x298] sm:$0xff] }
 0x16f   :  { %2615 = vmatpush1.msra.mxu0 %v6762_v47  ;;  %2704 = vmatpush1.msra.mxu1 %v6767_v41 }
 0x170   :  { %2616 = vmatprep.subr.mxu0 %v6784_v51  ;;  %2705 = vmatprep.subr.mxu1 %v6789_v13  ;;  %v7306_v51 = vld [vmem:[%s8881_s0 + $0x280] sm:$0xff]  ;;  %v7311_v13 = vld [vmem:[%s8881_s0 + $0x290] sm:$0xff] }
 0x171   :  { %2617 = vmatpush1.msra.mxu0 %v6804_v14  ;;  %2650 = vmatprep.mubr.f32.mxu0 %v8893_v58 }
 0x172   :  { %2706 = vmatpush1.msra.mxu1 %v6809_v17  ;;  %2739 = vmatprep.mubr.f32.mxu1 %v8893_v58 }
 0x173   :  { %4769 = vmatmul.mubr.msk.f32.vlgmr.msra.gmra.mxu0 %vm94_vm0, %v6573_v31  ;;  %4773 = vmatmul.mubr.msk.f32.vlgmr.msra.gmra.mxu1 %vm94_vm0, %v6573_v31  ;;  %v7292_v31 = vld [vmem:[%s8881_s0 + $0x288] sm:$0xff] }
 0x174   :  { %2840 = vmatprep.subr.mxu0 %v7258_v16  ;;  %2929 = vmatprep.subr.mxu1 %v7263_v35 }
 0x175   :  { %2841 = vmatpush1.msra.mxu0 %v7270_v36  ;;  %2930 = vmatpush1.msra.mxu1 %v7275_v56 }
 0x176   :  { %2842 = vmatprep.subr.mxu0 %v7058_v52  ;;  %2931 = vmatprep.subr.mxu1 %v7063_v61  ;;  %v1170_v57 = vpop.f32.mrf.mxu0  ;;  %v1259_v0 = vpop.f32.mrf.mxu1 }
 0x177   :  { %2843 = vmatpush1.msra.mxu0 %v7070_v18  ;;  %2932 = vmatpush1.msra.mxu1 %v7075_v19  ;;  %v1171_v47 = vadd.f32 %v1170_v57, %v6497_v15  ;;  %v1260_v41 = vadd.f32 %v1259_v0, %v6497_v15  ;;  %v7441_v57 = vld [vmem:[%s8881_s0 + $0x1e0] sm:$0xff]  ;;  %v7446_v0 = vld [vmem:[%s8881_s0 + $0x1f0] sm:$0xff] }
 0x178   :  { %2844 = vmatprep.subr.mxu0 %v6859_v33  ;;  %2933 = vmatprep.subr.mxu1 %v6864_v54  ;;  %v1172_v14 = vpop.f32.mrf.mxu0  ;;  %v1261_v17 = vpop.f32.mrf.mxu1  ;;  %v7318_v33 = vld [vmem:[%s8881_s0 + $0x268] sm:$0xff]  ;;  %v7323_v54 = vld [vmem:[%s8881_s0 + $0x278] sm:$0xff] }
 0x179   :  { %2845 = vmatpush1.msra.mxu0 %v6870_v55  ;;  %2934 = vmatpush1.msra.mxu1 %v6875_v39  ;;  %4325 = vst [vmem:[%s8884_s3 + $0x220] sm:$0xff] %v1171_v47  ;;  %4327 = vst [vmem:[%s8884_s3 + $0x230] sm:$0xff] %v1260_v41  ;;  %v1173_v55 = vadd.f32 %v1172_v14, %v6497_v15  ;;  %v1262_v39 = vadd.f32 %v1261_v17, %v6497_v15  ;;  %v7459_v47 = vld [vmem:[%s8882_s1 + $0x10] sm:$0xff] }
 0x17a   :  { %2846 = vmatprep.subr.mxu0 %v7292_v31  ;;  %2935 = vmatprep.subr.mxu1 %v7297_v1 }
 0x17b   :  { %2847 = vmatpush1.msra.mxu0 %v7306_v51  ;;  %2936 = vmatpush1.msra.mxu1 %v7311_v13  ;;  %4326 = vst [vmem:[%s8884_s3 + $0x228] sm:$0xff] %v1173_v55  ;;  %4328 = vst [vmem:[%s8884_s3 + $0x238] sm:$0xff] %v1262_v39 }
 0x17c   :  { %2848 = vmatprep.subr.mxu0 %v7318_v33  ;;  %2937 = vmatprep.subr.mxu1 %v7323_v54  ;;  %v1176_v32 = vpop.f32.mrf.mxu0  ;;  %v1265_v4 = vpop.f32.mrf.mxu1 }
 0x17d   :  { %2849 = vmatpush1.msra.mxu0 %v7338_v42  ;;  %2938 = vmatpush1.msra.mxu1 %v7343_v34  ;;  %v1177_v20 = vadd.f32 %v1176_v32, %v6536_v22  ;;  %v1266_v25 = vadd.f32 %v1265_v4, %v6536_v22 }
 0x17e   :  { %2850 = vmatprep.subr.mxu0 %v7102_v11  ;;  %2939 = vmatprep.subr.mxu1 %v7107_v23  ;;  %v1178_v62 = vpop.f32.mrf.mxu0  ;;  %v1267_v5 = vpop.f32.mrf.mxu1 }
 0x17f   :  { %2851 = vmatpush1.msra.mxu0 %v7118_v28  ;;  %2940 = vmatpush1.msra.mxu1 %v7123_v29  ;;  %4329 = vst [vmem:[%s8884_s3 + $0x240] sm:$0xff] %v1177_v20  ;;  %4331 = vst [vmem:[%s8884_s3 + $0x250] sm:$0xff] %v1266_v25  ;;  %v1179_v6 = vadd.f32 %v1178_v62, %v6536_v22  ;;  %v1268_v8 = vadd.f32 %v1267_v5, %v6536_v22  ;;  %v7488_v25 = vld [vmem:[%s8881_s0 + $0x188] sm:$0xff]  ;;  %v7493_v62 = vld [vmem:[%s8881_s0 + $0x198] sm:$0xff] }
 0x180   :  { %2656 = vmatprep.mubr.f32.mxu0 %v8893_v58  ;;  %2745 = vmatprep.mubr.f32.mxu1 %v8893_v58  ;;  %v7498_v5 = vld [vmem:[%s8882_s1 + $0x18] sm:$0xff] }
 0x181   :  { %2852 = vmatprep.subr.mxu0 %v6912_v27  ;;  %2941 = vmatprep.subr.mxu1 %v6917_v30  ;;  %4330 = vst [vmem:[%s8884_s3 + $0x248] sm:$0xff] %v1179_v6  ;;  %4332 = vst [vmem:[%s8884_s3 + $0x258] sm:$0xff] %v1268_v8  ;;  %v7394_v27 = vld [vmem:[%s8882_s1 + $0x8] sm:$0xff]  ;;  %v7403_v30 = vld [vmem:[%s8881_s0 + $0x200] sm:$0xff] }
 0x182   :  { %4770 = vmatmul.mubr.msk.f32.gmra.mxu0 %vm94_vm0, %v7394_v27  ;;  %4774 = vmatmul.mubr.msk.f32.gmra.mxu1 %vm94_vm0, %v7394_v27  ;;  %v1182_v38 = vpop.f32.mrf.mxu0  ;;  %v1271_v63 = vpop.f32.mrf.mxu1  ;;  %v4794_v6 = vld [vmem:[%s8881_s0 + $0x168] sm:$0xff]  ;;  %v4796_v8 = vld [vmem:[%s8881_s0 + $0x178] sm:$0xff] }
 0x183   :  { %2853 = vmatpush1.msra.mxu0 %v6924_v43  ;;  %2942 = vmatpush1.msra.mxu1 %v6929_v44  ;;  %v1183_v45 = vadd.f32 %v1182_v38, %v6599_v37  ;;  %v1272_v24 = vadd.f32 %v1271_v63, %v6599_v37  ;;  %v4793_v38 = vld [vmem:[%s8881_s0 + $0x160] sm:$0xff]  ;;  %v7547_v63 = vld [vmem:[%s8881_s0 + $0x318] sm:$0xff] }
 0x184   :  { %2854 = vmatprep.subr.mxu0 %v7378_v10  ;;  %2943 = vmatprep.subr.mxu1 %v7383_v53  ;;  %v1184_v43 = vpop.f32.mrf.mxu0  ;;  %v1273_v44 = vpop.f32.mrf.mxu1 }
 0x185   :  { %2855 = vmatpush1.msra.mxu0 %v7403_v30  ;;  %2944 = vmatpush1.msra.mxu1 %v7408_v40  ;;  %4333 = vst [vmem:[%s8884_s3 + $0x260] sm:$0xff] %v1183_v45  ;;  %4335 = vst [vmem:[%s8884_s3 + $0x270] sm:$0xff] %v1272_v24  ;;  %v1185_v46 = vadd.f32 %v1184_v43, %v6599_v37  ;;  %v1274_v26 = vadd.f32 %v1273_v44, %v6599_v37  ;;  %v7553_v45 = vld [vmem:[%s8881_s0 + $0x300] sm:$0xff]  ;;  %v7558_v24 = vld [vmem:[%s8881_s0 + $0x310] sm:$0xff] }
 0x186   :  { %2662 = vmatprep.mubr.f32.mxu0 %v8893_v58  ;;  %2751 = vmatprep.mubr.f32.mxu1 %v8893_v58  ;;  %v7563_v43 = vld [vmem:[%s8882_s1] sm:$0xff] }
 0x187   :  { %2856 = vmatprep.subr.mxu0 %v7419_v60  ;;  %2945 = vmatprep.subr.mxu1 %v7424_v9  ;;  %4334 = vst [vmem:[%s8884_s3 + $0x268] sm:$0xff] %v1185_v46  ;;  %4336 = vst [vmem:[%s8884_s3 + $0x278] sm:$0xff] %v1274_v26  ;;  %v7580_v26 = vld [vmem:[%s8881_s0 + $0x2a8] sm:$0xff] }
 0x188   :  { %4771 = vmatmul.mubr.msk.f32.gmra.mxu0 %vm94_vm0, %v7459_v47  ;;  %4775 = vmatmul.mubr.msk.f32.gmra.mxu1 %vm94_vm0, %v7459_v47 }
 0x189   :  { %2857 = vmatpush1.msra.mxu0 %v7441_v57  ;;  %2946 = vmatpush1.msra.mxu1 %v7446_v0  ;;  %v1412_v41 = vpop.f32.mrf.mxu0  ;;  %v1501_v14 = vpop.f32.mrf.mxu1 }
 0x18a   :  { %2858 = vmatprep.subr.mxu0 %v7174_v21  ;;  %2947 = vmatprep.subr.mxu1 %v7179_v3  ;;  %v1413_v17 = vadd.f32 %v1412_v41, %v6399_v50  ;;  %v1502_v55 = vadd.f32 %v1501_v14, %v6399_v50  ;;  %v7585_v41 = vld [vmem:[%s8881_s0 + $0x2b8] sm:$0xff] }
 0x18b   :  { %2859 = vmatpush1.msra.mxu0 %v7196_v48  ;;  %2948 = vmatpush1.msra.mxu1 %v7201_v49  ;;  %v1414_v39 = vpop.f32.mrf.mxu0  ;;  %v1503_v32 = vpop.f32.mrf.mxu1 }
 0x18c   :  { %2668 = vmatprep.mubr.f32.mxu0 %v8893_v58  ;;  %2757 = vmatprep.mubr.f32.mxu1 %v8893_v58  ;;  %4397 = vst [vmem:[%s8884_s3 + $0x280] sm:$0xff] %v1413_v17  ;;  %4399 = vst [vmem:[%s8884_s3 + $0x290] sm:$0xff] %v1502_v55  ;;  %v1415_v4 = vadd.f32 %v1414_v39, %v6399_v50  ;;  %v1504_v20 = vadd.f32 %v1503_v32, %v6399_v50  ;;  %v7594_v55 = vld [vmem:[%s8881_s0 + $0x2a0] sm:$0xff]  ;;  %v7599_v39 = vld [vmem:[%s8881_s0 + $0x2b0] sm:$0xff] }
 0x18d   :  { %2860 = vmatprep.subr.mxu0 %v6982_v59  ;;  %2949 = vmatprep.subr.mxu1 %v6987_v2  ;;  %v7507_v59 = vld [vmem:[%s8881_s0 + $0x180] sm:$0xff]  ;;  %v7512_v2 = vld [vmem:[%s8881_s0 + $0x190] sm:$0xff] }
 0x18e   :  { %4772 = vmatmul.mubr.msk.f32.gmra.mxu0 %vm94_vm0, %v7498_v5  ;;  %4776 = vmatmul.mubr.msk.f32.gmra.mxu1 %vm94_vm0, %v7498_v5  ;;  %4398 = vst [vmem:[%s8884_s3 + $0x288] sm:$0xff] %v1415_v4  ;;  %4400 = vst [vmem:[%s8884_s3 + $0x298] sm:$0xff] %v1504_v20 }
 0x18f   :  { %2861 = vmatpush1.msra.mxu0 %v7002_v7  ;;  %2950 = vmatpush1.msra.mxu1 %v7007_v12  ;;  %v4795_v7 = vld [vmem:[%s8881_s0 + $0x170] sm:$0xff]  ;;  %v7542_v12 = vld [vmem:[%s8881_s0 + $0x308] sm:$0xff] }
 0x190   :  { %2862 = vmatprep.subr.mxu0 %v7488_v25  ;;  %2951 = vmatprep.subr.mxu1 %v7493_v62 }
 0x191   :  { %2863 = vmatpush1.msra.mxu0 %v7507_v59  ;;  %2952 = vmatpush1.msra.mxu1 %v7512_v2 }
 0x192   :  { %2864 = vmatprep.subr.mxu0 %v4794_v6  ;;  %2953 = vmatprep.subr.mxu1 %v4796_v8 }
 0x193   :  { %2865 = vmatpush1.msra.mxu0 %v4793_v38  ;;  %2898 = vmatprep.mubr.f32.mxu0 %v8893_v58 }
 0x194   :  { %2954 = vmatpush1.msra.mxu1 %v4795_v7  ;;  %2987 = vmatprep.mubr.f32.mxu1 %v8893_v58 }
 0x195   :  { %4845 = vmatmul.mubr.msk.f32.vlgmr.msra.gmra.mxu0 %vm94_vm0, %v7563_v43  ;;  %4849 = vmatmul.mubr.msk.f32.vlgmr.msra.gmra.mxu1 %vm94_vm0, %v7563_v43 }
 0x196   :  { %3088 = vmatprep.subr.mxu0 %v7542_v12  ;;  %3177 = vmatprep.subr.mxu1 %v7547_v63 }
 0x197   :  { %3089 = vmatpush1.msra.mxu0 %v7553_v45  ;;  %3178 = vmatpush1.msra.mxu1 %v7558_v24 }
 0x198   :  { %3090 = vmatprep.subr.mxu0 %v7258_v16  ;;  %3179 = vmatprep.subr.mxu1 %v7263_v35  ;;  %v1418_v44 = vpop.f32.mrf.mxu0  ;;  %v1507_v46 = vpop.f32.mrf.mxu1 }
 0x199   :  { %3091 = vmatpush1.msra.mxu0 %v7270_v36  ;;  %3180 = vmatpush1.msra.mxu1 %v7275_v56  ;;  %v1419_v14 = vadd.f32 %v1418_v44, %v6497_v15  ;;  %v1508_v17 = vadd.f32 %v1507_v46, %v6497_v15  ;;  %v7646_v46 = vld [vmem:[%s8881_s0 + $0x228] sm:$0xff] }
 0x19a   :  { %3092 = vmatprep.subr.mxu0 %v7058_v52  ;;  %3181 = vmatprep.subr.mxu1 %v7063_v61  ;;  %v1420_v32 = vpop.f32.mrf.mxu0  ;;  %v1509_v4 = vpop.f32.mrf.mxu1 }
 0x19b   :  { %3093 = vmatpush1.msra.mxu0 %v7070_v18  ;;  %3182 = vmatpush1.msra.mxu1 %v7075_v19  ;;  %4401 = vst [vmem:[%s8884_s3 + $0x2a0] sm:$0xff] %v1419_v14  ;;  %4403 = vst [vmem:[%s8884_s3 + $0x2b0] sm:$0xff] %v1508_v17  ;;  %v1421_v52 = vadd.f32 %v1420_v32, %v6497_v15  ;;  %v1510_v61 = vadd.f32 %v1509_v4, %v6497_v15  ;;  %v7651_v14 = vld [vmem:[%s8881_s0 + $0x238] sm:$0xff] }
 0x19c   :  { %3094 = vmatprep.subr.mxu0 %v7580_v26  ;;  %3183 = vmatprep.subr.mxu1 %v7585_v41 }
 0x19d   :  { %3095 = vmatpush1.msra.mxu0 %v7594_v55  ;;  %3184 = vmatpush1.msra.mxu1 %v7599_v39  ;;  %4402 = vst [vmem:[%s8884_s3 + $0x2a8] sm:$0xff] %v1421_v52  ;;  %4404 = vst [vmem:[%s8884_s3 + $0x2b8] sm:$0xff] %v1510_v61 }
 0x19e   :  { %3096 = vmatprep.subr.mxu0 %v7292_v31  ;;  %3185 = vmatprep.subr.mxu1 %v7297_v1  ;;  %v1424_v18 = vpop.f32.mrf.mxu0  ;;  %v1513_v19 = vpop.f32.mrf.mxu1 }
 0x19f   :  { %3097 = vmatpush1.msra.mxu0 %v7306_v51  ;;  %3186 = vmatpush1.msra.mxu1 %v7311_v13  ;;  %v1425_v20 = vadd.f32 %v1424_v18, %v6536_v22  ;;  %v1514_v6 = vadd.f32 %v1513_v19, %v6536_v22 }
 0x1a0   :  { %3098 = vmatprep.subr.mxu0 %v7318_v33  ;;  %3187 = vmatprep.subr.mxu1 %v7323_v54  ;;  %v1426_v8 = vpop.f32.mrf.mxu0  ;;  %v1515_v38 = vpop.f32.mrf.mxu1 }
 0x1a1   :  { %3099 = vmatpush1.msra.mxu0 %v7338_v42  ;;  %3188 = vmatpush1.msra.mxu1 %v7343_v34  ;;  %4405 = vst [vmem:[%s8884_s3 + $0x2c0] sm:$0xff] %v1425_v20  ;;  %4407 = vst [vmem:[%s8884_s3 + $0x2d0] sm:$0xff] %v1514_v6  ;;  %v1427_v7 = vadd.f32 %v1426_v8, %v6536_v22  ;;  %v1516_v44 = vadd.f32 %v1515_v38, %v6536_v22 }
 0x1a2   :  { %2904 = vmatprep.mubr.f32.mxu0 %v8893_v58  ;;  %2993 = vmatprep.mubr.f32.mxu1 %v8893_v58 }
 0x1a3   :  { %3100 = vmatprep.subr.mxu0 %v7102_v11  ;;  %3189 = vmatprep.subr.mxu1 %v7107_v23  ;;  %4406 = vst [vmem:[%s8884_s3 + $0x2c8] sm:$0xff] %v1427_v7  ;;  %4408 = vst [vmem:[%s8884_s3 + $0x2d8] sm:$0xff] %v1516_v44  ;;  %v7666_v11 = vld [vmem:[%s8881_s0 + $0x220] sm:$0xff]  ;;  %v7671_v23 = vld [vmem:[%s8881_s0 + $0x230] sm:$0xff] }
 0x1a4   :  { %4846 = vmatmul.mubr.msk.f32.gmra.mxu0 %vm94_vm0, %v7394_v27  ;;  %4850 = vmatmul.mubr.msk.f32.gmra.mxu1 %vm94_vm0, %v7394_v27  ;;  %v1430_v17 = vpop.f32.mrf.mxu0  ;;  %v1519_v32 = vpop.f32.mrf.mxu1 }
 0x1a5   :  { %3101 = vmatpush1.msra.mxu0 %v7118_v28  ;;  %3190 = vmatpush1.msra.mxu1 %v7123_v29  ;;  %v1431_v4 = vadd.f32 %v1430_v17, %v6599_v37  ;;  %v1520_v52 = vadd.f32 %v1519_v32, %v6599_v37  ;;  %v7726_v32 = vld [vmem:[%s8881_s0 + $0x1a8] sm:$0xff] }
 0x1a6   :  { %3102 = vmatprep.subr.mxu0 %v7646_v46  ;;  %3191 = vmatprep.subr.mxu1 %v7651_v14  ;;  %v1432_v61 = vpop.f32.mrf.mxu0  ;;  %v1521_v18 = vpop.f32.mrf.mxu1 }
 0x1a7   :  { %3103 = vmatpush1.msra.mxu0 %v7666_v11  ;;  %3192 = vmatpush1.msra.mxu1 %v7671_v23  ;;  %4409 = vst [vmem:[%s8884_s3 + $0x2e0] sm:$0xff] %v1431_v4  ;;  %4411 = vst [vmem:[%s8884_s3 + $0x2f0] sm:$0xff] %v1520_v52  ;;  %v1433_v28 = vadd.f32 %v1432_v61, %v6599_v37  ;;  %v1522_v29 = vadd.f32 %v1521_v18, %v6599_v37  ;;  %v7731_v4 = vld [vmem:[%s8881_s0 + $0x1b8] sm:$0xff]  ;;  %v7800_v52 = vld [vmem:[%s8881_s0 + $0x2c8] sm:$0xff] }
 0x1a8   :  { %2910 = vmatprep.mubr.f32.mxu0 %v8893_v58  ;;  %2999 = vmatprep.mubr.f32.mxu1 %v8893_v58  ;;  %v7805_v61 = vld [vmem:[%s8881_s0 + $0x2d8] sm:$0xff] }
 0x1a9   :  { %3104 = vmatprep.subr.mxu0 %v7378_v10  ;;  %3193 = vmatprep.subr.mxu1 %v7383_v53  ;;  %4410 = vst [vmem:[%s8884_s3 + $0x2e8] sm:$0xff] %v1433_v28  ;;  %4412 = vst [vmem:[%s8884_s3 + $0x2f8] sm:$0xff] %v1522_v29  ;;  %v7814_v29 = vld [vmem:[%s8881_s0 + $0x2c0] sm:$0xff] }
 0x1aa   :  { %4847 = vmatmul.mubr.msk.f32.gmra.mxu0 %vm94_vm0, %v7459_v47  ;;  %4851 = vmatmul.mubr.msk.f32.gmra.mxu1 %vm94_vm0, %v7459_v47 }
 0x1ab   :  { %3105 = vmatpush1.msra.mxu0 %v7403_v30  ;;  %3194 = vmatpush1.msra.mxu1 %v7408_v40  ;;  %v1660_v19 = vpop.f32.mrf.mxu0  ;;  %v1749_v20 = vpop.f32.mrf.mxu1 }
 0x1ac   :  { %3106 = vmatprep.subr.mxu0 %v7419_v60  ;;  %3195 = vmatprep.subr.mxu1 %v7424_v9  ;;  %v1661_v6 = vadd.f32 %v1660_v19, %v6399_v50  ;;  %v1750_v8 = vadd.f32 %v1749_v20, %v6399_v50  ;;  %v7819_v19 = vld [vmem:[%s8881_s0 + $0x2d0] sm:$0xff] }
 0x1ad   :  { %3107 = vmatpush1.msra.mxu0 %v7441_v57  ;;  %3196 = vmatpush1.msra.mxu1 %v7446_v0  ;;  %v1662_v38 = vpop.f32.mrf.mxu0  ;;  %v1751_v7 = vpop.f32.mrf.mxu1 }
 0x1ae   :  { %2916 = vmatprep.mubr.f32.mxu0 %v8893_v58  ;;  %3005 = vmatprep.mubr.f32.mxu1 %v8893_v58  ;;  %4473 = vst [vmem:[%s8884_s3 + $0x300] sm:$0xff] %v1661_v6  ;;  %4475 = vst [vmem:[%s8884_s3 + $0x310] sm:$0xff] %v1750_v8  ;;  %v1663_v44 = vadd.f32 %v1662_v38, %v6399_v50  ;;  %v1752_v17 = vadd.f32 %v1751_v7, %v6399_v50 }
 0x1af   :  { %3108 = vmatprep.subr.mxu0 %v7174_v21  ;;  %3197 = vmatprep.subr.mxu1 %v7179_v3  ;;  %v7740_v21 = vld [vmem:[%s8881_s0 + $0x1a0] sm:$0xff]  ;;  %v7745_v3 = vld [vmem:[%s8881_s0 + $0x1b0] sm:$0xff] }
 0x1b0   :  { %4848 = vmatmul.mubr.msk.f32.gmra.mxu0 %vm94_vm0, %v7498_v5  ;;  %4852 = vmatmul.mubr.msk.f32.gmra.mxu1 %vm94_vm0, %v7498_v5  ;;  %4474 = vst [vmem:[%s8884_s3 + $0x308] sm:$0xff] %v1663_v44  ;;  %4476 = vst [vmem:[%s8884_s3 + $0x318] sm:$0xff] %v1752_v17 }
 0x1b1   :  { %3109 = vmatpush1.msra.mxu0 %v7196_v48  ;;  %3198 = vmatpush1.msra.mxu1 %v7201_v49  ;;  %v7766_v48 = vld [vmem:[%s8881_s0 + $0x328] sm:$0xff]  ;;  %v7771_v49 = vld [vmem:[%s8881_s0 + $0x338] sm:$0xff] }
 0x1b2   :  { %3110 = vmatprep.subr.mxu0 %v7726_v32  ;;  %3199 = vmatprep.subr.mxu1 %v7731_v4 }
 0x1b3   :  { %3111 = vmatpush1.msra.mxu0 %v7740_v21  ;;  %3200 = vmatpush1.msra.mxu1 %v7745_v3 }
 0x1b4   :  { %3112 = vmatprep.subr.mxu0 %v7488_v25  ;;  %3201 = vmatprep.subr.mxu1 %v7493_v62  ;;  %v7778_v25 = vld [vmem:[%s8881_s0 + $0x320] sm:$0xff]  ;;  %v7783_v62 = vld [vmem:[%s8881_s0 + $0x330] sm:$0xff] }
 0x1b5   :  { %3113 = vmatpush1.msra.mxu0 %v7507_v59  ;;  %3146 = vmatprep.mubr.f32.mxu0 %v8893_v58 }
 0x1b6   :  { %3202 = vmatpush1.msra.mxu1 %v7512_v2  ;;  %3235 = vmatprep.mubr.f32.mxu1 %v8893_v58 }
 0x1b7   :  { %4921 = vmatmul.mubr.msk.f32.vlgmr.msra.gmra.mxu0 %vm94_vm0, %v7563_v43  ;;  %4925 = vmatmul.mubr.msk.f32.vlgmr.msra.gmra.mxu1 %vm94_vm0, %v7563_v43 }
 0x1b8   :  { %3336 = vmatprep.subr.mxu0 %v7766_v48  ;;  %3425 = vmatprep.subr.mxu1 %v7771_v49 }
 0x1b9   :  { %3337 = vmatpush1.msra.mxu0 %v7778_v25  ;;  %3426 = vmatpush1.msra.mxu1 %v7783_v62 }
 0x1ba   :  { %3338 = vmatprep.subr.mxu0 %v7542_v12  ;;  %3427 = vmatprep.subr.mxu1 %v7547_v63  ;;  %v1666_v59 = vpop.f32.mrf.mxu0  ;;  %v1755_v2 = vpop.f32.mrf.mxu1 }
 0x1bb   :  { %3339 = vmatpush1.msra.mxu0 %v7553_v45  ;;  %3428 = vmatpush1.msra.mxu1 %v7558_v24  ;;  %v1667_v18 = vadd.f32 %v1666_v59, %v6497_v15  ;;  %v1756_v28 = vadd.f32 %v1755_v2, %v6497_v15 }
 0x1bc   :  { %3340 = vmatprep.subr.mxu0 %v7258_v16  ;;  %3429 = vmatprep.subr.mxu1 %v7263_v35  ;;  %v1668_v20 = vpop.f32.mrf.mxu0  ;;  %v1757_v6 = vpop.f32.mrf.mxu1 }
 0x1bd   :  { %3341 = vmatpush1.msra.mxu0 %v7270_v36  ;;  %3430 = vmatpush1.msra.mxu1 %v7275_v56  ;;  %4477 = vst [vmem:[%s8884_s3 + $0x320] sm:$0xff] %v1667_v18  ;;  %4479 = vst [vmem:[%s8884_s3 + $0x330] sm:$0xff] %v1756_v28  ;;  %v1669_v16 = vadd.f32 %v1668_v20, %v6497_v15  ;;  %v1758_v35 = vadd.f32 %v1757_v6, %v6497_v15 }
 0x1be   :  { %3342 = vmatprep.subr.mxu0 %v7800_v52  ;;  %3431 = vmatprep.subr.mxu1 %v7805_v61 }
 0x1bf   :  { %3343 = vmatpush1.msra.mxu0 %v7814_v29  ;;  %3432 = vmatpush1.msra.mxu1 %v7819_v19  ;;  %4478 = vst [vmem:[%s8884_s3 + $0x328] sm:$0xff] %v1669_v16  ;;  %4480 = vst [vmem:[%s8884_s3 + $0x338] sm:$0xff] %v1758_v35 }
 0x1c0   :  { %3344 = vmatprep.subr.mxu0 %v7580_v26  ;;  %3433 = vmatprep.subr.mxu1 %v7585_v41  ;;  %v1672_v36 = vpop.f32.mrf.mxu0  ;;  %v1761_v56 = vpop.f32.mrf.mxu1 }
 0x1c1   :  { %3345 = vmatpush1.msra.mxu0 %v7594_v55  ;;  %3434 = vmatpush1.msra.mxu1 %v7599_v39  ;;  %v1673_v8 = vadd.f32 %v1672_v36, %v6536_v22  ;;  %v1762_v38 = vadd.f32 %v1761_v56, %v6536_v22 }
 0x1c2   :  { %3346 = vmatprep.subr.mxu0 %v7292_v31  ;;  %3435 = vmatprep.subr.mxu1 %v7297_v1  ;;  %v1674_v7 = vpop.f32.mrf.mxu0  ;;  %v1763_v44 = vpop.f32.mrf.mxu1  ;;  %v7866_v1 = vld [vmem:[%s8881_s0 + $0x248] sm:$0xff] }
 0x1c3   :  { %3347 = vmatpush1.msra.mxu0 %v7306_v51  ;;  %3436 = vmatpush1.msra.mxu1 %v7311_v13  ;;  %4481 = vst [vmem:[%s8884_s3 + $0x340] sm:$0xff] %v1673_v8  ;;  %4483 = vst [vmem:[%s8884_s3 + $0x350] sm:$0xff] %v1762_v38  ;;  %v1675_v17 = vadd.f32 %v1674_v7, %v6536_v22  ;;  %v1764_v31 = vadd.f32 %v1763_v44, %v6536_v22  ;;  %v7871_v51 = vld [vmem:[%s8881_s0 + $0x258] sm:$0xff]  ;;  %v7886_v13 = vld [vmem:[%s8881_s0 + $0x240] sm:$0xff] }
 0x1c4   :  { %3152 = vmatprep.mubr.f32.mxu0 %v8893_v58  ;;  %3241 = vmatprep.mubr.f32.mxu1 %v8893_v58  ;;  %v8020_v38 = vld [vmem:[%s8881_s0 + $0x2e8] sm:$0xff]  ;;  %v8025_v7 = vld [vmem:[%s8881_s0 + $0x2f8] sm:$0xff] }
 0x1c5   :  { %3348 = vmatprep.subr.mxu0 %v7318_v33  ;;  %3437 = vmatprep.subr.mxu1 %v7323_v54  ;;  %4482 = vst [vmem:[%s8884_s3 + $0x348] sm:$0xff] %v1675_v17  ;;  %4484 = vst [vmem:[%s8884_s3 + $0x358] sm:$0xff] %v1764_v31  ;;  %v7891_v33 = vld [vmem:[%s8881_s0 + $0x250] sm:$0xff]  ;;  %v8034_v31 = vld [vmem:[%s8881_s0 + $0x2e0] sm:$0xff] }
 0x1c6   :  { %4922 = vmatmul.mubr.msk.f32.gmra.mxu0 %vm94_vm0, %v7394_v27  ;;  %4926 = vmatmul.mubr.msk.f32.gmra.mxu1 %vm94_vm0, %v7394_v27  ;;  %v1678_v54 = vpop.f32.mrf.mxu0  ;;  %v1767_v59 = vpop.f32.mrf.mxu1 }
 0x1c7   :  { %3349 = vmatpush1.msra.mxu0 %v7338_v42  ;;  %3438 = vmatpush1.msra.mxu1 %v7343_v34  ;;  %v1679_v2 = vadd.f32 %v1678_v54, %v6599_v37  ;;  %v1768_v18 = vadd.f32 %v1767_v59, %v6599_v37  ;;  %v8039_v54 = vld [vmem:[%s8881_s0 + $0x2f0] sm:$0xff] }
 0x1c8   :  { %3350 = vmatprep.subr.mxu0 %v7866_v1  ;;  %3439 = vmatprep.subr.mxu1 %v7871_v51  ;;  %v1680_v28 = vpop.f32.mrf.mxu0  ;;  %v1769_v20 = vpop.f32.mrf.mxu1 }
 0x1c9   :  { %3351 = vmatpush1.msra.mxu0 %v7886_v13  ;;  %3440 = vmatpush1.msra.mxu1 %v7891_v33  ;;  %4485 = vst [vmem:[%s8884_s3 + $0x360] sm:$0xff] %v1679_v2  ;;  %4487 = vst [vmem:[%s8884_s3 + $0x370] sm:$0xff] %v1768_v18  ;;  %v1681_v42 = vadd.f32 %v1680_v28, %v6599_v37  ;;  %v1770_v34 = vadd.f32 %v1769_v20, %v6599_v37  ;;  %v8072_v20 = vld [vmem:[%s8881_s0 + $0x288] sm:$0xff] }
 0x1ca   :  { %3158 = vmatprep.mubr.f32.mxu0 %v8893_v58  ;;  %3247 = vmatprep.mubr.f32.mxu1 %v8893_v58 }
 0x1cb   :  { %3352 = vmatprep.subr.mxu0 %v7646_v46  ;;  %3441 = vmatprep.subr.mxu1 %v7651_v14  ;;  %4486 = vst [vmem:[%s8884_s3 + $0x368] sm:$0xff] %v1681_v42  ;;  %4488 = vst [vmem:[%s8884_s3 + $0x378] sm:$0xff] %v1770_v34  ;;  %v8077_v42 = vld [vmem:[%s8881_s0 + $0x298] sm:$0xff] }
 0x1cc   :  { %4923 = vmatmul.mubr.msk.f32.gmra.mxu0 %vm94_vm0, %v7459_v47  ;;  %4927 = vmatmul.mubr.msk.f32.gmra.mxu1 %vm94_vm0, %v7459_v47 }
 0x1cd   :  { %3353 = vmatpush1.msra.mxu0 %v7666_v11  ;;  %3442 = vmatpush1.msra.mxu1 %v7671_v23  ;;  %v1908_v6 = vpop.f32.mrf.mxu0  ;;  %v1997_v16 = vpop.f32.mrf.mxu1 }
 0x1ce   :  { %3354 = vmatprep.subr.mxu0 %v7378_v10  ;;  %3443 = vmatprep.subr.mxu1 %v7383_v53  ;;  %v1909_v35 = vadd.f32 %v1908_v6, %v6399_v50  ;;  %v1998_v36 = vadd.f32 %v1997_v16, %v6399_v50  ;;  %v8106_v16 = vld [vmem:[%s8881_s0 + $0x268] sm:$0xff] }
 0x1cf   :  { %3355 = vmatpush1.msra.mxu0 %v7403_v30  ;;  %3444 = vmatpush1.msra.mxu1 %v7408_v40  ;;  %v1910_v56 = vpop.f32.mrf.mxu0  ;;  %v1999_v8 = vpop.f32.mrf.mxu1  ;;  %v7946_v30 = vld [vmem:[%s8881_s0 + $0x1c8] sm:$0xff]  ;;  %v7951_v40 = vld [vmem:[%s8881_s0 + $0x1d8] sm:$0xff] }
 0x1d0   :  { %3164 = vmatprep.mubr.f32.mxu0 %v8893_v58  ;;  %3253 = vmatprep.mubr.f32.mxu1 %v8893_v58  ;;  %4549 = vst [vmem:[%s8884_s3 + $0x380] sm:$0xff] %v1909_v35  ;;  %4551 = vst [vmem:[%s8884_s3 + $0x390] sm:$0xff] %v1998_v36  ;;  %v1911_v10 = vadd.f32 %v1910_v56, %v6399_v50  ;;  %v2000_v53 = vadd.f32 %v1999_v8, %v6399_v50  ;;  %v8111_v35 = vld [vmem:[%s8881_s0 + $0x278] sm:$0xff]  ;;  %v8126_v36 = vld [vmem:[%s8881_s0 + $0x260] sm:$0xff] }
 0x1d1   :  { %3356 = vmatprep.subr.mxu0 %v7419_v60  ;;  %3445 = vmatprep.subr.mxu1 %v7424_v9  ;;  %v7960_v60 = vld [vmem:[%s8881_s0 + $0x1c0] sm:$0xff]  ;;  %v7965_v9 = vld [vmem:[%s8881_s0 + $0x1d0] sm:$0xff] }
 0x1d2   :  { %4924 = vmatmul.mubr.msk.f32.gmra.mxu0 %vm94_vm0, %v7498_v5  ;;  %4928 = vmatmul.mubr.msk.f32.gmra.mxu1 %vm94_vm0, %v7498_v5  ;;  %4550 = vst [vmem:[%s8884_s3 + $0x388] sm:$0xff] %v1911_v10  ;;  %4552 = vst [vmem:[%s8884_s3 + $0x398] sm:$0xff] %v2000_v53  ;;  %v8131_v56 = vld [vmem:[%s8881_s0 + $0x270] sm:$0xff] }
 0x1d3   :  { %3357 = vmatpush1.msra.mxu0 %v7441_v57  ;;  %3446 = vmatpush1.msra.mxu1 %v7446_v0  ;;  %v7986_v57 = vld [vmem:[%s8881_s0 + $0x348] sm:$0xff]  ;;  %v7991_v0 = vld [vmem:[%s8881_s0 + $0x358] sm:$0xff] }
 0x1d4   :  { %3358 = vmatprep.subr.mxu0 %v7946_v30  ;;  %3447 = vmatprep.subr.mxu1 %v7951_v40 }
 0x1d5   :  { %3359 = vmatpush1.msra.mxu0 %v7960_v60  ;;  %3448 = vmatpush1.msra.mxu1 %v7965_v9 }
 0x1d6   :  { %3360 = vmatprep.subr.mxu0 %v7726_v32  ;;  %3449 = vmatprep.subr.mxu1 %v7731_v4  ;;  %v7998_v32 = vld [vmem:[%s8881_s0 + $0x340] sm:$0xff]  ;;  %v8003_v4 = vld [vmem:[%s8881_s0 + $0x350] sm:$0xff] }
 0x1d7   :  { %3361 = vmatpush1.msra.mxu0 %v7740_v21  ;;  %3394 = vmatprep.mubr.f32.mxu0 %v8893_v58 }
 0x1d8   :  { %3450 = vmatpush1.msra.mxu1 %v7745_v3  ;;  %3483 = vmatprep.mubr.f32.mxu1 %v8893_v58 }
 0x1d9   :  { %4997 = vmatmul.mubr.msk.f32.vlgmr.msra.gmra.mxu0 %vm94_vm0, %v7563_v43  ;;  %5001 = vmatmul.mubr.msk.f32.vlgmr.msra.gmra.mxu1 %vm94_vm0, %v7563_v43 }
 0x1da   :  { %3584 = vmatprep.subr.mxu0 %v7986_v57  ;;  %3673 = vmatprep.subr.mxu1 %v7991_v0 }
 0x1db   :  { %3585 = vmatpush1.msra.mxu0 %v7998_v32  ;;  %3674 = vmatpush1.msra.mxu1 %v8003_v4 }
 0x1dc   :  { %3586 = vmatprep.subr.mxu0 %v7766_v48  ;;  %3675 = vmatprep.subr.mxu1 %v7771_v49  ;;  %v1914_v21 = vpop.f32.mrf.mxu0  ;;  %v2003_v3 = vpop.f32.mrf.mxu1 }
 0x1dd   :  { %3587 = vmatpush1.msra.mxu0 %v7778_v25  ;;  %3676 = vmatpush1.msra.mxu1 %v7783_v62  ;;  %v1915_v44 = vadd.f32 %v1914_v21, %v6497_v15  ;;  %v2004_v17 = vadd.f32 %v2003_v3, %v6497_v15 }
 0x1de   :  { %3588 = vmatprep.subr.mxu0 %v7542_v12  ;;  %3677 = vmatprep.subr.mxu1 %v7547_v63  ;;  %v1916_v59 = vpop.f32.mrf.mxu0  ;;  %v2005_v2 = vpop.f32.mrf.mxu1 }
 0x1df   :  { %3589 = vmatpush1.msra.mxu0 %v7553_v45  ;;  %3678 = vmatpush1.msra.mxu1 %v7558_v24  ;;  %4553 = vst [vmem:[%s8884_s3 + $0x3a0] sm:$0xff] %v1915_v44  ;;  %4555 = vst [vmem:[%s8884_s3 + $0x3b0] sm:$0xff] %v2004_v17  ;;  %v1917_v12 = vadd.f32 %v1916_v59, %v6497_v15  ;;  %v2006_v63 = vadd.f32 %v2005_v2, %v6497_v15 }
 0x1e0   :  { %3590 = vmatprep.subr.mxu0 %v8020_v38  ;;  %3679 = vmatprep.subr.mxu1 %v8025_v7 }
 0x1e1   :  { %3591 = vmatpush1.msra.mxu0 %v8034_v31  ;;  %3680 = vmatpush1.msra.mxu1 %v8039_v54  ;;  %4554 = vst [vmem:[%s8884_s3 + $0x3a8] sm:$0xff] %v1917_v12  ;;  %4556 = vst [vmem:[%s8884_s3 + $0x3b8] sm:$0xff] %v2006_v63  ;;  %v8170_v12 = vld [vmem:[%s8881_s0 + $0x208] sm:$0xff]  ;;  %v8175_v63 = vld [vmem:[%s8881_s0 + $0x218] sm:$0xff] }
 0x1e2   :  { %3592 = vmatprep.subr.mxu0 %v7800_v52  ;;  %3681 = vmatprep.subr.mxu1 %v7805_v61  ;;  %v1920_v45 = vpop.f32.mrf.mxu0  ;;  %v2009_v24 = vpop.f32.mrf.mxu1 }
 0x1e3   :  { %3593 = vmatpush1.msra.mxu0 %v7814_v29  ;;  %3682 = vmatpush1.msra.mxu1 %v7819_v19  ;;  %v1921_v18 = vadd.f32 %v1920_v45, %v6536_v22  ;;  %v2010_v28 = vadd.f32 %v2009_v24, %v6536_v22  ;;  %v8186_v24 = vld [vmem:[%s8881_s0 + $0x200] sm:$0xff] }
 0x1e4   :  { %3594 = vmatprep.subr.mxu0 %v7580_v26  ;;  %3683 = vmatprep.subr.mxu1 %v7585_v41  ;;  %v1922_v34 = vpop.f32.mrf.mxu0  ;;  %v2011_v6 = vpop.f32.mrf.mxu1 }
 0x1e5   :  { %3595 = vmatpush1.msra.mxu0 %v7594_v55  ;;  %3684 = vmatpush1.msra.mxu1 %v7599_v39  ;;  %4557 = vst [vmem:[%s8884_s3 + $0x3c0] sm:$0xff] %v1921_v18  ;;  %4559 = vst [vmem:[%s8884_s3 + $0x3d0] sm:$0xff] %v2010_v28  ;;  %v1923_v26 = vadd.f32 %v1922_v34, %v6536_v22  ;;  %v2012_v41 = vadd.f32 %v2011_v6, %v6536_v22  ;;  %v8094_v55 = vld [vmem:[%s8881_s0 + $0x280] sm:$0xff]  ;;  %v8099_v39 = vld [vmem:[%s8881_s0 + $0x290] sm:$0xff] }
 0x1e6   :  { %3400 = vmatprep.mubr.f32.mxu0 %v8893_v58  ;;  %3489 = vmatprep.mubr.f32.mxu1 %v8893_v58  ;;  %v8191_v18 = vld [vmem:[%s8881_s0 + $0x210] sm:$0xff]  ;;  %v8206_v28 = vld [vmem:[%s8881_s0 + $0x1e8] sm:$0xff]  ;;  %v8211_v34 = vld [vmem:[%s8881_s0 + $0x1f8] sm:$0xff] }
 0x1e7   :  { %3596 = vmatprep.subr.mxu0 %v8072_v20  ;;  %3685 = vmatprep.subr.mxu1 %v8077_v42  ;;  %4558 = vst [vmem:[%s8884_s3 + $0x3c8] sm:$0xff] %v1923_v26  ;;  %4560 = vst [vmem:[%s8884_s3 + $0x3d8] sm:$0xff] %v2012_v41  ;;  %v8220_v6 = vld [vmem:[%s8881_s0 + $0x1e0] sm:$0xff]  ;;  %v8225_v26 = vld [vmem:[%s8881_s0 + $0x1f0] sm:$0xff] }
 0x1e8   :  { %4998 = vmatmul.mubr.msk.f32.gmra.mxu0 %vm94_vm0, %v7394_v27  ;;  %5002 = vmatmul.mubr.msk.f32.gmra.mxu1 %vm94_vm0, %v7394_v27  ;;  %v1926_v8 = vpop.f32.mrf.mxu0  ;;  %v2015_v10 = vpop.f32.mrf.mxu1  ;;  %v5148_v41 = vld [vmem:[%s8881_s0 + $0x378] sm:$0xff] }
 0x1e9   :  { %3597 = vmatpush1.msra.mxu0 %v8094_v55  ;;  %3686 = vmatpush1.msra.mxu1 %v8099_v39  ;;  %v1927_v53 = vadd.f32 %v1926_v8, %v6599_v37  ;;  %v2016_v27 = vadd.f32 %v2015_v10, %v6599_v37  ;;  %v5134_v8 = vld [vmem:[%s8881_s0 + $0x308] sm:$0xff] }
 0x1ea   :  { %3598 = vmatprep.subr.mxu0 %v8106_v16  ;;  %3687 = vmatprep.subr.mxu1 %v8111_v35  ;;  %v1928_v21 = vpop.f32.mrf.mxu0  ;;  %v2017_v3 = vpop.f32.mrf.mxu1 }
 0x1eb   :  { %3599 = vmatpush1.msra.mxu0 %v8126_v36  ;;  %3688 = vmatpush1.msra.mxu1 %v8131_v56  ;;  %4561 = vst [vmem:[%s8884_s3 + $0x3e0] sm:$0xff] %v1927_v53  ;;  %4563 = vst [vmem:[%s8884_s3 + $0x3f0] sm:$0xff] %v2016_v27  ;;  %v1929_v44 = vadd.f32 %v1928_v21, %v6599_v37  ;;  %v2018_v17 = vadd.f32 %v2017_v3, %v6599_v37 }
 0x1ec   :  { %3406 = vmatprep.mubr.f32.mxu0 %v8893_v58  ;;  %3495 = vmatprep.mubr.f32.mxu1 %v8893_v58 }
 0x1ed   :  { %3600 = vmatprep.subr.mxu0 %v7866_v1  ;;  %3689 = vmatprep.subr.mxu1 %v7871_v51  ;;  %4562 = vst [vmem:[%s8884_s3 + $0x3e8] sm:$0xff] %v1929_v44  ;;  %4564 = vst [vmem:[%s8884_s3 + $0x3f8] sm:$0xff] %v2018_v17  ;;  %v8332_v17 = vld [vmem:[%s8882_s1 + $0x8] sm:$0xff] }
 0x1ee   :  { %4999 = vmatmul.mubr.msk.f32.gmra.mxu0 %vm94_vm0, %v7459_v47  ;;  %5003 = vmatmul.mubr.msk.f32.gmra.mxu1 %vm94_vm0, %v7459_v47 }
 0x1ef   :  { %3601 = vmatpush1.msra.mxu0 %v7886_v13  ;;  %3690 = vmatpush1.msra.mxu1 %v7891_v33  ;;  %v2156_v59 = vpop.f32.mrf.mxu0  ;;  %v2245_v2 = vpop.f32.mrf.mxu1 }
 0x1f0   :  { %3602 = vmatprep.subr.mxu0 %v7646_v46  ;;  %3691 = vmatprep.subr.mxu1 %v7651_v14  ;;  %v2157_v47 = vadd.f32 %v2156_v59, %v6399_v50  ;;  %v2246_v45 = vadd.f32 %v2245_v2, %v6399_v50 }
 0x1f1   :  { %3603 = vmatpush1.msra.mxu0 %v7666_v11  ;;  %3692 = vmatpush1.msra.mxu1 %v7671_v23  ;;  %v2158_v46 = vpop.f32.mrf.mxu0  ;;  %v2247_v14 = vpop.f32.mrf.mxu1 }
 0x1f2   :  { %3412 = vmatprep.mubr.f32.mxu0 %v8893_v58  ;;  %3501 = vmatprep.mubr.f32.mxu1 %v8893_v58  ;;  %4625 = vst [vmem:[%s8884_s3 + $0x400] sm:$0xff] %v2157_v47  ;;  %4627 = vst [vmem:[%s8884_s3 + $0x410] sm:$0xff] %v2246_v45  ;;  %v2159_v11 = vadd.f32 %v2158_v46, %v6399_v50  ;;  %v2248_v23 = vadd.f32 %v2247_v14, %v6399_v50 }
 0x1f3   :  { %3604 = vmatprep.subr.mxu0 %v8170_v12  ;;  %3693 = vmatprep.subr.mxu1 %v8175_v63 }
 0x1f4   :  { %5000 = vmatmul.mubr.msk.f32.gmra.mxu0 %vm94_vm0, %v7498_v5  ;;  %5004 = vmatmul.mubr.msk.f32.gmra.mxu1 %vm94_vm0, %v7498_v5  ;;  %4626 = vst [vmem:[%s8884_s3 + $0x408] sm:$0xff] %v2159_v11  ;;  %4628 = vst [vmem:[%s8884_s3 + $0x418] sm:$0xff] %v2248_v23  ;;  %v5146_v5 = vld [vmem:[%s8881_s0 + $0x368] sm:$0xff]  ;;  %v5187_v23 = vld [vmem:[%s8882_s1 + $0x18] sm:$0xff] }
 0x1f5   :  { %3605 = vmatpush1.msra.mxu0 %v8186_v24  ;;  %3694 = vmatpush1.msra.mxu1 %v8191_v18 }
 0x1f6   :  { %3606 = vmatprep.subr.mxu0 %v8206_v28  ;;  %3695 = vmatprep.subr.mxu1 %v8211_v34 }
 0x1f7   :  { %3607 = vmatpush1.msra.mxu0 %v8220_v6  ;;  %3696 = vmatpush1.msra.mxu1 %v8225_v26 }
 0x1f8   :  { %3608 = vmatprep.subr.mxu0 %v7946_v30  ;;  %3697 = vmatprep.subr.mxu1 %v7951_v40  ;;  %v5145_v30 = vld [vmem:[%s8881_s0 + $0x360] sm:$0xff]  ;;  %v5147_v40 = vld [vmem:[%s8881_s0 + $0x370] sm:$0xff] }
 0x1f9   :  { %3609 = vmatpush1.msra.mxu0 %v7960_v60  ;;  %3642 = vmatprep.mubr.f32.mxu0 %v8893_v58 }
 0x1fa   :  { %3698 = vmatpush1.msra.mxu1 %v7965_v9  ;;  %3731 = vmatprep.mubr.f32.mxu1 %v8893_v58 }
 0x1fb   :  { %5073 = vmatmul.mubr.msk.f32.vlgmr.msra.gmra.mxu0 %vm94_vm0, %v7563_v43  ;;  %5077 = vmatmul.mubr.msk.f32.vlgmr.msra.gmra.mxu1 %vm94_vm0, %v7563_v43  ;;  %v5136_v43 = vld [vmem:[%s8881_s0 + $0x318] sm:$0xff] }
 0x1fc   :  { %3832 = vmatprep.subr.mxu0 %v5146_v5  ;;  %3921 = vmatprep.subr.mxu1 %v5148_v41 }
 0x1fd   :  { %3833 = vmatpush1.msra.mxu0 %v5145_v30  ;;  %3922 = vmatpush1.msra.mxu1 %v5147_v40 }
 0x1fe   :  { %3834 = vmatprep.subr.mxu0 %v7986_v57  ;;  %3923 = vmatprep.subr.mxu1 %v7991_v0  ;;  %v2162_v60 = vpop.f32.mrf.mxu0  ;;  %v2251_v9 = vpop.f32.mrf.mxu1  ;;  %v5133_v0 = vld [vmem:[%s8881_s0 + $0x300] sm:$0xff] }
 0x1ff   :  { %3835 = vmatpush1.msra.mxu0 %v7998_v32  ;;  %3924 = vmatpush1.msra.mxu1 %v8003_v4  ;;  %v2163_v10 = vadd.f32 %v2162_v60, %v6497_v15  ;;  %v2252_v57 = vadd.f32 %v2251_v9, %v6497_v15  ;;  %v5135_v32 = vld [vmem:[%s8881_s0 + $0x310] sm:$0xff] }
 0x200   :  { %3836 = vmatprep.subr.mxu0 %v7766_v48  ;;  %3925 = vmatprep.subr.mxu1 %v7771_v49  ;;  %v2164_v4 = vpop.f32.mrf.mxu0  ;;  %v2253_v53 = vpop.f32.mrf.mxu1 }
 0x201   :  { %3837 = vmatpush1.msra.mxu0 %v7778_v25  ;;  %3926 = vmatpush1.msra.mxu1 %v7783_v62  ;;  %4629 = vst [vmem:[%s8884_s3 + $0x420] sm:$0xff] %v2163_v10  ;;  %4631 = vst [vmem:[%s8884_s3 + $0x430] sm:$0xff] %v2252_v57  ;;  %v2165_v48 = vadd.f32 %v2164_v4, %v6497_v15  ;;  %v2254_v49 = vadd.f32 %v2253_v53, %v6497_v15 }
 0x202   :  { %3838 = vmatprep.subr.mxu0 %v5134_v8  ;;  %3927 = vmatprep.subr.mxu1 %v5136_v43 }
 0x203   :  { %3839 = vmatpush1.msra.mxu0 %v5133_v0  ;;  %3928 = vmatpush1.msra.mxu1 %v5135_v32  ;;  %4630 = vst [vmem:[%s8884_s3 + $0x428] sm:$0xff] %v2165_v48  ;;  %4632 = vst [vmem:[%s8884_s3 + $0x438] sm:$0xff] %v2254_v49 }
 0x204   :  { %3840 = vmatprep.subr.mxu0 %v8020_v38  ;;  %3929 = vmatprep.subr.mxu1 %v8025_v7  ;;  %v2168_v25 = vpop.f32.mrf.mxu0  ;;  %v2257_v62 = vpop.f32.mrf.mxu1  ;;  %v5122_v38 = vld [vmem:[%s8881_s0 + $0x2a8] sm:$0xff]  ;;  %v5124_v7 = vld [vmem:[%s8881_s0 + $0x2b8] sm:$0xff] }
 0x205   :  { %3841 = vmatpush1.msra.mxu0 %v8034_v31  ;;  %3930 = vmatpush1.msra.mxu1 %v8039_v54  ;;  %v2169_v27 = vadd.f32 %v2168_v25, %v6536_v22  ;;  %v2258_v21 = vadd.f32 %v2257_v62, %v6536_v22  ;;  %v5121_v31 = vld [vmem:[%s8881_s0 + $0x2a0] sm:$0xff]  ;;  %v5123_v54 = vld [vmem:[%s8881_s0 + $0x2b0] sm:$0xff] }
 0x206   :  { %3842 = vmatprep.subr.mxu0 %v7800_v52  ;;  %3931 = vmatprep.subr.mxu1 %v7805_v61  ;;  %v2170_v3 = vpop.f32.mrf.mxu0  ;;  %v2259_v44 = vpop.f32.mrf.mxu1 }
 0x207   :  { %3648 = vmatprep.mubr.f32.mxu0 %v8893_v58  ;;  %3737 = vmatprep.mubr.f32.mxu1 %v8893_v58  ;;  %4633 = vst [vmem:[%s8884_s3 + $0x440] sm:$0xff] %v2169_v27  ;;  %4635 = vst [vmem:[%s8884_s3 + $0x450] sm:$0xff] %v2258_v21  ;;  %v2171_v52 = vadd.f32 %v2170_v3, %v6536_v22  ;;  %v2260_v61 = vadd.f32 %v2259_v44, %v6536_v22 }
 0x208   :  { %3843 = vmatpush1.msra.mxu0 %v7814_v29  ;;  %3932 = vmatpush1.msra.mxu1 %v7819_v19 }
 0x209   :  { %5074 = vmatmul.mubr.msk.f32.gmra.mxu0 %vm94_vm0, %v8332_v17  ;;  %5078 = vmatmul.mubr.msk.f32.gmra.mxu1 %vm94_vm0, %v8332_v17  ;;  %4634 = vst [vmem:[%s8884_s3 + $0x448] sm:$0xff] %v2171_v52  ;;  %4636 = vst [vmem:[%s8884_s3 + $0x458] sm:$0xff] %v2260_v61 }
 0x20a   :  { %3844 = vmatprep.subr.mxu0 %v5122_v38  ;;  %3933 = vmatprep.subr.mxu1 %v5124_v7  ;;  %v2174_v29 = vpop.f32.mrf.mxu0  ;;  %v2263_v19 = vpop.f32.mrf.mxu1 }
 0x20b   :  { %3845 = vmatpush1.msra.mxu0 %v5121_v31  ;;  %3934 = vmatpush1.msra.mxu1 %v5123_v54  ;;  %v2175_v59 = vadd.f32 %v2174_v29, %v6599_v37  ;;  %v2264_v2 = vadd.f32 %v2263_v19, %v6599_v37 }
 0x20c   :  { %3846 = vmatprep.subr.mxu0 %v8072_v20  ;;  %3935 = vmatprep.subr.mxu1 %v8077_v42  ;;  %v2176_v47 = vpop.f32.mrf.mxu0  ;;  %v2265_v45 = vpop.f32.mrf.mxu1  ;;  %v8363_v42 = vld [vmem:[%s8882_s1 + $0x10] sm:$0xff] }
 0x20d   :  { %3654 = vmatprep.mubr.f32.mxu0 %v8893_v58  ;;  %3743 = vmatprep.mubr.f32.mxu1 %v8893_v58  ;;  %4637 = vst [vmem:[%s8884_s3 + $0x460] sm:$0xff] %v2175_v59  ;;  %4639 = vst [vmem:[%s8884_s3 + $0x470] sm:$0xff] %v2264_v2  ;;  %v2177_v46 = vadd.f32 %v2176_v47, %v6599_v37  ;;  %v2266_v20 = vadd.f32 %v2265_v45, %v6599_v37 }
 0x20e   :  { %3847 = vmatpush1.msra.mxu0 %v8094_v55  ;;  %3936 = vmatpush1.msra.mxu1 %v8099_v39 }
 0x20f   :  { %5075 = vmatmul.mubr.msk.f32.gmra.mxu0 %vm94_vm0, %v8363_v42  ;;  %5079 = vmatmul.mubr.msk.f32.gmra.mxu1 %vm94_vm0, %v8363_v42  ;;  %4638 = vst [vmem:[%s8884_s3 + $0x468] sm:$0xff] %v2177_v46  ;;  %4640 = vst [vmem:[%s8884_s3 + $0x478] sm:$0xff] %v2266_v20 }
 0x210   :  { %3848 = vmatprep.subr.mxu0 %v8106_v16  ;;  %3937 = vmatprep.subr.mxu1 %v8111_v35  ;;  %v5106_v16 = vld [vmem:[%s8881_s0 + $0x228] sm:$0xff]  ;;  %v5108_v35 = vld [vmem:[%s8881_s0 + $0x238] sm:$0xff] }
 0x211   :  { %3849 = vmatpush1.msra.mxu0 %v8126_v36  ;;  %3938 = vmatpush1.msra.mxu1 %v8131_v56  ;;  %v2404_v55 = vpop.f32.mrf.mxu0  ;;  %v2493_v39 = vpop.f32.mrf.mxu1  ;;  %v5107_v56 = vld [vmem:[%s8881_s0 + $0x230] sm:$0xff] }
 0x212   :  { %3850 = vmatprep.subr.mxu0 %v7866_v1  ;;  %3939 = vmatprep.subr.mxu1 %v7871_v51  ;;  %v2405_v14 = vadd.f32 %v2404_v55, %v6399_v50  ;;  %v2494_v11 = vadd.f32 %v2493_v39, %v6399_v50  ;;  %v5105_v51 = vld [vmem:[%s8881_s0 + $0x220] sm:$0xff] }
 0x213   :  { %3660 = vmatprep.mubr.f32.mxu0 %v8893_v58  ;;  %3749 = vmatprep.mubr.f32.mxu1 %v8893_v58  ;;  %v2406_v36 = vpop.f32.mrf.mxu0  ;;  %v2495_v1 = vpop.f32.mrf.mxu1 }
 0x214   :  { %3851 = vmatpush1.msra.mxu0 %v7886_v13  ;;  %3940 = vmatpush1.msra.mxu1 %v7891_v33  ;;  %4701 = vst [vmem:[%s8884_s3 + $0x480] sm:$0xff] %v2405_v14  ;;  %4703 = vst [vmem:[%s8884_s3 + $0x490] sm:$0xff] %v2494_v11  ;;  %v2407_v13 = vadd.f32 %v2406_v36, %v6399_v50  ;;  %v2496_v33 = vadd.f32 %v2495_v1, %v6399_v50 }
 0x215   :  { %5076 = vmatmul.mubr.msk.f32.gmra.mxu0 %vm94_vm0, %v5187_v23  ;;  %5080 = vmatmul.mubr.msk.f32.gmra.mxu1 %vm94_vm0, %v5187_v23 }
 0x216   :  { %3852 = vmatprep.subr.mxu0 %v5106_v16  ;;  %3941 = vmatprep.subr.mxu1 %v5108_v35  ;;  %4702 = vst [vmem:[%s8884_s3 + $0x488] sm:$0xff] %v2407_v13  ;;  %4704 = vst [vmem:[%s8884_s3 + $0x498] sm:$0xff] %v2496_v33 }
 0x217   :  { %3853 = vmatpush1.msra.mxu0 %v5105_v51  ;;  %3942 = vmatpush1.msra.mxu1 %v5107_v56 }
 0x218   :  { %3854 = vmatprep.subr.mxu0 %v8170_v12  ;;  %3943 = vmatprep.subr.mxu1 %v8175_v63  ;;  %v5188_v12 = vld [vmem:[%s8882_s1] sm:$0xff] }
 0x219   :  { %3855 = vmatpush1.msra.mxu0 %v8186_v24  ;;  %3944 = vmatpush1.msra.mxu1 %v8191_v18 }
 0x21a   :  { %3856 = vmatprep.subr.mxu0 %v8206_v28  ;;  %3945 = vmatprep.subr.mxu1 %v8211_v34 }
 0x21b   :  { %3857 = vmatpush1.msra.mxu0 %v8220_v6  ;;  %3890 = vmatprep.mubr.f32.mxu0 %v8893_v58 }
 0x21c   :  { %3946 = vmatpush1.msra.mxu1 %v8225_v26  ;;  %3979 = vmatprep.mubr.f32.mxu1 %v8893_v58 }
 0x21d   :  { %5149 = vmatmul.mubr.msk.f32.vlgmr.msra.gmra.mxu0 %vm94_vm0, %v5188_v12  ;;  %5153 = vmatmul.mubr.msk.f32.vlgmr.msra.gmra.mxu1 %vm94_vm0, %v5188_v12 }
 0x21e   :  { %3896 = vmatprep.mubr.f32.mxu0 %v8893_v58  ;;  %3985 = vmatprep.mubr.f32.mxu1 %v8893_v58 }
 0x220   :  { %v2410_v63 = vpop.f32.mrf.mxu0  ;;  %v2499_v24 = vpop.f32.mrf.mxu1 }
 0x221   :  { %5150 = vmatmul.mubr.msk.f32.gmra.mxu0 %vm94_vm0, %v8332_v17  ;;  %5154 = vmatmul.mubr.msk.f32.gmra.mxu1 %vm94_vm0, %v8332_v17  ;;  %v2411_v18 = vadd.f32 %v2410_v63, %v6497_v15  ;;  %v2500_v28 = vadd.f32 %v2499_v24, %v6497_v15 }
 0x222   :  { %3902 = vmatprep.mubr.f32.mxu0 %v8893_v58  ;;  %3991 = vmatprep.mubr.f32.mxu1 %v8893_v58  ;;  %v2412_v34 = vpop.f32.mrf.mxu0  ;;  %v2501_v6 = vpop.f32.mrf.mxu1 }
 0x223   :  { %4705 = vst [vmem:[%s8884_s3 + $0x4a0] sm:$0xff] %v2411_v18  ;;  %4707 = vst [vmem:[%s8884_s3 + $0x4b0] sm:$0xff] %v2500_v28  ;;  %v2413_v26 = vadd.f32 %v2412_v34, %v6497_v15  ;;  %v2502_v5 = vadd.f32 %v2501_v6, %v6497_v15 }
 0x225   :  { %5151 = vmatmul.mubr.msk.f32.gmra.mxu0 %vm94_vm0, %v8363_v42  ;;  %5155 = vmatmul.mubr.msk.f32.gmra.mxu1 %vm94_vm0, %v8363_v42  ;;  %4706 = vst [vmem:[%s8884_s3 + $0x4a8] sm:$0xff] %v2413_v26  ;;  %4708 = vst [vmem:[%s8884_s3 + $0x4b8] sm:$0xff] %v2502_v5 }
 0x226   :  { %3908 = vmatprep.mubr.f32.mxu0 %v8893_v58  ;;  %3997 = vmatprep.mubr.f32.mxu1 %v8893_v58  ;;  %v2416_v41 = vpop.f32.mrf.mxu0  ;;  %v2505_v30 = vpop.f32.mrf.mxu1 }
 0x227   :  { %v2417_v40 = vadd.f32 %v2416_v41, %v6536_v22  ;;  %v2506_v60 = vadd.f32 %v2505_v30, %v6536_v22 }
 0x228   :  { %v2418_v9 = vpop.f32.mrf.mxu0  ;;  %v2507_v8 = vpop.f32.mrf.mxu1 }
 0x229   :  { %5152 = vmatmul.mubr.msk.f32.gmra.mxu0 %vm94_vm0, %v5187_v23  ;;  %5156 = vmatmul.mubr.msk.f32.gmra.mxu1 %vm94_vm0, %v5187_v23  ;;  %4709 = vst [vmem:[%s8884_s3 + $0x4c0] sm:$0xff] %v2417_v40  ;;  %4711 = vst [vmem:[%s8884_s3 + $0x4d0] sm:$0xff] %v2506_v60  ;;  %v2419_v58 = vadd.f32 %v2418_v9, %v6536_v22  ;;  %v2508_v43 = vadd.f32 %v2507_v8, %v6536_v22 }
 0x22b   :  { %4710 = vst [vmem:[%s8884_s3 + $0x4c8] sm:$0xff] %v2419_v58  ;;  %4712 = vst [vmem:[%s8884_s3 + $0x4d8] sm:$0xff] %v2508_v43 }
 0x22c   :  { %v2422_v10 = vpop.f32.mrf.mxu0  ;;  %v2511_v57 = vpop.f32.mrf.mxu1 }
 0x22d   :  { %v2423_v0 = vadd.f32 %v2422_v10, %v6599_v37  ;;  %v2512_v32 = vadd.f32 %v2511_v57, %v6599_v37 }
 0x22e   :  { %v2424_v4 = vpop.f32.mrf.mxu0  ;;  %v2513_v53 = vpop.f32.mrf.mxu1 }
 0x22f   :  { %4713 = vst [vmem:[%s8884_s3 + $0x4e0] sm:$0xff] %v2423_v0  ;;  %4715 = vst [vmem:[%s8884_s3 + $0x4f0] sm:$0xff] %v2512_v32  ;;  %v2425_v48 = vadd.f32 %v2424_v4, %v6599_v37  ;;  %v2514_v49 = vadd.f32 %v2513_v53, %v6599_v37 }
 0x231   :  { %4714 = vst [vmem:[%s8884_s3 + $0x4e8] sm:$0xff] %v2425_v48  ;;  %4716 = vst [vmem:[%s8884_s3 + $0x4f8] sm:$0xff] %v2514_v49 }
 0x233   :  { %v2652_v25 = vpop.f32.mrf.mxu0  ;;  %v2741_v62 = vpop.f32.mrf.mxu1 }
 0x234   :  { %v2653_v27 = vadd.f32 %v2652_v25, %v6399_v50  ;;  %v2742_v21 = vadd.f32 %v2741_v62, %v6399_v50 }
 0x235   :  { %v2654_v3 = vpop.f32.mrf.mxu0  ;;  %v2743_v44 = vpop.f32.mrf.mxu1 }
 0x236   :  { %4777 = vst [vmem:[%s8884_s3 + $0x500] sm:$0xff] %v2653_v27  ;;  %4779 = vst [vmem:[%s8884_s3 + $0x510] sm:$0xff] %v2742_v21  ;;  %v2655_v38 = vadd.f32 %v2654_v3, %v6399_v50  ;;  %v2744_v7 = vadd.f32 %v2743_v44, %v6399_v50 }
 0x238   :  { %4778 = vst [vmem:[%s8884_s3 + $0x508] sm:$0xff] %v2655_v38  ;;  %4780 = vst [vmem:[%s8884_s3 + $0x518] sm:$0xff] %v2744_v7 }
 0x242   :  { %v2658_v52 = vpop.f32.mrf.mxu0  ;;  %v2747_v61 = vpop.f32.mrf.mxu1 }
 0x243   :  { %v2659_v31 = vadd.f32 %v2658_v52, %v6497_v15  ;;  %v2748_v54 = vadd.f32 %v2747_v61, %v6497_v15 }
 0x244   :  { %v2660_v17 = vpop.f32.mrf.mxu0  ;;  %v2749_v29 = vpop.f32.mrf.mxu1 }
 0x245   :  { %4781 = vst [vmem:[%s8884_s3 + $0x520] sm:$0xff] %v2659_v31  ;;  %4783 = vst [vmem:[%s8884_s3 + $0x530] sm:$0xff] %v2748_v54  ;;  %v2661_v19 = vadd.f32 %v2660_v17, %v6497_v15  ;;  %v2750_v59 = vadd.f32 %v2749_v29, %v6497_v15 }
 0x247   :  { %4782 = vst [vmem:[%s8884_s3 + $0x528] sm:$0xff] %v2661_v19  ;;  %4784 = vst [vmem:[%s8884_s3 + $0x538] sm:$0xff] %v2750_v59 }
 0x248   :  { %v2664_v2 = vpop.f32.mrf.mxu0  ;;  %v2753_v47 = vpop.f32.mrf.mxu1 }
 0x249   :  { %v2665_v45 = vadd.f32 %v2664_v2, %v6536_v22  ;;  %v2754_v46 = vadd.f32 %v2753_v47, %v6536_v22 }
 0x24a   :  { %v2666_v20 = vpop.f32.mrf.mxu0  ;;  %v2755_v42 = vpop.f32.mrf.mxu1 }
 0x24b   :  { %4785 = vst [vmem:[%s8884_s3 + $0x540] sm:$0xff] %v2665_v45  ;;  %4787 = vst [vmem:[%s8884_s3 + $0x550] sm:$0xff] %v2754_v46  ;;  %v2667_v55 = vadd.f32 %v2666_v20, %v6536_v22  ;;  %v2756_v39 = vadd.f32 %v2755_v42, %v6536_v22 }
 0x24d   :  { %4786 = vst [vmem:[%s8884_s3 + $0x548] sm:$0xff] %v2667_v55  ;;  %4788 = vst [vmem:[%s8884_s3 + $0x558] sm:$0xff] %v2756_v39 }
 0x24e   :  { %v2670_v14 = vpop.f32.mrf.mxu0  ;;  %v2759_v11 = vpop.f32.mrf.mxu1 }
 0x24f   :  { %v2671_v16 = vadd.f32 %v2670_v14, %v6599_v37  ;;  %v2760_v35 = vadd.f32 %v2759_v11, %v6599_v37 }
 0x250   :  { %v2672_v36 = vpop.f32.mrf.mxu0  ;;  %v2761_v1 = vpop.f32.mrf.mxu1 }
 0x251   :  { %4789 = vst [vmem:[%s8884_s3 + $0x560] sm:$0xff] %v2671_v16  ;;  %4791 = vst [vmem:[%s8884_s3 + $0x570] sm:$0xff] %v2760_v35  ;;  %v2673_v51 = vadd.f32 %v2672_v36, %v6599_v37  ;;  %v2762_v56 = vadd.f32 %v2761_v1, %v6599_v37 }
 0x253   :  { %4790 = vst [vmem:[%s8884_s3 + $0x568] sm:$0xff] %v2673_v51  ;;  %4792 = vst [vmem:[%s8884_s3 + $0x578] sm:$0xff] %v2762_v56 }
 0x255   :  { %v2900_v13 = vpop.f32.mrf.mxu0  ;;  %v2989_v33 = vpop.f32.mrf.mxu1 }
 0x256   :  { %v2901_v23 = vadd.f32 %v2900_v13, %v6399_v50  ;;  %v2990_v12 = vadd.f32 %v2989_v33, %v6399_v50 }
 0x257   :  { %v2902_v63 = vpop.f32.mrf.mxu0  ;;  %v2991_v24 = vpop.f32.mrf.mxu1 }
 0x258   :  { %4853 = vst [vmem:[%s8884_s3 + $0x580] sm:$0xff] %v2901_v23  ;;  %4855 = vst [vmem:[%s8884_s3 + $0x590] sm:$0xff] %v2990_v12  ;;  %v2903_v18 = vadd.f32 %v2902_v63, %v6399_v50  ;;  %v2992_v28 = vadd.f32 %v2991_v24, %v6399_v50 }
 0x25a   :  { %4854 = vst [vmem:[%s8884_s3 + $0x588] sm:$0xff] %v2903_v18  ;;  %4856 = vst [vmem:[%s8884_s3 + $0x598] sm:$0xff] %v2992_v28 }
 0x264   :  { %v2906_v34 = vpop.f32.mrf.mxu0  ;;  %v2995_v6 = vpop.f32.mrf.mxu1 }
 0x265   :  { %v2907_v26 = vadd.f32 %v2906_v34, %v6497_v15  ;;  %v2996_v5 = vadd.f32 %v2995_v6, %v6497_v15 }
 0x266   :  { %v2908_v41 = vpop.f32.mrf.mxu0  ;;  %v2997_v30 = vpop.f32.mrf.mxu1 }
 0x267   :  { %4857 = vst [vmem:[%s8884_s3 + $0x5a0] sm:$0xff] %v2907_v26  ;;  %4859 = vst [vmem:[%s8884_s3 + $0x5b0] sm:$0xff] %v2996_v5  ;;  %v2909_v40 = vadd.f32 %v2908_v41, %v6497_v15  ;;  %v2998_v60 = vadd.f32 %v2997_v30, %v6497_v15 }
 0x269   :  { %4858 = vst [vmem:[%s8884_s3 + $0x5a8] sm:$0xff] %v2909_v40  ;;  %4860 = vst [vmem:[%s8884_s3 + $0x5b8] sm:$0xff] %v2998_v60 }
 0x26a   :  { %v2912_v9 = vpop.f32.mrf.mxu0  ;;  %v3001_v8 = vpop.f32.mrf.mxu1 }
 0x26b   :  { %v2913_v58 = vadd.f32 %v2912_v9, %v6536_v22  ;;  %v3002_v43 = vadd.f32 %v3001_v8, %v6536_v22 }
 0x26c   :  { %v2914_v10 = vpop.f32.mrf.mxu0  ;;  %v3003_v57 = vpop.f32.mrf.mxu1 }
 0x26d   :  { %4861 = vst [vmem:[%s8884_s3 + $0x5c0] sm:$0xff] %v2913_v58  ;;  %4863 = vst [vmem:[%s8884_s3 + $0x5d0] sm:$0xff] %v3002_v43  ;;  %v2915_v0 = vadd.f32 %v2914_v10, %v6536_v22  ;;  %v3004_v32 = vadd.f32 %v3003_v57, %v6536_v22 }
 0x26f   :  { %4862 = vst [vmem:[%s8884_s3 + $0x5c8] sm:$0xff] %v2915_v0  ;;  %4864 = vst [vmem:[%s8884_s3 + $0x5d8] sm:$0xff] %v3004_v32 }
 0x270   :  { %v2918_v4 = vpop.f32.mrf.mxu0  ;;  %v3007_v53 = vpop.f32.mrf.mxu1 }
 0x271   :  { %v2919_v48 = vadd.f32 %v2918_v4, %v6599_v37  ;;  %v3008_v49 = vadd.f32 %v3007_v53, %v6599_v37 }
 0x272   :  { %v2920_v25 = vpop.f32.mrf.mxu0  ;;  %v3009_v62 = vpop.f32.mrf.mxu1 }
 0x273   :  { %4865 = vst [vmem:[%s8884_s3 + $0x5e0] sm:$0xff] %v2919_v48  ;;  %4867 = vst [vmem:[%s8884_s3 + $0x5f0] sm:$0xff] %v3008_v49  ;;  %v2921_v27 = vadd.f32 %v2920_v25, %v6599_v37  ;;  %v3010_v21 = vadd.f32 %v3009_v62, %v6599_v37 }
 0x275   :  { %4866 = vst [vmem:[%s8884_s3 + $0x5e8] sm:$0xff] %v2921_v27  ;;  %4868 = vst [vmem:[%s8884_s3 + $0x5f8] sm:$0xff] %v3010_v21 }
 0x277   :  { %v3148_v3 = vpop.f32.mrf.mxu0  ;;  %v3237_v44 = vpop.f32.mrf.mxu1 }
 0x278   :  { %v3149_v38 = vadd.f32 %v3148_v3, %v6399_v50  ;;  %v3238_v7 = vadd.f32 %v3237_v44, %v6399_v50 }
 0x279   :  { %v3150_v52 = vpop.f32.mrf.mxu0  ;;  %v3239_v61 = vpop.f32.mrf.mxu1 }
 0x27a   :  { %4929 = vst [vmem:[%s8884_s3 + $0x600] sm:$0xff] %v3149_v38  ;;  %4931 = vst [vmem:[%s8884_s3 + $0x610] sm:$0xff] %v3238_v7  ;;  %v3151_v31 = vadd.f32 %v3150_v52, %v6399_v50  ;;  %v3240_v54 = vadd.f32 %v3239_v61, %v6399_v50 }
 0x27c   :  { %4930 = vst [vmem:[%s8884_s3 + $0x608] sm:$0xff] %v3151_v31  ;;  %4932 = vst [vmem:[%s8884_s3 + $0x618] sm:$0xff] %v3240_v54 }
 0x286   :  { %v3154_v17 = vpop.f32.mrf.mxu0  ;;  %v3243_v29 = vpop.f32.mrf.mxu1 }
 0x287   :  { %v3155_v19 = vadd.f32 %v3154_v17, %v6497_v15  ;;  %v3244_v59 = vadd.f32 %v3243_v29, %v6497_v15 }
 0x288   :  { %v3156_v2 = vpop.f32.mrf.mxu0  ;;  %v3245_v47 = vpop.f32.mrf.mxu1 }
 0x289   :  { %4933 = vst [vmem:[%s8884_s3 + $0x620] sm:$0xff] %v3155_v19  ;;  %4935 = vst [vmem:[%s8884_s3 + $0x630] sm:$0xff] %v3244_v59  ;;  %v3157_v45 = vadd.f32 %v3156_v2, %v6497_v15  ;;  %v3246_v46 = vadd.f32 %v3245_v47, %v6497_v15 }
 0x28b   :  { %4934 = vst [vmem:[%s8884_s3 + $0x628] sm:$0xff] %v3157_v45  ;;  %4936 = vst [vmem:[%s8884_s3 + $0x638] sm:$0xff] %v3246_v46 }
 0x28c   :  { %v3160_v20 = vpop.f32.mrf.mxu0  ;;  %v3249_v42 = vpop.f32.mrf.mxu1 }
 0x28d   :  { %v3161_v55 = vadd.f32 %v3160_v20, %v6536_v22  ;;  %v3250_v39 = vadd.f32 %v3249_v42, %v6536_v22 }
 0x28e   :  { %v3162_v14 = vpop.f32.mrf.mxu0  ;;  %v3251_v11 = vpop.f32.mrf.mxu1 }
 0x28f   :  { %4937 = vst [vmem:[%s8884_s3 + $0x640] sm:$0xff] %v3161_v55  ;;  %4939 = vst [vmem:[%s8884_s3 + $0x650] sm:$0xff] %v3250_v39  ;;  %v3163_v16 = vadd.f32 %v3162_v14, %v6536_v22  ;;  %v3252_v35 = vadd.f32 %v3251_v11, %v6536_v22 }
 0x291   :  { %4938 = vst [vmem:[%s8884_s3 + $0x648] sm:$0xff] %v3163_v16  ;;  %4940 = vst [vmem:[%s8884_s3 + $0x658] sm:$0xff] %v3252_v35 }
 0x292   :  { %v3166_v36 = vpop.f32.mrf.mxu0  ;;  %v3255_v1 = vpop.f32.mrf.mxu1 }
 0x293   :  { %v3167_v51 = vadd.f32 %v3166_v36, %v6599_v37  ;;  %v3256_v56 = vadd.f32 %v3255_v1, %v6599_v37 }
 0x294   :  { %v3168_v13 = vpop.f32.mrf.mxu0  ;;  %v3257_v33 = vpop.f32.mrf.mxu1 }
 0x295   :  { %4941 = vst [vmem:[%s8884_s3 + $0x660] sm:$0xff] %v3167_v51  ;;  %4943 = vst [vmem:[%s8884_s3 + $0x670] sm:$0xff] %v3256_v56  ;;  %v3169_v23 = vadd.f32 %v3168_v13, %v6599_v37  ;;  %v3258_v12 = vadd.f32 %v3257_v33, %v6599_v37 }
 0x297   :  { %4942 = vst [vmem:[%s8884_s3 + $0x668] sm:$0xff] %v3169_v23  ;;  %4944 = vst [vmem:[%s8884_s3 + $0x678] sm:$0xff] %v3258_v12 }
 0x299   :  { %v3396_v63 = vpop.f32.mrf.mxu0  ;;  %v3485_v24 = vpop.f32.mrf.mxu1 }
 0x29a   :  { %v3397_v18 = vadd.f32 %v3396_v63, %v6399_v50  ;;  %v3486_v28 = vadd.f32 %v3485_v24, %v6399_v50 }
 0x29b   :  { %v3398_v34 = vpop.f32.mrf.mxu0  ;;  %v3487_v6 = vpop.f32.mrf.mxu1 }
 0x29c   :  { %5005 = vst [vmem:[%s8884_s3 + $0x680] sm:$0xff] %v3397_v18  ;;  %5007 = vst [vmem:[%s8884_s3 + $0x690] sm:$0xff] %v3486_v28  ;;  %v3399_v26 = vadd.f32 %v3398_v34, %v6399_v50  ;;  %v3488_v5 = vadd.f32 %v3487_v6, %v6399_v50 }
 0x29e   :  { %5006 = vst [vmem:[%s8884_s3 + $0x688] sm:$0xff] %v3399_v26  ;;  %5008 = vst [vmem:[%s8884_s3 + $0x698] sm:$0xff] %v3488_v5 }
 0x2a8   :  { %v3402_v41 = vpop.f32.mrf.mxu0  ;;  %v3491_v30 = vpop.f32.mrf.mxu1 }
 0x2a9   :  { %v3403_v40 = vadd.f32 %v3402_v41, %v6497_v15  ;;  %v3492_v60 = vadd.f32 %v3491_v30, %v6497_v15 }
 0x2aa   :  { %v3404_v9 = vpop.f32.mrf.mxu0  ;;  %v3493_v8 = vpop.f32.mrf.mxu1 }
 0x2ab   :  { %5009 = vst [vmem:[%s8884_s3 + $0x6a0] sm:$0xff] %v3403_v40  ;;  %5011 = vst [vmem:[%s8884_s3 + $0x6b0] sm:$0xff] %v3492_v60  ;;  %v3405_v58 = vadd.f32 %v3404_v9, %v6497_v15  ;;  %v3494_v43 = vadd.f32 %v3493_v8, %v6497_v15 }
 0x2ad   :  { %5010 = vst [vmem:[%s8884_s3 + $0x6a8] sm:$0xff] %v3405_v58  ;;  %5012 = vst [vmem:[%s8884_s3 + $0x6b8] sm:$0xff] %v3494_v43 }
 0x2ae   :  { %v3408_v10 = vpop.f32.mrf.mxu0  ;;  %v3497_v57 = vpop.f32.mrf.mxu1 }
 0x2af   :  { %v3409_v0 = vadd.f32 %v3408_v10, %v6536_v22  ;;  %v3498_v32 = vadd.f32 %v3497_v57, %v6536_v22 }
 0x2b0   :  { %v3410_v4 = vpop.f32.mrf.mxu0  ;;  %v3499_v53 = vpop.f32.mrf.mxu1 }
 0x2b1   :  { %5013 = vst [vmem:[%s8884_s3 + $0x6c0] sm:$0xff] %v3409_v0  ;;  %5015 = vst [vmem:[%s8884_s3 + $0x6d0] sm:$0xff] %v3498_v32  ;;  %v3411_v48 = vadd.f32 %v3410_v4, %v6536_v22  ;;  %v3500_v49 = vadd.f32 %v3499_v53, %v6536_v22 }
 0x2b3   :  { %5014 = vst [vmem:[%s8884_s3 + $0x6c8] sm:$0xff] %v3411_v48  ;;  %5016 = vst [vmem:[%s8884_s3 + $0x6d8] sm:$0xff] %v3500_v49 }
 0x2b4   :  { %v3414_v25 = vpop.f32.mrf.mxu0  ;;  %v3503_v62 = vpop.f32.mrf.mxu1 }
 0x2b5   :  { %v3415_v27 = vadd.f32 %v3414_v25, %v6599_v37  ;;  %v3504_v21 = vadd.f32 %v3503_v62, %v6599_v37 }
 0x2b6   :  { %v3416_v3 = vpop.f32.mrf.mxu0  ;;  %v3505_v44 = vpop.f32.mrf.mxu1 }
 0x2b7   :  { %5017 = vst [vmem:[%s8884_s3 + $0x6e0] sm:$0xff] %v3415_v27  ;;  %5019 = vst [vmem:[%s8884_s3 + $0x6f0] sm:$0xff] %v3504_v21  ;;  %v3417_v38 = vadd.f32 %v3416_v3, %v6599_v37  ;;  %v3506_v7 = vadd.f32 %v3505_v44, %v6599_v37 }
 0x2b9   :  { %5018 = vst [vmem:[%s8884_s3 + $0x6e8] sm:$0xff] %v3417_v38  ;;  %5020 = vst [vmem:[%s8884_s3 + $0x6f8] sm:$0xff] %v3506_v7 }
 0x2bb   :  { %v3644_v52 = vpop.f32.mrf.mxu0  ;;  %v3733_v61 = vpop.f32.mrf.mxu1 }
 0x2bc   :  { %v3645_v31 = vadd.f32 %v3644_v52, %v6399_v50  ;;  %v3734_v54 = vadd.f32 %v3733_v61, %v6399_v50 }
 0x2bd   :  { %v3646_v17 = vpop.f32.mrf.mxu0  ;;  %v3735_v29 = vpop.f32.mrf.mxu1 }
 0x2be   :  { %5081 = vst [vmem:[%s8884_s3 + $0x700] sm:$0xff] %v3645_v31  ;;  %5083 = vst [vmem:[%s8884_s3 + $0x710] sm:$0xff] %v3734_v54  ;;  %v3647_v19 = vadd.f32 %v3646_v17, %v6399_v50  ;;  %v3736_v59 = vadd.f32 %v3735_v29, %v6399_v50 }
 0x2c0   :  { %5082 = vst [vmem:[%s8884_s3 + $0x708] sm:$0xff] %v3647_v19  ;;  %5084 = vst [vmem:[%s8884_s3 + $0x718] sm:$0xff] %v3736_v59 }
 0x2c9   :  { %v3650_v2 = vpop.f32.mrf.mxu0  ;;  %v3739_v47 = vpop.f32.mrf.mxu1 }
 0x2ca   :  { %v3651_v45 = vadd.f32 %v3650_v2, %v6497_v15  ;;  %v3740_v46 = vadd.f32 %v3739_v47, %v6497_v15 }
 0x2cb   :  { %v3652_v20 = vpop.f32.mrf.mxu0  ;;  %v3741_v42 = vpop.f32.mrf.mxu1 }
 0x2cc   :  { %5085 = vst [vmem:[%s8884_s3 + $0x720] sm:$0xff] %v3651_v45  ;;  %5087 = vst [vmem:[%s8884_s3 + $0x730] sm:$0xff] %v3740_v46  ;;  %v3653_v55 = vadd.f32 %v3652_v20, %v6497_v15  ;;  %v3742_v39 = vadd.f32 %v3741_v42, %v6497_v15 }
 0x2ce   :  { %5086 = vst [vmem:[%s8884_s3 + $0x728] sm:$0xff] %v3653_v55  ;;  %5088 = vst [vmem:[%s8884_s3 + $0x738] sm:$0xff] %v3742_v39 }
 0x2cf   :  { %v3656_v14 = vpop.f32.mrf.mxu0  ;;  %v3745_v11 = vpop.f32.mrf.mxu1 }
 0x2d0   :  { %v3657_v16 = vadd.f32 %v3656_v14, %v6536_v22  ;;  %v3746_v35 = vadd.f32 %v3745_v11, %v6536_v22 }
 0x2d1   :  { %v3658_v36 = vpop.f32.mrf.mxu0  ;;  %v3747_v1 = vpop.f32.mrf.mxu1 }
 0x2d2   :  { %5089 = vst [vmem:[%s8884_s3 + $0x740] sm:$0xff] %v3657_v16  ;;  %5091 = vst [vmem:[%s8884_s3 + $0x750] sm:$0xff] %v3746_v35  ;;  %v3659_v51 = vadd.f32 %v3658_v36, %v6536_v22  ;;  %v3748_v56 = vadd.f32 %v3747_v1, %v6536_v22 }
 0x2d4   :  { %5090 = vst [vmem:[%s8884_s3 + $0x748] sm:$0xff] %v3659_v51  ;;  %5092 = vst [vmem:[%s8884_s3 + $0x758] sm:$0xff] %v3748_v56 }
 0x2d5   :  { %v3662_v13 = vpop.f32.mrf.mxu0  ;;  %v3751_v33 = vpop.f32.mrf.mxu1 }
 0x2d6   :  { %v3663_v23 = vadd.f32 %v3662_v13, %v6599_v37  ;;  %v3752_v12 = vadd.f32 %v3751_v33, %v6599_v37 }
 0x2d7   :  { %v3664_v63 = vpop.f32.mrf.mxu0  ;;  %v3753_v24 = vpop.f32.mrf.mxu1 }
 0x2d8   :  { %5093 = vst [vmem:[%s8884_s3 + $0x760] sm:$0xff] %v3663_v23  ;;  %5095 = vst [vmem:[%s8884_s3 + $0x770] sm:$0xff] %v3752_v12  ;;  %v3665_v18 = vadd.f32 %v3664_v63, %v6599_v37  ;;  %v3754_v28 = vadd.f32 %v3753_v24, %v6599_v37 }
 0x2da   :  { %5094 = vst [vmem:[%s8884_s3 + $0x768] sm:$0xff] %v3665_v18  ;;  %5096 = vst [vmem:[%s8884_s3 + $0x778] sm:$0xff] %v3754_v28 }
 0x2dd   :  { %v3892_v34 = vpop.f32.mrf.mxu0  ;;  %v3981_v6 = vpop.f32.mrf.mxu1 }
 0x2de   :  { %v3893_v26 = vadd.f32 %v3892_v34, %v6399_v50  ;;  %v3982_v5 = vadd.f32 %v3981_v6, %v6399_v50 }
 0x2df   :  { %v3894_v41 = vpop.f32.mrf.mxu0  ;;  %v3983_v30 = vpop.f32.mrf.mxu1 }
 0x2e0   :  { %5157 = vst [vmem:[%s8884_s3 + $0x780] sm:$0xff] %v3893_v26  ;;  %5159 = vst [vmem:[%s8884_s3 + $0x790] sm:$0xff] %v3982_v5  ;;  %v3895_v40 = vadd.f32 %v3894_v41, %v6399_v50  ;;  %v3984_v60 = vadd.f32 %v3983_v30, %v6399_v50 }
 0x2e1   :  { %v3898_v9 = vpop.f32.mrf.mxu0  ;;  %v3987_v8 = vpop.f32.mrf.mxu1 }
 0x2e2   :  { %5158 = vst [vmem:[%s8884_s3 + $0x788] sm:$0xff] %v3895_v40  ;;  %5160 = vst [vmem:[%s8884_s3 + $0x798] sm:$0xff] %v3984_v60  ;;  %v3899_v58 = vadd.f32 %v3898_v9, %v6497_v15  ;;  %v3988_v43 = vadd.f32 %v3987_v8, %v6497_v15 }
 0x2e3   :  { %v3900_v10 = vpop.f32.mrf.mxu0  ;;  %v3989_v57 = vpop.f32.mrf.mxu1 }
 0x2e4   :  { %5161 = vst [vmem:[%s8884_s3 + $0x7a0] sm:$0xff] %v3899_v58  ;;  %5163 = vst [vmem:[%s8884_s3 + $0x7b0] sm:$0xff] %v3988_v43  ;;  %v3901_v50 = vadd.f32 %v3900_v10, %v6497_v15  ;;  %v3990_v0 = vadd.f32 %v3989_v57, %v6497_v15 }
 0x2e5   :  { %v3904_v32 = vpop.f32.mrf.mxu0  ;;  %v3993_v4 = vpop.f32.mrf.mxu1 }
 0x2e6   :  { %5162 = vst [vmem:[%s8884_s3 + $0x7a8] sm:$0xff] %v3901_v50  ;;  %5164 = vst [vmem:[%s8884_s3 + $0x7b8] sm:$0xff] %v3990_v0  ;;  %v3905_v53 = vadd.f32 %v3904_v32, %v6536_v22  ;;  %v3994_v48 = vadd.f32 %v3993_v4, %v6536_v22 }
 0x2e7   :  { %v3906_v49 = vpop.f32.mrf.mxu0  ;;  %v3995_v25 = vpop.f32.mrf.mxu1 }
 0x2e8   :  { %5165 = vst [vmem:[%s8884_s3 + $0x7c0] sm:$0xff] %v3905_v53  ;;  %5167 = vst [vmem:[%s8884_s3 + $0x7d0] sm:$0xff] %v3994_v48  ;;  %v3907_v15 = vadd.f32 %v3906_v49, %v6536_v22  ;;  %v3996_v62 = vadd.f32 %v3995_v25, %v6536_v22 }
 0x2e9   :  { %v3910_v27 = vpop.f32.mrf.mxu0  ;;  %v3999_v21 = vpop.f32.mrf.mxu1 }
 0x2ea   :  { %5166 = vst [vmem:[%s8884_s3 + $0x7c8] sm:$0xff] %v3907_v15  ;;  %5168 = vst [vmem:[%s8884_s3 + $0x7d8] sm:$0xff] %v3996_v62  ;;  %v3911_v3 = vadd.f32 %v3910_v27, %v6599_v37  ;;  %v4000_v44 = vadd.f32 %v3999_v21, %v6599_v37 }
 0x2eb   :  { %v3912_v38 = vpop.f32.mrf.mxu0  ;;  %v4001_v7 = vpop.f32.mrf.mxu1 }
 0x2ec   :  { %5169 = vst [vmem:[%s8884_s3 + $0x7e0] sm:$0xff] %v3911_v3  ;;  %5171 = vst [vmem:[%s8884_s3 + $0x7f0] sm:$0xff] %v4000_v44  ;;  %v3913_v22 = vadd.f32 %v3912_v38, %v6599_v37  ;;  %v4002_v52 = vadd.f32 %v4001_v7, %v6599_v37 }
 0x2ee   :  { %5170 = vst [vmem:[%s8884_s3 + $0x7e8] sm:$0xff] %v3913_v22  ;;  %5172 = vst [vmem:[%s8884_s3 + $0x7f8] sm:$0xff] %v4002_v52 }

</bundles_post_ra>
